<compile_context>
chip_gen: v7x
topology: tpu7x:2x2x1
jax: 0.10.0
libtpu: 0.0.40
codegen_flags: <defaults>
</compile_context>

<pallas_src>
import functools

import jax
import jax.numpy as jnp
from jax import lax
from jax.experimental import pallas as pl
from jax.experimental.pallas import tpu as pltpu


def _round_up(x, m):
    return ((x + m - 1) // m) * m


# ----------------------------------------------------------------------------
# Fused kernel: all LSTM layers + mean over time + Linear classifier.
# One grid step == one independent batch block.
# ----------------------------------------------------------------------------
def _fused_lstm_fc_kernel(*refs, num_layers, hg, seq_len, bb):
    """Ref layout:
      inputs : x_blk (1, T*BB, D) bf16,
               [w_ih_t (Din, 4Hg) bf16, w_hh_t (Hg, 4Hg) bf16, b (1, 4Hg) f32]
                 * num_layers,
               w_fc_t (Hg, Cp) bf16, b_fc (1, Cp) f32
      outputs: out (BB, Cp) f32
      scratch: gx_scr (T*BB, 4Hg) f32, hseq_scr (T*BB, Hg) f32
    """
    Hg = hg
    BB = bb
    T = seq_len

    x_ref = refs[0]
    layer_refs = refs[1:1 + 3 * num_layers]
    w_fc_ref = refs[1 + 3 * num_layers]
    b_fc_ref = refs[2 + 3 * num_layers]
    out_ref = refs[3 + 3 * num_layers]
    gx_scr = refs[4 + 3 * num_layers]
    hseq_scr = refs[5 + 3 * num_layers]

    h_sum = None
    for layer in range(num_layers):                 # static Python layer loop
        w_ih_ref, w_hh_ref, b_ref = layer_refs[3 * layer:3 * layer + 3]
        is_last = layer == num_layers - 1

        # --- Hoisted, non-recurrent input projection: one big bf16 MXU matmul
        # over the whole sequence block, bias folded in once (f32 accumulate).
        if layer == 0:
            seq_in = x_ref[0]                                   # (T*BB, D) bf16
        else:
            seq_in = hseq_scr[...].astype(jnp.bfloat16)         # (T*BB, Hg)
        gx_scr[...] = (
            jnp.dot(seq_in, w_ih_ref[...], preferred_element_type=jnp.float32)
            + b_ref[...])

        w_hh = w_hh_ref[...]                        # (Hg, 4Hg) bf16, hoisted

        # --- Sequential recurrence: only h_prev @ W_hh + elementwise gates.
        def step(t, carry, w_hh=w_hh, is_last=is_last):
            if is_last:
                h_prev, c_prev, h_acc = carry
            else:
                h_prev, c_prev = carry
            row = pl.multiple_of(t * BB, 8)         # aligned sublane offset
            gates = gx_scr[pl.ds(row, BB), :] + jnp.dot(
                h_prev.astype(jnp.bfloat16), w_hh,
                preferred_element_type=jnp.float32)
            # PyTorch gate order [i, f, g, o]; each gate spans a full 128-lane
            # multiple (Hg), so the slices below are aligned lane tiles.
            i_g = jax.nn.sigmoid(gates[:, 0 * Hg:1 * Hg])
            f_g = jax.nn.sigmoid(gates[:, 1 * Hg:2 * Hg])
            g_g = jnp.tanh(gates[:, 2 * Hg:3 * Hg])
            o_g = jax.nn.sigmoid(gates[:, 3 * Hg:4 * Hg])
            c_new = f_g * c_prev + i_g * g_g
            h_new = o_g * jnp.tanh(c_new)
            if is_last:
                # Only the last layer's running sum feeds the classifier.
                return h_new, c_new, h_acc + h_new
            # Intermediate layers: full h sequence stays in VMEM scratch to
            # feed the next layer's hoisted projection.
            hseq_scr[pl.ds(row, BB), :] = h_new
            return h_new, c_new

        zeros = jnp.zeros((BB, Hg), jnp.float32)
        init = (zeros, zeros, zeros) if is_last else (zeros, zeros)
        carry = lax.fori_loop(0, T, step, init, unroll=min(T, 8))
        if is_last:
            h_sum = carry[2]

    # --- Fused classifier: mean(h) @ W_fc + b == mean(h @ W_fc + b).
    h_mean = h_sum * (1.0 / T)
    out_ref[...] = (
        jnp.dot(h_mean.astype(jnp.bfloat16), w_fc_ref[...],
                preferred_element_type=jnp.float32)
        + b_fc_ref[...])


# ----------------------------------------------------------------------------
# One-time parameter preparation: torch-layout f32 -> padded bf16 kernel layout
# ----------------------------------------------------------------------------
def prepare_kernel_params(params, hidden, num_classes):
    H = hidden
    Hg = _round_up(H, 128)              # per-gate lane padding
    Cp = _round_up(num_classes, 128)    # lane-dense classifier output

    def pad_gate_cols(w):               # (rows, 4H) -> (rows, 4Hg), zero pad
        r = w.shape[0]
        w = w.reshape(r, 4, H)
        w = jnp.pad(w, ((0, 0), (0, 0), (0, Hg - H)))
        return w.reshape(r, 4 * Hg)

    layers = []
    for li, layer in enumerate(params["layers"]):
        w_ih_t = pad_gate_cols(layer["w_ih"].T)                  # (Din, 4Hg)
        if li > 0:                                               # Din: H -> Hg
            w_ih_t = jnp.pad(w_ih_t, ((0, Hg - H), (0, 0)))
        w_hh_t = jnp.pad(pad_gate_cols(layer["w_hh"].T), ((0, Hg - H), (0, 0)))
        b = pad_gate_cols((layer["b_ih"] + layer["b_hh"]).reshape(1, 4 * H))
        layers.append({
            "w_ih_t": w_ih_t.astype(jnp.bfloat16),
            "w_hh_t": w_hh_t.astype(jnp.bfloat16),
            "b": b.astype(jnp.float32),
        })

    w_fc_t = jnp.pad(params["w_fc"].T,
                     ((0, Hg - H), (0, Cp - num_classes))).astype(jnp.bfloat16)
    b_fc = jnp.pad(params["b_fc"].reshape(1, -1),
                   ((0, 0), (0, Cp - num_classes))).astype(jnp.float32)
    return {"layers": layers, "w_fc_t": w_fc_t, "b_fc": b_fc}


# ----------------------------------------------------------------------------
# Wrapper.
# ----------------------------------------------------------------------------
@functools.partial(jax.jit, static_argnames=("num_classes",))
def lstm_model_forward(kparams, x, target=None, frame_num=None, *, num_classes):
    """x: (B, T, D) -> (B, num_classes); matches torch.mean(fc(lstm(x)[0]), 1)
    for mask_empty_frame=False (target / frame_num unused in that config)."""
    del target, frame_num
    B, T, D = x.shape
    num_layers = len(kparams["layers"])
    Hg = kparams["layers"][0]["w_hh_t"].shape[0]
    Cp = kparams["w_fc_t"].shape[1]

    # Batch blocking: one grid step per independent batch block ("parallel").
    if B <= 128:
        BB = _round_up(B, 8)
        Bp = BB
    else:
        BB = 128
        Bp = _round_up(B, 128)
    n_blocks = Bp // BB

    # Time-major, batch-padded, pre-blocked bf16 layout: (n_blocks, T*BB, D).
    x_tm = jnp.transpose(x, (1, 0, 2)).astype(jnp.bfloat16)     # (T, B, D)
    x_tm = jnp.pad(x_tm, ((0, 0), (0, Bp - B), (0, 0)))         # (T, Bp, D)
    x_blk = (x_tm.reshape(T, n_blocks, BB, D)
             .transpose(1, 0, 2, 3)
             .reshape(n_blocks, T * BB, D))

    flat_w = []
    for layer in kparams["layers"]:
        flat_w += [layer["w_ih_t"], layer["w_hh_t"], layer["b"]]
    flat_w += [kparams["w_fc_t"], kparams["b_fc"]]

    kernel = functools.partial(
        _fused_lstm_fc_kernel, num_layers=num_layers, hg=Hg, seq_len=T, bb=BB)

    out = pl.pallas_call(
        kernel,
        out_shape=jax.ShapeDtypeStruct((Bp, Cp), jnp.float32),
        grid_spec=pltpu.PrefetchScalarGridSpec(
            num_scalar_prefetch=0,
            grid=(n_blocks,),
            in_specs=[pl.BlockSpec((1, T * BB, D), lambda j: (j, 0, 0))]
                     + [pl.BlockSpec(w.shape, lambda j: (0, 0)) for w in flat_w],
            out_specs=pl.BlockSpec((BB, Cp), lambda j: (j, 0)),
            scratch_shapes=[
                pltpu.VMEM((T * BB, 4 * Hg), jnp.float32),   # hoisted x-proj
                pltpu.VMEM((T * BB, Hg), jnp.float32),       # inter-layer h
            ]),
        compiler_params=pltpu.CompilerParams(
            dimension_semantics=("parallel",),
            vmem_limit_bytes=48 * 1024 * 1024),
    )(x_blk, *flat_w)
    return out[:B, :num_classes]


# ----------------------------------------------------------------------------
# Parameter init (deterministic, torch-layout shapes of nn.LSTM / nn.Linear).
# ----------------------------------------------------------------------------
def init_params(key, input_size, hidden, num_layers, num_classes):
    k = 1.0 / jnp.sqrt(jnp.float32(hidden))
    params = {"layers": []}
    for layer in range(num_layers):
        in_dim = input_size if layer == 0 else hidden
        key, k1, k2, k3, k4 = jax.random.split(key, 5)
        params["layers"].append({
            "w_ih": jax.random.uniform(k1, (4 * hidden, in_dim), jnp.float32, -k, k),
            "w_hh": jax.random.uniform(k2, (4 * hidden, hidden), jnp.float32, -k, k),
            "b_ih": jax.random.uniform(k3, (4 * hidden,), jnp.float32, -k, k),
            "b_hh": jax.random.uniform(k4, (4 * hidden,), jnp.float32, -k, k),
        })
    key, k5, k6 = jax.random.split(key, 3)
    params["w_fc"] = jax.random.uniform(k5, (num_classes, hidden), jnp.float32, -k, k)
    params["b_fc"] = jax.random.uniform(k6, (num_classes,), jnp.float32, -k, k)
    return params


# ----------------------------------------------------------------------------
# Pure-JAX f32 reference (correctness check for the Pallas kernel).
# ----------------------------------------------------------------------------
def reference_forward(params, x, hidden):
    H = hidden
    h_seq = jnp.transpose(x, (1, 0, 2)).astype(jnp.float32)     # (T, B, D)
    B = h_seq.shape[1]

    def run_layer(h_seq, w_ih_t, w_hh_t, b):
        def step(carry, x_t):
            h, c = carry
            g = x_t @ w_ih_t + h @ w_hh_t + b
            i = jax.nn.sigmoid(g[:, 0 * H:1 * H])
            f = jax.nn.sigmoid(g[:, 1 * H:2 * H])
            gg = jnp.tanh(g[:, 2 * H:3 * H])
            o = jax.nn.sigmoid(g[:, 3 * H:4 * H])
            c = f * c + i * gg
            h = o * jnp.tanh(c)
            return (h, c), h
        init = (jnp.zeros((B, H), jnp.float32), jnp.zeros((B, H), jnp.float32))
        _, out = lax.scan(step, init, h_seq)
        return out

    for layer in params["layers"]:
        h_seq = run_layer(h_seq, layer["w_ih"].T, layer["w_hh"].T,
                          (layer["b_ih"] + layer["b_hh"])[None, :])
    logits = (jnp.einsum("tbh,ch->tbc", h_seq, params["w_fc"])
              + params["b_fc"][None, None, :])
    return jnp.mean(logits, axis=0)


if __name__ == "__main__":
    batch, time_step = 2, 8
    input_size, hidden, num_layers, num_classes = 16, 32, 2, 10

    key = jax.random.PRNGKey(0)
    key, kx, kp = jax.random.split(key, 3)
    x = jax.random.normal(kx, (batch, time_step, input_size), jnp.float32)
    frame_num = jnp.full((batch, 1), time_step, jnp.int32)   # unused (no masking)
    params = init_params(kp, input_size, hidden, num_layers, num_classes)
    kparams = prepare_kernel_params(params, hidden, num_classes)

    out = lstm_model_forward(kparams, x, None, frame_num, num_classes=num_classes)
    out = jax.block_until_ready(out)

    ref = reference_forward(params, x, hidden)
    assert out.shape == (batch, num_classes)
    # bf16 MXU inputs (f32 accumulation) vs. pure-f32 reference -> loose tol.
    assert jnp.allclose(out, ref, atol=3e-2, rtol=3e-2), "mismatch vs reference"

    print("KERNEL_OK")
</pallas_src>

<mosaic_0001>
module attributes {stable_mosaic.version = 11 : i64} {
  func.func @_fused_lstm_fc_kernel(%arg0: i32, %arg1: memref<1x64x16xbf16, #tpu.memory_space<vmem>>, %arg2: memref<16x512xbf16, #tpu.memory_space<vmem>>, %arg3: memref<128x512xbf16, #tpu.memory_space<vmem>>, %arg4: memref<1x512xf32, #tpu.memory_space<vmem>>, %arg5: memref<128x512xbf16, #tpu.memory_space<vmem>>, %arg6: memref<128x512xbf16, #tpu.memory_space<vmem>>, %arg7: memref<1x512xf32, #tpu.memory_space<vmem>>, %arg8: memref<128x128xbf16, #tpu.memory_space<vmem>>, %arg9: memref<1x128xf32, #tpu.memory_space<vmem>>, %arg10: memref<8x128xf32, #tpu.memory_space<vmem>>, %arg11: memref<64x512xf32, #tpu.memory_space<vmem>>, %arg12: memref<64x128xf32, #tpu.memory_space<vmem>>) attributes {dimension_semantics = [#tpu.dimension_semantics<parallel>], iteration_bounds = array<i64: 1>, scalar_prefetch = 0 : i64, scratch_operands = 2 : i64, tpu.core_type = #tpu.core_type<tc>, window_params = [{transform_indices = @transform_0, window_bounds = array<i64: 1, 64, 16>}, {pipeline_mode = #tpu.pipeline_mode<synchronous>, transform_indices = @transform_1, window_bounds = array<i64: 16, 512>}, {pipeline_mode = #tpu.pipeline_mode<synchronous>, transform_indices = @transform_2, window_bounds = array<i64: 128, 512>}, {pipeline_mode = #tpu.pipeline_mode<synchronous>, transform_indices = @transform_3, window_bounds = array<i64: 1, 512>}, {pipeline_mode = #tpu.pipeline_mode<synchronous>, transform_indices = @transform_4, window_bounds = array<i64: 128, 512>}, {pipeline_mode = #tpu.pipeline_mode<synchronous>, transform_indices = @transform_5, window_bounds = array<i64: 128, 512>}, {pipeline_mode = #tpu.pipeline_mode<synchronous>, transform_indices = @transform_6, window_bounds = array<i64: 1, 512>}, {pipeline_mode = #tpu.pipeline_mode<synchronous>, transform_indices = @transform_7, window_bounds = array<i64: 128, 128>}, {pipeline_mode = #tpu.pipeline_mode<synchronous>, transform_indices = @transform_8, window_bounds = array<i64: 1, 128>}, {transform_indices = @transform_9, window_bounds = array<i64: 8, 128>}]} {
    %c0 = arith.constant 0 : index
    %c0_0 = arith.constant 0 : index
    %c0_1 = arith.constant 0 : index
    %0 = vector.load %arg1[%c0, %c0_0, %c0_1] : memref<1x64x16xbf16, #tpu.memory_space<vmem>>, vector<1x64x16xbf16>
    %1 = vector.shape_cast %0 : vector<1x64x16xbf16> to vector<64x16xbf16>
    %c0_2 = arith.constant 0 : index
    %c0_3 = arith.constant 0 : index
    %2 = vector.load %arg2[%c0_2, %c0_3] : memref<16x512xbf16, #tpu.memory_space<vmem>>, vector<16x512xbf16>
    %cst = arith.constant dense<0.000000e+00> : vector<64x512xf32>
    %3 = tpu.matmul %1, %2, %cst {dimension_numbers = #tpu.dot_dimension_numbers<[1], [0], [0], [1], [0, 0, 1, 1], [], []>} : vector<64x16xbf16>, vector<16x512xbf16>, vector<64x512xf32> -> vector<64x512xf32>
    %c0_4 = arith.constant 0 : index
    %c0_5 = arith.constant 0 : index
    %4 = vector.load %arg4[%c0_4, %c0_5] : memref<1x512xf32, #tpu.memory_space<vmem>>, vector<1x512xf32>
    %5 = vector.broadcast %4 : vector<1x512xf32> to vector<64x512xf32>
    %6 = arith.addf %3, %5 : vector<64x512xf32>
    %c0_6 = arith.constant 0 : index
    %c0_7 = arith.constant 0 : index
    %7 = vector.load %arg11[%c0_6, %c0_7] : memref<64x512xf32, #tpu.memory_space<vmem>>, vector<64x512xf32>
    tpu.vector_store %arg11[%c0_6, %c0_7], %6 {strides = array<i32>} : memref<64x512xf32, #tpu.memory_space<vmem>>, vector<64x512xf32>,
    %c0_8 = arith.constant 0 : index
    %c0_9 = arith.constant 0 : index
    %8 = vector.load %arg3[%c0_8, %c0_9] : memref<128x512xbf16, #tpu.memory_space<vmem>>, vector<128x512xbf16>
    %cst_10 = arith.constant 0.000000e+00 : f32
    %9 = vector.broadcast %cst_10 : f32 to vector<8x128xf32>
    %c0_i32 = arith.constant 0 : i32
    %c8_i32 = arith.constant 8 : i32
    %10 = arith.muli %c0_i32, %c8_i32 : i32
    %11 = tpu.assume_multiple %10, 8 : i32
    %12 = arith.index_cast %11 : i32 to index
    %c0_11 = arith.constant 0 : index
    %13 = vector.load %arg11[%12, %c0_11] : memref<64x512xf32, #tpu.memory_space<vmem>>, vector<8x512xf32>
    %14 = arith.truncf %9 : vector<8x128xf32> to vector<8x128xbf16>
    %cst_12 = arith.constant dense<0.000000e+00> : vector<8x512xf32>
    %15 = tpu.matmul %14, %8, %cst_12 {dimension_numbers = #tpu.dot_dimension_numbers<[1], [0], [0], [1], [0, 0, 1, 1], [], []>} : vector<8x128xbf16>, vector<128x512xbf16>, vector<8x512xf32> -> vector<8x512xf32>
    %16 = arith.addf %13, %15 : vector<8x512xf32>
    %17 = vector.extract_strided_slice %16 {offsets = [0, 0], sizes = [8, 128], strides = [1, 1]} : vector<8x512xf32> to vector<8x128xf32>
    %18 = arith.negf %17 : vector<8x128xf32>
    %19 = math.exp %18 : vector<8x128xf32>
    %cst_13 = arith.constant 1.000000e+00 : f32
    %20 = vector.broadcast %cst_13 : f32 to vector<8x128xf32>
    %21 = arith.addf %20, %19 : vector<8x128xf32>
    %22 = arith.divf %20, %21 : vector<8x128xf32>
    %23 = vector.extract_strided_slice %16 {offsets = [0, 128], sizes = [8, 128], strides = [1, 1]} : vector<8x512xf32> to vector<8x128xf32>
    %24 = arith.negf %23 : vector<8x128xf32>
    %25 = math.exp %24 : vector<8x128xf32>
    %cst_14 = arith.constant 1.000000e+00 : f32
    %26 = vector.broadcast %cst_14 : f32 to vector<8x128xf32>
    %27 = arith.addf %26, %25 : vector<8x128xf32>
    %28 = arith.divf %26, %27 : vector<8x128xf32>
    %29 = vector.extract_strided_slice %16 {offsets = [0, 256], sizes = [8, 128], strides = [1, 1]} : vector<8x512xf32> to vector<8x128xf32>
    %30 = math.tanh %29 : vector<8x128xf32>
    %31 = vector.extract_strided_slice %16 {offsets = [0, 384], sizes = [8, 128], strides = [1, 1]} : vector<8x512xf32> to vector<8x128xf32>
    %32 = arith.negf %31 : vector<8x128xf32>
    %33 = math.exp %32 : vector<8x128xf32>
    %cst_15 = arith.constant 1.000000e+00 : f32
    %34 = vector.broadcast %cst_15 : f32 to vector<8x128xf32>
    %35 = arith.addf %34, %33 : vector<8x128xf32>
    %36 = arith.divf %34, %35 : vector<8x128xf32>
    %37 = arith.mulf %28, %9 : vector<8x128xf32>
    %38 = arith.mulf %22, %30 : vector<8x128xf32>
    %39 = arith.addf %37, %38 : vector<8x128xf32>
    %40 = math.tanh %39 : vector<8x128xf32>
    %41 = arith.mulf %36, %40 : vector<8x128xf32>
    %42 = arith.index_cast %11 : i32 to index
    %c0_16 = arith.constant 0 : index
    %43 = vector.load %arg12[%42, %c0_16] : memref<64x128xf32, #tpu.memory_space<vmem>>, vector<8x128xf32>
    tpu.vector_store %arg12[%42, %c0_16], %41 {strides = array<i32>} : memref<64x128xf32, #tpu.memory_space<vmem>>, vector<8x128xf32>,
    %c1_i32 = arith.constant 1 : i32
    %c8_i32_17 = arith.constant 8 : i32
    %44 = arith.muli %c1_i32, %c8_i32_17 : i32
    %45 = tpu.assume_multiple %44, 8 : i32
    %46 = arith.index_cast %45 : i32 to index
    %c0_18 = arith.constant 0 : index
    %47 = vector.load %arg11[%46, %c0_18] : memref<64x512xf32, #tpu.memory_space<vmem>>, vector<8x512xf32>
    %48 = arith.truncf %41 : vector<8x128xf32> to vector<8x128xbf16>
    %cst_19 = arith.constant dense<0.000000e+00> : vector<8x512xf32>
    %49 = tpu.matmul %48, %8, %cst_19 {dimension_numbers = #tpu.dot_dimension_numbers<[1], [0], [0], [1], [0, 0, 1, 1], [], []>} : vector<8x128xbf16>, vector<128x512xbf16>, vector<8x512xf32> -> vector<8x512xf32>
    %50 = arith.addf %47, %49 : vector<8x512xf32>
    %51 = vector.extract_strided_slice %50 {offsets = [0, 0], sizes = [8, 128], strides = [1, 1]} : vector<8x512xf32> to vector<8x128xf32>
    %52 = arith.negf %51 : vector<8x128xf32>
    %53 = math.exp %52 : vector<8x128xf32>
    %cst_20 = arith.constant 1.000000e+00 : f32
    %54 = vector.broadcast %cst_20 : f32 to vector<8x128xf32>
    %55 = arith.addf %54, %53 : vector<8x128xf32>
    %56 = arith.divf %54, %55 : vector<8x128xf32>
    %57 = vector.extract_strided_slice %50 {offsets = [0, 128], sizes = [8, 128], strides = [1, 1]} : vector<8x512xf32> to vector<8x128xf32>
    %58 = arith.negf %57 : vector<8x128xf32>
    %59 = math.exp %58 : vector<8x128xf32>
    %cst_21 = arith.constant 1.000000e+00 : f32
    %60 = vector.broadcast %cst_21 : f32 to vector<8x128xf32>
    %61 = arith.addf %60, %59 : vector<8x128xf32>
    %62 = arith.divf %60, %61 : vector<8x128xf32>
    %63 = vector.extract_strided_slice %50 {offsets = [0, 256], sizes = [8, 128], strides = [1, 1]} : vector<8x512xf32> to vector<8x128xf32>
    %64 = math.tanh %63 : vector<8x128xf32>
    %65 = vector.extract_strided_slice %50 {offsets = [0, 384], sizes = [8, 128], strides = [1, 1]} : vector<8x512xf32> to vector<8x128xf32>
    %66 = arith.negf %65 : vector<8x128xf32>
    %67 = math.exp %66 : vector<8x128xf32>
    %cst_22 = arith.constant 1.000000e+00 : f32
    %68 = vector.broadcast %cst_22 : f32 to vector<8x128xf32>
    %69 = arith.addf %68, %67 : vector<8x128xf32>
    %70 = arith.divf %68, %69 : vector<8x128xf32>
    %71 = arith.mulf %62, %39 : vector<8x128xf32>
    %72 = arith.mulf %56, %64 : vector<8x128xf32>
    %73 = arith.addf %71, %72 : vector<8x128xf32>
    %74 = math.tanh %73 : vector<8x128xf32>
    %75 = arith.mulf %70, %74 : vector<8x128xf32>
    %76 = arith.index_cast %45 : i32 to index
    %c0_23 = arith.constant 0 : index
    %77 = vector.load %arg12[%76, %c0_23] : memref<64x128xf32, #tpu.memory_space<vmem>>, vector<8x128xf32>
    tpu.vector_store %arg12[%76, %c0_23], %75 {strides = array<i32>} : memref<64x128xf32, #tpu.memory_space<vmem>>, vector<8x128xf32>,
    %c2_i32 = arith.constant 2 : i32
    %c8_i32_24 = arith.constant 8 : i32
    %78 = arith.muli %c2_i32, %c8_i32_24 : i32
    %79 = tpu.assume_multiple %78, 8 : i32
    %80 = arith.index_cast %79 : i32 to index
    %c0_25 = arith.constant 0 : index
    %81 = vector.load %arg11[%80, %c0_25] : memref<64x512xf32, #tpu.memory_space<vmem>>, vector<8x512xf32>
    %82 = arith.truncf %75 : vector<8x128xf32> to vector<8x128xbf16>
    %cst_26 = arith.constant dense<0.000000e+00> : vector<8x512xf32>
    %83 = tpu.matmul %82, %8, %cst_26 {dimension_numbers = #tpu.dot_dimension_numbers<[1], [0], [0], [1], [0, 0, 1, 1], [], []>} : vector<8x128xbf16>, vector<128x512xbf16>, vector<8x512xf32> -> vector<8x512xf32>
    %84 = arith.addf %81, %83 : vector<8x512xf32>
    %85 = vector.extract_strided_slice %84 {offsets = [0, 0], sizes = [8, 128], strides = [1, 1]} : vector<8x512xf32> to vector<8x128xf32>
    %86 = arith.negf %85 : vector<8x128xf32>
    %87 = math.exp %86 : vector<8x128xf32>
    %cst_27 = arith.constant 1.000000e+00 : f32
    %88 = vector.broadcast %cst_27 : f32 to vector<8x128xf32>
    %89 = arith.addf %88, %87 : vector<8x128xf32>
    %90 = arith.divf %88, %89 : vector<8x128xf32>
    %91 = vector.extract_strided_slice %84 {offsets = [0, 128], sizes = [8, 128], strides = [1, 1]} : vector<8x512xf32> to vector<8x128xf32>
    %92 = arith.negf %91 : vector<8x128xf32>
    %93 = math.exp %92 : vector<8x128xf32>
    %cst_28 = arith.constant 1.000000e+00 : f32
    %94 = vector.broadcast %cst_28 : f32 to vector<8x128xf32>
    %95 = arith.addf %94, %93 : vector<8x128xf32>
    %96 = arith.divf %94, %95 : vector<8x128xf32>
    %97 = vector.extract_strided_slice %84 {offsets = [0, 256], sizes = [8, 128], strides = [1, 1]} : vector<8x512xf32> to vector<8x128xf32>
    %98 = math.tanh %97 : vector<8x128xf32>
    %99 = vector.extract_strided_slice %84 {offsets = [0, 384], sizes = [8, 128], strides = [1, 1]} : vector<8x512xf32> to vector<8x128xf32>
    %100 = arith.negf %99 : vector<8x128xf32>
    %101 = math.exp %100 : vector<8x128xf32>
    %cst_29 = arith.constant 1.000000e+00 : f32
    %102 = vector.broadcast %cst_29 : f32 to vector<8x128xf32>
    %103 = arith.addf %102, %101 : vector<8x128xf32>
    %104 = arith.divf %102, %103 : vector<8x128xf32>
    %105 = arith.mulf %96, %73 : vector<8x128xf32>
    %106 = arith.mulf %90, %98 : vector<8x128xf32>
    %107 = arith.addf %105, %106 : vector<8x128xf32>
    %108 = math.tanh %107 : vector<8x128xf32>
    %109 = arith.mulf %104, %108 : vector<8x128xf32>
    %110 = arith.index_cast %79 : i32 to index
    %c0_30 = arith.constant 0 : index
    %111 = vector.load %arg12[%110, %c0_30] : memref<64x128xf32, #tpu.memory_space<vmem>>, vector<8x128xf32>
    tpu.vector_store %arg12[%110, %c0_30], %109 {strides = array<i32>} : memref<64x128xf32, #tpu.memory_space<vmem>>, vector<8x128xf32>,
    %c3_i32 = arith.constant 3 : i32
    %c8_i32_31 = arith.constant 8 : i32
    %112 = arith.muli %c3_i32, %c8_i32_31 : i32
    %113 = tpu.assume_multiple %112, 8 : i32
    %114 = arith.index_cast %113 : i32 to index
    %c0_32 = arith.constant 0 : index
    %115 = vector.load %arg11[%114, %c0_32] : memref<64x512xf32, #tpu.memory_space<vmem>>, vector<8x512xf32>
    %116 = arith.truncf %109 : vector<8x128xf32> to vector<8x128xbf16>
    %cst_33 = arith.constant dense<0.000000e+00> : vector<8x512xf32>
    %117 = tpu.matmul %116, %8, %cst_33 {dimension_numbers = #tpu.dot_dimension_numbers<[1], [0], [0], [1], [0, 0, 1, 1], [], []>} : vector<8x128xbf16>, vector<128x512xbf16>, vector<8x512xf32> -> vector<8x512xf32>
    %118 = arith.addf %115, %117 : vector<8x512xf32>
    %119 = vector.extract_strided_slice %118 {offsets = [0, 0], sizes = [8, 128], strides = [1, 1]} : vector<8x512xf32> to vector<8x128xf32>
    %120 = arith.negf %119 : vector<8x128xf32>
    %121 = math.exp %120 : vector<8x128xf32>
    %cst_34 = arith.constant 1.000000e+00 : f32
    %122 = vector.broadcast %cst_34 : f32 to vector<8x128xf32>
    %123 = arith.addf %122, %121 : vector<8x128xf32>
    %124 = arith.divf %122, %123 : vector<8x128xf32>
    %125 = vector.extract_strided_slice %118 {offsets = [0, 128], sizes = [8, 128], strides = [1, 1]} : vector<8x512xf32> to vector<8x128xf32>
    %126 = arith.negf %125 : vector<8x128xf32>
    %127 = math.exp %126 : vector<8x128xf32>
    %cst_35 = arith.constant 1.000000e+00 : f32
    %128 = vector.broadcast %cst_35 : f32 to vector<8x128xf32>
    %129 = arith.addf %128, %127 : vector<8x128xf32>
    %130 = arith.divf %128, %129 : vector<8x128xf32>
    %131 = vector.extract_strided_slice %118 {offsets = [0, 256], sizes = [8, 128], strides = [1, 1]} : vector<8x512xf32> to vector<8x128xf32>
    %132 = math.tanh %131 : vector<8x128xf32>
    %133 = vector.extract_strided_slice %118 {offsets = [0, 384], sizes = [8, 128], strides = [1, 1]} : vector<8x512xf32> to vector<8x128xf32>
    %134 = arith.negf %133 : vector<8x128xf32>
    %135 = math.exp %134 : vector<8x128xf32>
    %cst_36 = arith.constant 1.000000e+00 : f32
    %136 = vector.broadcast %cst_36 : f32 to vector<8x128xf32>
    %137 = arith.addf %136, %135 : vector<8x128xf32>
    %138 = arith.divf %136, %137 : vector<8x128xf32>
    %139 = arith.mulf %130, %107 : vector<8x128xf32>
    %140 = arith.mulf %124, %132 : vector<8x128xf32>
    %141 = arith.addf %139, %140 : vector<8x128xf32>
    %142 = math.tanh %141 : vector<8x128xf32>
    %143 = arith.mulf %138, %142 : vector<8x128xf32>
    %144 = arith.index_cast %113 : i32 to index
    %c0_37 = arith.constant 0 : index
    %145 = vector.load %arg12[%144, %c0_37] : memref<64x128xf32, #tpu.memory_space<vmem>>, vector<8x128xf32>
    tpu.vector_store %arg12[%144, %c0_37], %143 {strides = array<i32>} : memref<64x128xf32, #tpu.memory_space<vmem>>, vector<8x128xf32>,
    %c4_i32 = arith.constant 4 : i32
    %c8_i32_38 = arith.constant 8 : i32
    %146 = arith.muli %c4_i32, %c8_i32_38 : i32
    %147 = tpu.assume_multiple %146, 8 : i32
    %148 = arith.index_cast %147 : i32 to index
    %c0_39 = arith.constant 0 : index
    %149 = vector.load %arg11[%148, %c0_39] : memref<64x512xf32, #tpu.memory_space<vmem>>, vector<8x512xf32>
    %150 = arith.truncf %143 : vector<8x128xf32> to vector<8x128xbf16>
    %cst_40 = arith.constant dense<0.000000e+00> : vector<8x512xf32>
    %151 = tpu.matmul %150, %8, %cst_40 {dimension_numbers = #tpu.dot_dimension_numbers<[1], [0], [0], [1], [0, 0, 1, 1], [], []>} : vector<8x128xbf16>, vector<128x512xbf16>, vector<8x512xf32> -> vector<8x512xf32>
    %152 = arith.addf %149, %151 : vector<8x512xf32>
    %153 = vector.extract_strided_slice %152 {offsets = [0, 0], sizes = [8, 128], strides = [1, 1]} : vector<8x512xf32> to vector<8x128xf32>
    %154 = arith.negf %153 : vector<8x128xf32>
    %155 = math.exp %154 : vector<8x128xf32>
    %cst_41 = arith.constant 1.000000e+00 : f32
    %156 = vector.broadcast %cst_41 : f32 to vector<8x128xf32>
    %157 = arith.addf %156, %155 : vector<8x128xf32>
    %158 = arith.divf %156, %157 : vector<8x128xf32>
    %159 = vector.extract_strided_slice %152 {offsets = [0, 128], sizes = [8, 128], strides = [1, 1]} : vector<8x512xf32> to vector<8x128xf32>
    %160 = arith.negf %159 : vector<8x128xf32>
    %161 = math.exp %160 : vector<8x128xf32>
    %cst_42 = arith.constant 1.000000e+00 : f32
    %162 = vector.broadcast %cst_42 : f32 to vector<8x128xf32>
    %163 = arith.addf %162, %161 : vector<8x128xf32>
    %164 = arith.divf %162, %163 : vector<8x128xf32>
    %165 = vector.extract_strided_slice %152 {offsets = [0, 256], sizes = [8, 128], strides = [1, 1]} : vector<8x512xf32> to vector<8x128xf32>
    %166 = math.tanh %165 : vector<8x128xf32>
    %167 = vector.extract_strided_slice %152 {offsets = [0, 384], sizes = [8, 128], strides = [1, 1]} : vector<8x512xf32> to vector<8x128xf32>
    %168 = arith.negf %167 : vector<8x128xf32>
    %169 = math.exp %168 : vector<8x128xf32>
    %cst_43 = arith.constant 1.000000e+00 : f32
    %170 = vector.broadcast %cst_43 : f32 to vector<8x128xf32>
    %171 = arith.addf %170, %169 : vector<8x128xf32>
    %172 = arith.divf %170, %171 : vector<8x128xf32>
    %173 = arith.mulf %164, %141 : vector<8x128xf32>
    %174 = arith.mulf %158, %166 : vector<8x128xf32>
    %175 = arith.addf %173, %174 : vector<8x128xf32>
    %176 = math.tanh %175 : vector<8x128xf32>
    %177 = arith.mulf %172, %176 : vector<8x128xf32>
    %178 = arith.index_cast %147 : i32 to index
    %c0_44 = arith.constant 0 : index
    %179 = vector.load %arg12[%178, %c0_44] : memref<64x128xf32, #tpu.memory_space<vmem>>, vector<8x128xf32>
    tpu.vector_store %arg12[%178, %c0_44], %177 {strides = array<i32>} : memref<64x128xf32, #tpu.memory_space<vmem>>, vector<8x128xf32>,
    %c5_i32 = arith.constant 5 : i32
    %c8_i32_45 = arith.constant 8 : i32
    %180 = arith.muli %c5_i32, %c8_i32_45 : i32
    %181 = tpu.assume_multiple %180, 8 : i32
    %182 = arith.index_cast %181 : i32 to index
    %c0_46 = arith.constant 0 : index
    %183 = vector.load %arg11[%182, %c0_46] : memref<64x512xf32, #tpu.memory_space<vmem>>, vector<8x512xf32>
    %184 = arith.truncf %177 : vector<8x128xf32> to vector<8x128xbf16>
    %cst_47 = arith.constant dense<0.000000e+00> : vector<8x512xf32>
    %185 = tpu.matmul %184, %8, %cst_47 {dimension_numbers = #tpu.dot_dimension_numbers<[1], [0], [0], [1], [0, 0, 1, 1], [], []>} : vector<8x128xbf16>, vector<128x512xbf16>, vector<8x512xf32> -> vector<8x512xf32>
    %186 = arith.addf %183, %185 : vector<8x512xf32>
    %187 = vector.extract_strided_slice %186 {offsets = [0, 0], sizes = [8, 128], strides = [1, 1]} : vector<8x512xf32> to vector<8x128xf32>
    %188 = arith.negf %187 : vector<8x128xf32>
    %189 = math.exp %188 : vector<8x128xf32>
    %cst_48 = arith.constant 1.000000e+00 : f32
    %190 = vector.broadcast %cst_48 : f32 to vector<8x128xf32>
    %191 = arith.addf %190, %189 : vector<8x128xf32>
    %192 = arith.divf %190, %191 : vector<8x128xf32>
    %193 = vector.extract_strided_slice %186 {offsets = [0, 128], sizes = [8, 128], strides = [1, 1]} : vector<8x512xf32> to vector<8x128xf32>
    %194 = arith.negf %193 : vector<8x128xf32>
    %195 = math.exp %194 : vector<8x128xf32>
    %cst_49 = arith.constant 1.000000e+00 : f32
    %196 = vector.broadcast %cst_49 : f32 to vector<8x128xf32>
    %197 = arith.addf %196, %195 : vector<8x128xf32>
    %198 = arith.divf %196, %197 : vector<8x128xf32>
    %199 = vector.extract_strided_slice %186 {offsets = [0, 256], sizes = [8, 128], strides = [1, 1]} : vector<8x512xf32> to vector<8x128xf32>
    %200 = math.tanh %199 : vector<8x128xf32>
    %201 = vector.extract_strided_slice %186 {offsets = [0, 384], sizes = [8, 128], strides = [1, 1]} : vector<8x512xf32> to vector<8x128xf32>
    %202 = arith.negf %201 : vector<8x128xf32>
    %203 = math.exp %202 : vector<8x128xf32>
    %cst_50 = arith.constant 1.000000e+00 : f32
    %204 = vector.broadcast %cst_50 : f32 to vector<8x128xf32>
    %205 = arith.addf %204, %203 : vector<8x128xf32>
    %206 = arith.divf %204, %205 : vector<8x128xf32>
    %207 = arith.mulf %198, %175 : vector<8x128xf32>
    %208 = arith.mulf %192, %200 : vector<8x128xf32>
    %209 = arith.addf %207, %208 : vector<8x128xf32>
    %210 = math.tanh %209 : vector<8x128xf32>
    %211 = arith.mulf %206, %210 : vector<8x128xf32>
    %212 = arith.index_cast %181 : i32 to index
    %c0_51 = arith.constant 0 : index
    %213 = vector.load %arg12[%212, %c0_51] : memref<64x128xf32, #tpu.memory_space<vmem>>, vector<8x128xf32>
    tpu.vector_store %arg12[%212, %c0_51], %211 {strides = array<i32>} : memref<64x128xf32, #tpu.memory_space<vmem>>, vector<8x128xf32>,
    %c6_i32 = arith.constant 6 : i32
    %c8_i32_52 = arith.constant 8 : i32
    %214 = arith.muli %c6_i32, %c8_i32_52 : i32
    %215 = tpu.assume_multiple %214, 8 : i32
    %216 = arith.index_cast %215 : i32 to index
    %c0_53 = arith.constant 0 : index
    %217 = vector.load %arg11[%216, %c0_53] : memref<64x512xf32, #tpu.memory_space<vmem>>, vector<8x512xf32>
    %218 = arith.truncf %211 : vector<8x128xf32> to vector<8x128xbf16>
    %cst_54 = arith.constant dense<0.000000e+00> : vector<8x512xf32>
    %219 = tpu.matmul %218, %8, %cst_54 {dimension_numbers = #tpu.dot_dimension_numbers<[1], [0], [0], [1], [0, 0, 1, 1], [], []>} : vector<8x128xbf16>, vector<128x512xbf16>, vector<8x512xf32> -> vector<8x512xf32>
    %220 = arith.addf %217, %219 : vector<8x512xf32>
    %221 = vector.extract_strided_slice %220 {offsets = [0, 0], sizes = [8, 128], strides = [1, 1]} : vector<8x512xf32> to vector<8x128xf32>
    %222 = arith.negf %221 : vector<8x128xf32>
    %223 = math.exp %222 : vector<8x128xf32>
    %cst_55 = arith.constant 1.000000e+00 : f32
    %224 = vector.broadcast %cst_55 : f32 to vector<8x128xf32>
    %225 = arith.addf %224, %223 : vector<8x128xf32>
    %226 = arith.divf %224, %225 : vector<8x128xf32>
    %227 = vector.extract_strided_slice %220 {offsets = [0, 128], sizes = [8, 128], strides = [1, 1]} : vector<8x512xf32> to vector<8x128xf32>
    %228 = arith.negf %227 : vector<8x128xf32>
    %229 = math.exp %228 : vector<8x128xf32>
    %cst_56 = arith.constant 1.000000e+00 : f32
    %230 = vector.broadcast %cst_56 : f32 to vector<8x128xf32>
    %231 = arith.addf %230, %229 : vector<8x128xf32>
    %232 = arith.divf %230, %231 : vector<8x128xf32>
    %233 = vector.extract_strided_slice %220 {offsets = [0, 256], sizes = [8, 128], strides = [1, 1]} : vector<8x512xf32> to vector<8x128xf32>
    %234 = math.tanh %233 : vector<8x128xf32>
    %235 = vector.extract_strided_slice %220 {offsets = [0, 384], sizes = [8, 128], strides = [1, 1]} : vector<8x512xf32> to vector<8x128xf32>
    %236 = arith.negf %235 : vector<8x128xf32>
    %237 = math.exp %236 : vector<8x128xf32>
    %cst_57 = arith.constant 1.000000e+00 : f32
    %238 = vector.broadcast %cst_57 : f32 to vector<8x128xf32>
    %239 = arith.addf %238, %237 : vector<8x128xf32>
    %240 = arith.divf %238, %239 : vector<8x128xf32>
    %241 = arith.mulf %232, %209 : vector<8x128xf32>
    %242 = arith.mulf %226, %234 : vector<8x128xf32>
    %243 = arith.addf %241, %242 : vector<8x128xf32>
    %244 = math.tanh %243 : vector<8x128xf32>
    %245 = arith.mulf %240, %244 : vector<8x128xf32>
    %246 = arith.index_cast %215 : i32 to index
    %c0_58 = arith.constant 0 : index
    %247 = vector.load %arg12[%246, %c0_58] : memref<64x128xf32, #tpu.memory_space<vmem>>, vector<8x128xf32>
    tpu.vector_store %arg12[%246, %c0_58], %245 {strides = array<i32>} : memref<64x128xf32, #tpu.memory_space<vmem>>, vector<8x128xf32>,
    %c7_i32 = arith.constant 7 : i32
    %c8_i32_59 = arith.constant 8 : i32
    %248 = arith.muli %c7_i32, %c8_i32_59 : i32
    %249 = tpu.assume_multiple %248, 8 : i32
    %250 = arith.index_cast %249 : i32 to index
    %c0_60 = arith.constant 0 : index
    %251 = vector.load %arg11[%250, %c0_60] : memref<64x512xf32, #tpu.memory_space<vmem>>, vector<8x512xf32>
    %252 = arith.truncf %245 : vector<8x128xf32> to vector<8x128xbf16>
    %cst_61 = arith.constant dense<0.000000e+00> : vector<8x512xf32>
    %253 = tpu.matmul %252, %8, %cst_61 {dimension_numbers = #tpu.dot_dimension_numbers<[1], [0], [0], [1], [0, 0, 1, 1], [], []>} : vector<8x128xbf16>, vector<128x512xbf16>, vector<8x512xf32> -> vector<8x512xf32>
    %254 = arith.addf %251, %253 : vector<8x512xf32>
    %255 = vector.extract_strided_slice %254 {offsets = [0, 0], sizes = [8, 128], strides = [1, 1]} : vector<8x512xf32> to vector<8x128xf32>
    %256 = arith.negf %255 : vector<8x128xf32>
    %257 = math.exp %256 : vector<8x128xf32>
    %cst_62 = arith.constant 1.000000e+00 : f32
    %258 = vector.broadcast %cst_62 : f32 to vector<8x128xf32>
    %259 = arith.addf %258, %257 : vector<8x128xf32>
    %260 = arith.divf %258, %259 : vector<8x128xf32>
    %261 = vector.extract_strided_slice %254 {offsets = [0, 128], sizes = [8, 128], strides = [1, 1]} : vector<8x512xf32> to vector<8x128xf32>
    %262 = arith.negf %261 : vector<8x128xf32>
    %263 = math.exp %262 : vector<8x128xf32>
    %cst_63 = arith.constant 1.000000e+00 : f32
    %264 = vector.broadcast %cst_63 : f32 to vector<8x128xf32>
    %265 = arith.addf %264, %263 : vector<8x128xf32>
    %266 = arith.divf %264, %265 : vector<8x128xf32>
    %267 = vector.extract_strided_slice %254 {offsets = [0, 256], sizes = [8, 128], strides = [1, 1]} : vector<8x512xf32> to vector<8x128xf32>
    %268 = math.tanh %267 : vector<8x128xf32>
    %269 = vector.extract_strided_slice %254 {offsets = [0, 384], sizes = [8, 128], strides = [1, 1]} : vector<8x512xf32> to vector<8x128xf32>
    %270 = arith.negf %269 : vector<8x128xf32>
    %271 = math.exp %270 : vector<8x128xf32>
    %cst_64 = arith.constant 1.000000e+00 : f32
    %272 = vector.broadcast %cst_64 : f32 to vector<8x128xf32>
    %273 = arith.addf %272, %271 : vector<8x128xf32>
    %274 = arith.divf %272, %273 : vector<8x128xf32>
    %275 = arith.mulf %266, %243 : vector<8x128xf32>
    %276 = arith.mulf %260, %268 : vector<8x128xf32>
    %277 = arith.addf %275, %276 : vector<8x128xf32>
    %278 = math.tanh %277 : vector<8x128xf32>
    %279 = arith.mulf %274, %278 : vector<8x128xf32>
    %280 = arith.index_cast %249 : i32 to index
    %c0_65 = arith.constant 0 : index
    %281 = vector.load %arg12[%280, %c0_65] : memref<64x128xf32, #tpu.memory_space<vmem>>, vector<8x128xf32>
    tpu.vector_store %arg12[%280, %c0_65], %279 {strides = array<i32>} : memref<64x128xf32, #tpu.memory_space<vmem>>, vector<8x128xf32>,
    %c8_i32_66 = arith.constant 8 : i32
    %c0_67 = arith.constant 0 : index
    %c0_68 = arith.constant 0 : index
    %282 = vector.load %arg12[%c0_67, %c0_68] : memref<64x128xf32, #tpu.memory_space<vmem>>, vector<64x128xf32>
    %283 = arith.truncf %282 : vector<64x128xf32> to vector<64x128xbf16>
    %c0_69 = arith.constant 0 : index
    %c0_70 = arith.constant 0 : index
    %284 = vector.load %arg5[%c0_69, %c0_70] : memref<128x512xbf16, #tpu.memory_space<vmem>>, vector<128x512xbf16>
    %cst_71 = arith.constant dense<0.000000e+00> : vector<64x512xf32>
    %285 = tpu.matmul %283, %284, %cst_71 {dimension_numbers = #tpu.dot_dimension_numbers<[1], [0], [0], [1], [0, 0, 1, 1], [], []>} : vector<64x128xbf16>, vector<128x512xbf16>, vector<64x512xf32> -> vector<64x512xf32>
    %c0_72 = arith.constant 0 : index
    %c0_73 = arith.constant 0 : index
    %286 = vector.load %arg7[%c0_72, %c0_73] : memref<1x512xf32, #tpu.memory_space<vmem>>, vector<1x512xf32>
    %287 = vector.broadcast %286 : vector<1x512xf32> to vector<64x512xf32>
    %288 = arith.addf %285, %287 : vector<64x512xf32>
    %c0_74 = arith.constant 0 : index
    %c0_75 = arith.constant 0 : index
    %289 = vector.load %arg11[%c0_74, %c0_75] : memref<64x512xf32, #tpu.memory_space<vmem>>, vector<64x512xf32>
    tpu.vector_store %arg11[%c0_74, %c0_75], %288 {strides = array<i32>} : memref<64x512xf32, #tpu.memory_space<vmem>>, vector<64x512xf32>,
    %c0_76 = arith.constant 0 : index
    %c0_77 = arith.constant 0 : index
    %290 = vector.load %arg6[%c0_76, %c0_77] : memref<128x512xbf16, #tpu.memory_space<vmem>>, vector<128x512xbf16>
    %cst_78 = arith.constant 0.000000e+00 : f32
    %291 = vector.broadcast %cst_78 : f32 to vector<8x128xf32>
    %c0_i32_79 = arith.constant 0 : i32
    %c8_i32_80 = arith.constant 8 : i32
    %292 = arith.muli %c0_i32_79, %c8_i32_80 : i32
    %293 = tpu.assume_multiple %292, 8 : i32
    %294 = arith.index_cast %293 : i32 to index
    %c0_81 = arith.constant 0 : index
    %295 = vector.load %arg11[%294, %c0_81] : memref<64x512xf32, #tpu.memory_space<vmem>>, vector<8x512xf32>
    %296 = arith.truncf %291 : vector<8x128xf32> to vector<8x128xbf16>
    %cst_82 = arith.constant dense<0.000000e+00> : vector<8x512xf32>
    %297 = tpu.matmul %296, %290, %cst_82 {dimension_numbers = #tpu.dot_dimension_numbers<[1], [0], [0], [1], [0, 0, 1, 1], [], []>} : vector<8x128xbf16>, vector<128x512xbf16>, vector<8x512xf32> -> vector<8x512xf32>
    %298 = arith.addf %295, %297 : vector<8x512xf32>
    %299 = vector.extract_strided_slice %298 {offsets = [0, 0], sizes = [8, 128], strides = [1, 1]} : vector<8x512xf32> to vector<8x128xf32>
    %300 = arith.negf %299 : vector<8x128xf32>
    %301 = math.exp %300 : vector<8x128xf32>
    %cst_83 = arith.constant 1.000000e+00 : f32
    %302 = vector.broadcast %cst_83 : f32 to vector<8x128xf32>
    %303 = arith.addf %302, %301 : vector<8x128xf32>
    %304 = arith.divf %302, %303 : vector<8x128xf32>
    %305 = vector.extract_strided_slice %298 {offsets = [0, 128], sizes = [8, 128], strides = [1, 1]} : vector<8x512xf32> to vector<8x128xf32>
    %306 = arith.negf %305 : vector<8x128xf32>
    %307 = math.exp %306 : vector<8x128xf32>
    %cst_84 = arith.constant 1.000000e+00 : f32
    %308 = vector.broadcast %cst_84 : f32 to vector<8x128xf32>
    %309 = arith.addf %308, %307 : vector<8x128xf32>
    %310 = arith.divf %308, %309 : vector<8x128xf32>
    %311 = vector.extract_strided_slice %298 {offsets = [0, 256], sizes = [8, 128], strides = [1, 1]} : vector<8x512xf32> to vector<8x128xf32>
    %312 = math.tanh %311 : vector<8x128xf32>
    %313 = vector.extract_strided_slice %298 {offsets = [0, 384], sizes = [8, 128], strides = [1, 1]} : vector<8x512xf32> to vector<8x128xf32>
    %314 = arith.negf %313 : vector<8x128xf32>
    %315 = math.exp %314 : vector<8x128xf32>
    %cst_85 = arith.constant 1.000000e+00 : f32
    %316 = vector.broadcast %cst_85 : f32 to vector<8x128xf32>
    %317 = arith.addf %316, %315 : vector<8x128xf32>
    %318 = arith.divf %316, %317 : vector<8x128xf32>
    %319 = arith.mulf %310, %291 : vector<8x128xf32>
    %320 = arith.mulf %304, %312 : vector<8x128xf32>
    %321 = arith.addf %319, %320 : vector<8x128xf32>
    %322 = math.tanh %321 : vector<8x128xf32>
    %323 = arith.mulf %318, %322 : vector<8x128xf32>
    %324 = arith.addf %291, %323 : vector<8x128xf32>
    %c1_i32_86 = arith.constant 1 : i32
    %c8_i32_87 = arith.constant 8 : i32
    %325 = arith.muli %c1_i32_86, %c8_i32_87 : i32
    %326 = tpu.assume_multiple %325, 8 : i32
    %327 = arith.index_cast %326 : i32 to index
    %c0_88 = arith.constant 0 : index
    %328 = vector.load %arg11[%327, %c0_88] : memref<64x512xf32, #tpu.memory_space<vmem>>, vector<8x512xf32>
    %329 = arith.truncf %323 : vector<8x128xf32> to vector<8x128xbf16>
    %cst_89 = arith.constant dense<0.000000e+00> : vector<8x512xf32>
    %330 = tpu.matmul %329, %290, %cst_89 {dimension_numbers = #tpu.dot_dimension_numbers<[1], [0], [0], [1], [0, 0, 1, 1], [], []>} : vector<8x128xbf16>, vector<128x512xbf16>, vector<8x512xf32> -> vector<8x512xf32>
    %331 = arith.addf %328, %330 : vector<8x512xf32>
    %332 = vector.extract_strided_slice %331 {offsets = [0, 0], sizes = [8, 128], strides = [1, 1]} : vector<8x512xf32> to vector<8x128xf32>
    %333 = arith.negf %332 : vector<8x128xf32>
    %334 = math.exp %333 : vector<8x128xf32>
    %cst_90 = arith.constant 1.000000e+00 : f32
    %335 = vector.broadcast %cst_90 : f32 to vector<8x128xf32>
    %336 = arith.addf %335, %334 : vector<8x128xf32>
    %337 = arith.divf %335, %336 : vector<8x128xf32>
    %338 = vector.extract_strided_slice %331 {offsets = [0, 128], sizes = [8, 128], strides = [1, 1]} : vector<8x512xf32> to vector<8x128xf32>
    %339 = arith.negf %338 : vector<8x128xf32>
    %340 = math.exp %339 : vector<8x128xf32>
    %cst_91 = arith.constant 1.000000e+00 : f32
    %341 = vector.broadcast %cst_91 : f32 to vector<8x128xf32>
    %342 = arith.addf %341, %340 : vector<8x128xf32>
    %343 = arith.divf %341, %342 : vector<8x128xf32>
    %344 = vector.extract_strided_slice %331 {offsets = [0, 256], sizes = [8, 128], strides = [1, 1]} : vector<8x512xf32> to vector<8x128xf32>
    %345 = math.tanh %344 : vector<8x128xf32>
    %346 = vector.extract_strided_slice %331 {offsets = [0, 384], sizes = [8, 128], strides = [1, 1]} : vector<8x512xf32> to vector<8x128xf32>
    %347 = arith.negf %346 : vector<8x128xf32>
    %348 = math.exp %347 : vector<8x128xf32>
    %cst_92 = arith.constant 1.000000e+00 : f32
    %349 = vector.broadcast %cst_92 : f32 to vector<8x128xf32>
    %350 = arith.addf %349, %348 : vector<8x128xf32>
    %351 = arith.divf %349, %350 : vector<8x128xf32>
    %352 = arith.mulf %343, %321 : vector<8x128xf32>
    %353 = arith.mulf %337, %345 : vector<8x128xf32>
    %354 = arith.addf %352, %353 : vector<8x128xf32>
    %355 = math.tanh %354 : vector<8x128xf32>
    %356 = arith.mulf %351, %355 : vector<8x128xf32>
    %357 = arith.addf %324, %356 : vector<8x128xf32>
    %c2_i32_93 = arith.constant 2 : i32
    %c8_i32_94 = arith.constant 8 : i32
    %358 = arith.muli %c2_i32_93, %c8_i32_94 : i32
    %359 = tpu.assume_multiple %358, 8 : i32
    %360 = arith.index_cast %359 : i32 to index
    %c0_95 = arith.constant 0 : index
    %361 = vector.load %arg11[%360, %c0_95] : memref<64x512xf32, #tpu.memory_space<vmem>>, vector<8x512xf32>
    %362 = arith.truncf %356 : vector<8x128xf32> to vector<8x128xbf16>
    %cst_96 = arith.constant dense<0.000000e+00> : vector<8x512xf32>
    %363 = tpu.matmul %362, %290, %cst_96 {dimension_numbers = #tpu.dot_dimension_numbers<[1], [0], [0], [1], [0, 0, 1, 1], [], []>} : vector<8x128xbf16>, vector<128x512xbf16>, vector<8x512xf32> -> vector<8x512xf32>
    %364 = arith.addf %361, %363 : vector<8x512xf32>
    %365 = vector.extract_strided_slice %364 {offsets = [0, 0], sizes = [8, 128], strides = [1, 1]} : vector<8x512xf32> to vector<8x128xf32>
    %366 = arith.negf %365 : vector<8x128xf32>
    %367 = math.exp %366 : vector<8x128xf32>
    %cst_97 = arith.constant 1.000000e+00 : f32
    %368 = vector.broadcast %cst_97 : f32 to vector<8x128xf32>
    %369 = arith.addf %368, %367 : vector<8x128xf32>
    %370 = arith.divf %368, %369 : vector<8x128xf32>
    %371 = vector.extract_strided_slice %364 {offsets = [0, 128], sizes = [8, 128], strides = [1, 1]} : vector<8x512xf32> to vector<8x128xf32>
    %372 = arith.negf %371 : vector<8x128xf32>
    %373 = math.exp %372 : vector<8x128xf32>
    %cst_98 = arith.constant 1.000000e+00 : f32
    %374 = vector.broadcast %cst_98 : f32 to vector<8x128xf32>
    %375 = arith.addf %374, %373 : vector<8x128xf32>
    %376 = arith.divf %374, %375 : vector<8x128xf32>
    %377 = vector.extract_strided_slice %364 {offsets = [0, 256], sizes = [8, 128], strides = [1, 1]} : vector<8x512xf32> to vector<8x128xf32>
    %378 = math.tanh %377 : vector<8x128xf32>
    %379 = vector.extract_strided_slice %364 {offsets = [0, 384], sizes = [8, 128], strides = [1, 1]} : vector<8x512xf32> to vector<8x128xf32>
    %380 = arith.negf %379 : vector<8x128xf32>
    %381 = math.exp %380 : vector<8x128xf32>
    %cst_99 = arith.constant 1.000000e+00 : f32
    %382 = vector.broadcast %cst_99 : f32 to vector<8x128xf32>
    %383 = arith.addf %382, %381 : vector<8x128xf32>
    %384 = arith.divf %382, %383 : vector<8x128xf32>
    %385 = arith.mulf %376, %354 : vector<8x128xf32>
    %386 = arith.mulf %370, %378 : vector<8x128xf32>
    %387 = arith.addf %385, %386 : vector<8x128xf32>
    %388 = math.tanh %387 : vector<8x128xf32>
    %389 = arith.mulf %384, %388 : vector<8x128xf32>
    %390 = arith.addf %357, %389 : vector<8x128xf32>
    %c3_i32_100 = arith.constant 3 : i32
    %c8_i32_101 = arith.constant 8 : i32
    %391 = arith.muli %c3_i32_100, %c8_i32_101 : i32
    %392 = tpu.assume_multiple %391, 8 : i32
    %393 = arith.index_cast %392 : i32 to index
    %c0_102 = arith.constant 0 : index
    %394 = vector.load %arg11[%393, %c0_102] : memref<64x512xf32, #tpu.memory_space<vmem>>, vector<8x512xf32>
    %395 = arith.truncf %389 : vector<8x128xf32> to vector<8x128xbf16>
    %cst_103 = arith.constant dense<0.000000e+00> : vector<8x512xf32>
    %396 = tpu.matmul %395, %290, %cst_103 {dimension_numbers = #tpu.dot_dimension_numbers<[1], [0], [0], [1], [0, 0, 1, 1], [], []>} : vector<8x128xbf16>, vector<128x512xbf16>, vector<8x512xf32> -> vector<8x512xf32>
    %397 = arith.addf %394, %396 : vector<8x512xf32>
    %398 = vector.extract_strided_slice %397 {offsets = [0, 0], sizes = [8, 128], strides = [1, 1]} : vector<8x512xf32> to vector<8x128xf32>
    %399 = arith.negf %398 : vector<8x128xf32>
    %400 = math.exp %399 : vector<8x128xf32>
    %cst_104 = arith.constant 1.000000e+00 : f32
    %401 = vector.broadcast %cst_104 : f32 to vector<8x128xf32>
    %402 = arith.addf %401, %400 : vector<8x128xf32>
    %403 = arith.divf %401, %402 : vector<8x128xf32>
    %404 = vector.extract_strided_slice %397 {offsets = [0, 128], sizes = [8, 128], strides = [1, 1]} : vector<8x512xf32> to vector<8x128xf32>
    %405 = arith.negf %404 : vector<8x128xf32>
    %406 = math.exp %405 : vector<8x128xf32>
    %cst_105 = arith.constant 1.000000e+00 : f32
    %407 = vector.broadcast %cst_105 : f32 to vector<8x128xf32>
    %408 = arith.addf %407, %406 : vector<8x128xf32>
    %409 = arith.divf %407, %408 : vector<8x128xf32>
    %410 = vector.extract_strided_slice %397 {offsets = [0, 256], sizes = [8, 128], strides = [1, 1]} : vector<8x512xf32> to vector<8x128xf32>
    %411 = math.tanh %410 : vector<8x128xf32>
    %412 = vector.extract_strided_slice %397 {offsets = [0, 384], sizes = [8, 128], strides = [1, 1]} : vector<8x512xf32> to vector<8x128xf32>
    %413 = arith.negf %412 : vector<8x128xf32>
    %414 = math.exp %413 : vector<8x128xf32>
    %cst_106 = arith.constant 1.000000e+00 : f32
    %415 = vector.broadcast %cst_106 : f32 to vector<8x128xf32>
    %416 = arith.addf %415, %414 : vector<8x128xf32>
    %417 = arith.divf %415, %416 : vector<8x128xf32>
    %418 = arith.mulf %409, %387 : vector<8x128xf32>
    %419 = arith.mulf %403, %411 : vector<8x128xf32>
    %420 = arith.addf %418, %419 : vector<8x128xf32>
    %421 = math.tanh %420 : vector<8x128xf32>
    %422 = arith.mulf %417, %421 : vector<8x128xf32>
    %423 = arith.addf %390, %422 : vector<8x128xf32>
    %c4_i32_107 = arith.constant 4 : i32
    %c8_i32_108 = arith.constant 8 : i32
    %424 = arith.muli %c4_i32_107, %c8_i32_108 : i32
    %425 = tpu.assume_multiple %424, 8 : i32
    %426 = arith.index_cast %425 : i32 to index
    %c0_109 = arith.constant 0 : index
    %427 = vector.load %arg11[%426, %c0_109] : memref<64x512xf32, #tpu.memory_space<vmem>>, vector<8x512xf32>
    %428 = arith.truncf %422 : vector<8x128xf32> to vector<8x128xbf16>
    %cst_110 = arith.constant dense<0.000000e+00> : vector<8x512xf32>
    %429 = tpu.matmul %428, %290, %cst_110 {dimension_numbers = #tpu.dot_dimension_numbers<[1], [0], [0], [1], [0, 0, 1, 1], [], []>} : vector<8x128xbf16>, vector<128x512xbf16>, vector<8x512xf32> -> vector<8x512xf32>
    %430 = arith.addf %427, %429 : vector<8x512xf32>
    %431 = vector.extract_strided_slice %430 {offsets = [0, 0], sizes = [8, 128], strides = [1, 1]} : vector<8x512xf32> to vector<8x128xf32>
    %432 = arith.negf %431 : vector<8x128xf32>
    %433 = math.exp %432 : vector<8x128xf32>
    %cst_111 = arith.constant 1.000000e+00 : f32
    %434 = vector.broadcast %cst_111 : f32 to vector<8x128xf32>
    %435 = arith.addf %434, %433 : vector<8x128xf32>
    %436 = arith.divf %434, %435 : vector<8x128xf32>
    %437 = vector.extract_strided_slice %430 {offsets = [0, 128], sizes = [8, 128], strides = [1, 1]} : vector<8x512xf32> to vector<8x128xf32>
    %438 = arith.negf %437 : vector<8x128xf32>
    %439 = math.exp %438 : vector<8x128xf32>
    %cst_112 = arith.constant 1.000000e+00 : f32
    %440 = vector.broadcast %cst_112 : f32 to vector<8x128xf32>
    %441 = arith.addf %440, %439 : vector<8x128xf32>
    %442 = arith.divf %440, %441 : vector<8x128xf32>
    %443 = vector.extract_strided_slice %430 {offsets = [0, 256], sizes = [8, 128], strides = [1, 1]} : vector<8x512xf32> to vector<8x128xf32>
    %444 = math.tanh %443 : vector<8x128xf32>
    %445 = vector.extract_strided_slice %430 {offsets = [0, 384], sizes = [8, 128], strides = [1, 1]} : vector<8x512xf32> to vector<8x128xf32>
    %446 = arith.negf %445 : vector<8x128xf32>
    %447 = math.exp %446 : vector<8x128xf32>
    %cst_113 = arith.constant 1.000000e+00 : f32
    %448 = vector.broadcast %cst_113 : f32 to vector<8x128xf32>
    %449 = arith.addf %448, %447 : vector<8x128xf32>
    %450 = arith.divf %448, %449 : vector<8x128xf32>
    %451 = arith.mulf %442, %420 : vector<8x128xf32>
    %452 = arith.mulf %436, %444 : vector<8x128xf32>
    %453 = arith.addf %451, %452 : vector<8x128xf32>
    %454 = math.tanh %453 : vector<8x128xf32>
    %455 = arith.mulf %450, %454 : vector<8x128xf32>
    %456 = arith.addf %423, %455 : vector<8x128xf32>
    %c5_i32_114 = arith.constant 5 : i32
    %c8_i32_115 = arith.constant 8 : i32
    %457 = arith.muli %c5_i32_114, %c8_i32_115 : i32
    %458 = tpu.assume_multiple %457, 8 : i32
    %459 = arith.index_cast %458 : i32 to index
    %c0_116 = arith.constant 0 : index
    %460 = vector.load %arg11[%459, %c0_116] : memref<64x512xf32, #tpu.memory_space<vmem>>, vector<8x512xf32>
    %461 = arith.truncf %455 : vector<8x128xf32> to vector<8x128xbf16>
    %cst_117 = arith.constant dense<0.000000e+00> : vector<8x512xf32>
    %462 = tpu.matmul %461, %290, %cst_117 {dimension_numbers = #tpu.dot_dimension_numbers<[1], [0], [0], [1], [0, 0, 1, 1], [], []>} : vector<8x128xbf16>, vector<128x512xbf16>, vector<8x512xf32> -> vector<8x512xf32>
    %463 = arith.addf %460, %462 : vector<8x512xf32>
    %464 = vector.extract_strided_slice %463 {offsets = [0, 0], sizes = [8, 128], strides = [1, 1]} : vector<8x512xf32> to vector<8x128xf32>
    %465 = arith.negf %464 : vector<8x128xf32>
    %466 = math.exp %465 : vector<8x128xf32>
    %cst_118 = arith.constant 1.000000e+00 : f32
    %467 = vector.broadcast %cst_118 : f32 to vector<8x128xf32>
    %468 = arith.addf %467, %466 : vector<8x128xf32>
    %469 = arith.divf %467, %468 : vector<8x128xf32>
    %470 = vector.extract_strided_slice %463 {offsets = [0, 128], sizes = [8, 128], strides = [1, 1]} : vector<8x512xf32> to vector<8x128xf32>
    %471 = arith.negf %470 : vector<8x128xf32>
    %472 = math.exp %471 : vector<8x128xf32>
    %cst_119 = arith.constant 1.000000e+00 : f32
    %473 = vector.broadcast %cst_119 : f32 to vector<8x128xf32>
    %474 = arith.addf %473, %472 : vector<8x128xf32>
    %475 = arith.divf %473, %474 : vector<8x128xf32>
    %476 = vector.extract_strided_slice %463 {offsets = [0, 256], sizes = [8, 128], strides = [1, 1]} : vector<8x512xf32> to vector<8x128xf32>
    %477 = math.tanh %476 : vector<8x128xf32>
    %478 = vector.extract_strided_slice %463 {offsets = [0, 384], sizes = [8, 128], strides = [1, 1]} : vector<8x512xf32> to vector<8x128xf32>
    %479 = arith.negf %478 : vector<8x128xf32>
    %480 = math.exp %479 : vector<8x128xf32>
    %cst_120 = arith.constant 1.000000e+00 : f32
    %481 = vector.broadcast %cst_120 : f32 to vector<8x128xf32>
    %482 = arith.addf %481, %480 : vector<8x128xf32>
    %483 = arith.divf %481, %482 : vector<8x128xf32>
    %484 = arith.mulf %475, %453 : vector<8x128xf32>
    %485 = arith.mulf %469, %477 : vector<8x128xf32>
    %486 = arith.addf %484, %485 : vector<8x128xf32>
    %487 = math.tanh %486 : vector<8x128xf32>
    %488 = arith.mulf %483, %487 : vector<8x128xf32>
    %489 = arith.addf %456, %488 : vector<8x128xf32>
    %c6_i32_121 = arith.constant 6 : i32
    %c8_i32_122 = arith.constant 8 : i32
    %490 = arith.muli %c6_i32_121, %c8_i32_122 : i32
    %491 = tpu.assume_multiple %490, 8 : i32
    %492 = arith.index_cast %491 : i32 to index
    %c0_123 = arith.constant 0 : index
    %493 = vector.load %arg11[%492, %c0_123] : memref<64x512xf32, #tpu.memory_space<vmem>>, vector<8x512xf32>
    %494 = arith.truncf %488 : vector<8x128xf32> to vector<8x128xbf16>
    %cst_124 = arith.constant dense<0.000000e+00> : vector<8x512xf32>
    %495 = tpu.matmul %494, %290, %cst_124 {dimension_numbers = #tpu.dot_dimension_numbers<[1], [0], [0], [1], [0, 0, 1, 1], [], []>} : vector<8x128xbf16>, vector<128x512xbf16>, vector<8x512xf32> -> vector<8x512xf32>
    %496 = arith.addf %493, %495 : vector<8x512xf32>
    %497 = vector.extract_strided_slice %496 {offsets = [0, 0], sizes = [8, 128], strides = [1, 1]} : vector<8x512xf32> to vector<8x128xf32>
    %498 = arith.negf %497 : vector<8x128xf32>
    %499 = math.exp %498 : vector<8x128xf32>
    %cst_125 = arith.constant 1.000000e+00 : f32
    %500 = vector.broadcast %cst_125 : f32 to vector<8x128xf32>
    %501 = arith.addf %500, %499 : vector<8x128xf32>
    %502 = arith.divf %500, %501 : vector<8x128xf32>
    %503 = vector.extract_strided_slice %496 {offsets = [0, 128], sizes = [8, 128], strides = [1, 1]} : vector<8x512xf32> to vector<8x128xf32>
    %504 = arith.negf %503 : vector<8x128xf32>
    %505 = math.exp %504 : vector<8x128xf32>
    %cst_126 = arith.constant 1.000000e+00 : f32
    %506 = vector.broadcast %cst_126 : f32 to vector<8x128xf32>
    %507 = arith.addf %506, %505 : vector<8x128xf32>
    %508 = arith.divf %506, %507 : vector<8x128xf32>
    %509 = vector.extract_strided_slice %496 {offsets = [0, 256], sizes = [8, 128], strides = [1, 1]} : vector<8x512xf32> to vector<8x128xf32>
    %510 = math.tanh %509 : vector<8x128xf32>
    %511 = vector.extract_strided_slice %496 {offsets = [0, 384], sizes = [8, 128], strides = [1, 1]} : vector<8x512xf32> to vector<8x128xf32>
    %512 = arith.negf %511 : vector<8x128xf32>
    %513 = math.exp %512 : vector<8x128xf32>
    %cst_127 = arith.constant 1.000000e+00 : f32
    %514 = vector.broadcast %cst_127 : f32 to vector<8x128xf32>
    %515 = arith.addf %514, %513 : vector<8x128xf32>
    %516 = arith.divf %514, %515 : vector<8x128xf32>
    %517 = arith.mulf %508, %486 : vector<8x128xf32>
    %518 = arith.mulf %502, %510 : vector<8x128xf32>
    %519 = arith.addf %517, %518 : vector<8x128xf32>
    %520 = math.tanh %519 : vector<8x128xf32>
    %521 = arith.mulf %516, %520 : vector<8x128xf32>
    %522 = arith.addf %489, %521 : vector<8x128xf32>
    %c7_i32_128 = arith.constant 7 : i32
    %c8_i32_129 = arith.constant 8 : i32
    %523 = arith.muli %c7_i32_128, %c8_i32_129 : i32
    %524 = tpu.assume_multiple %523, 8 : i32
    %525 = arith.index_cast %524 : i32 to index
    %c0_130 = arith.constant 0 : index
    %526 = vector.load %arg11[%525, %c0_130] : memref<64x512xf32, #tpu.memory_space<vmem>>, vector<8x512xf32>
    %527 = arith.truncf %521 : vector<8x128xf32> to vector<8x128xbf16>
    %cst_131 = arith.constant dense<0.000000e+00> : vector<8x512xf32>
    %528 = tpu.matmul %527, %290, %cst_131 {dimension_numbers = #tpu.dot_dimension_numbers<[1], [0], [0], [1], [0, 0, 1, 1], [], []>} : vector<8x128xbf16>, vector<128x512xbf16>, vector<8x512xf32> -> vector<8x512xf32>
    %529 = arith.addf %526, %528 : vector<8x512xf32>
    %530 = vector.extract_strided_slice %529 {offsets = [0, 0], sizes = [8, 128], strides = [1, 1]} : vector<8x512xf32> to vector<8x128xf32>
    %531 = arith.negf %530 : vector<8x128xf32>
    %532 = math.exp %531 : vector<8x128xf32>
    %cst_132 = arith.constant 1.000000e+00 : f32
    %533 = vector.broadcast %cst_132 : f32 to vector<8x128xf32>
    %534 = arith.addf %533, %532 : vector<8x128xf32>
    %535 = arith.divf %533, %534 : vector<8x128xf32>
    %536 = vector.extract_strided_slice %529 {offsets = [0, 128], sizes = [8, 128], strides = [1, 1]} : vector<8x512xf32> to vector<8x128xf32>
    %537 = arith.negf %536 : vector<8x128xf32>
    %538 = math.exp %537 : vector<8x128xf32>
    %cst_133 = arith.constant 1.000000e+00 : f32
    %539 = vector.broadcast %cst_133 : f32 to vector<8x128xf32>
    %540 = arith.addf %539, %538 : vector<8x128xf32>
    %541 = arith.divf %539, %540 : vector<8x128xf32>
    %542 = vector.extract_strided_slice %529 {offsets = [0, 256], sizes = [8, 128], strides = [1, 1]} : vector<8x512xf32> to vector<8x128xf32>
    %543 = math.tanh %542 : vector<8x128xf32>
    %544 = vector.extract_strided_slice %529 {offsets = [0, 384], sizes = [8, 128], strides = [1, 1]} : vector<8x512xf32> to vector<8x128xf32>
    %545 = arith.negf %544 : vector<8x128xf32>
    %546 = math.exp %545 : vector<8x128xf32>
    %cst_134 = arith.constant 1.000000e+00 : f32
    %547 = vector.broadcast %cst_134 : f32 to vector<8x128xf32>
    %548 = arith.addf %547, %546 : vector<8x128xf32>
    %549 = arith.divf %547, %548 : vector<8x128xf32>
    %550 = arith.mulf %541, %519 : vector<8x128xf32>
    %551 = arith.mulf %535, %543 : vector<8x128xf32>
    %552 = arith.addf %550, %551 : vector<8x128xf32>
    %553 = math.tanh %552 : vector<8x128xf32>
    %554 = arith.mulf %549, %553 : vector<8x128xf32>
    %555 = arith.addf %522, %554 : vector<8x128xf32>
    %c8_i32_135 = arith.constant 8 : i32
    %cst_136 = arith.constant 1.250000e-01 : f32
    %556 = vector.broadcast %cst_136 : f32 to vector<8x128xf32>
    %557 = arith.mulf %555, %556 : vector<8x128xf32>
    %558 = arith.truncf %557 : vector<8x128xf32> to vector<8x128xbf16>
    %c0_137 = arith.constant 0 : index
    %c0_138 = arith.constant 0 : index
    %559 = vector.load %arg8[%c0_137, %c0_138] : memref<128x128xbf16, #tpu.memory_space<vmem>>, vector<128x128xbf16>
    %cst_139 = arith.constant dense<0.000000e+00> : vector<8x128xf32>
    %560 = tpu.matmul %558, %559, %cst_139 {dimension_numbers = #tpu.dot_dimension_numbers<[1], [0], [0], [1], [0, 0, 1, 1], [], []>} : vector<8x128xbf16>, vector<128x128xbf16>, vector<8x128xf32> -> vector<8x128xf32>
    %c0_140 = arith.constant 0 : index
    %c0_141 = arith.constant 0 : index
    %561 = vector.load %arg9[%c0_140, %c0_141] : memref<1x128xf32, #tpu.memory_space<vmem>>, vector<1x128xf32>
    %562 = vector.broadcast %561 : vector<1x128xf32> to vector<8x128xf32>
    %563 = arith.addf %560, %562 : vector<8x128xf32>
    %c0_142 = arith.constant 0 : index
    %c0_143 = arith.constant 0 : index
    %564 = vector.load %arg10[%c0_142, %c0_143] : memref<8x128xf32, #tpu.memory_space<vmem>>, vector<8x128xf32>
    tpu.vector_store %arg10[%c0_142, %c0_143], %563 {strides = array<i32>} : memref<8x128xf32, #tpu.memory_space<vmem>>, vector<8x128xf32>,
    return
  }
  func.func @transform_0(%arg0: i32) -> (i32, i32, i32) {
    %c0_i32 = arith.constant 0 : i32
    %c0_i32_0 = arith.constant 0 : i32
    %c0_i32_1 = arith.constant 0 : i32
    return %arg0, %c0_i32, %c0_i32_0 : i32, i32, i32
  }
  func.func @transform_1(%arg0: i32) -> (i32, i32) {
    %c0_i32 = arith.constant 0 : i32
    %c0_i32_0 = arith.constant 0 : i32
    %c0_i32_1 = arith.constant 0 : i32
    return %c0_i32, %c0_i32_0 : i32, i32
  }
  func.func @transform_2(%arg0: i32) -> (i32, i32) {
    %c0_i32 = arith.constant 0 : i32
    %c0_i32_0 = arith.constant 0 : i32
    %c0_i32_1 = arith.constant 0 : i32
    return %c0_i32, %c0_i32_0 : i32, i32
  }
  func.func @transform_3(%arg0: i32) -> (i32, i32) {
    %c0_i32 = arith.constant 0 : i32
    %c0_i32_0 = arith.constant 0 : i32
    %c0_i32_1 = arith.constant 0 : i32
    return %c0_i32, %c0_i32_0 : i32, i32
  }
  func.func @transform_4(%arg0: i32) -> (i32, i32) {
    %c0_i32 = arith.constant 0 : i32
    %c0_i32_0 = arith.constant 0 : i32
    %c0_i32_1 = arith.constant 0 : i32
    return %c0_i32, %c0_i32_0 : i32, i32
  }
  func.func @transform_5(%arg0: i32) -> (i32, i32) {
    %c0_i32 = arith.constant 0 : i32
    %c0_i32_0 = arith.constant 0 : i32
    %c0_i32_1 = arith.constant 0 : i32
    return %c0_i32, %c0_i32_0 : i32, i32
  }
  func.func @transform_6(%arg0: i32) -> (i32, i32) {
    %c0_i32 = arith.constant 0 : i32
    %c0_i32_0 = arith.constant 0 : i32
    %c0_i32_1 = arith.constant 0 : i32
    return %c0_i32, %c0_i32_0 : i32, i32
  }
  func.func @transform_7(%arg0: i32) -> (i32, i32) {
    %c0_i32 = arith.constant 0 : i32
    %c0_i32_0 = arith.constant 0 : i32
    %c0_i32_1 = arith.constant 0 : i32
    return %c0_i32, %c0_i32_0 : i32, i32
  }
  func.func @transform_8(%arg0: i32) -> (i32, i32) {
    %c0_i32 = arith.constant 0 : i32
    %c0_i32_0 = arith.constant 0 : i32
    %c0_i32_1 = arith.constant 0 : i32
    return %c0_i32, %c0_i32_0 : i32, i32
  }
  func.func @transform_9(%arg0: i32) -> (i32, i32) {
    %c0_i32 = arith.constant 0 : i32
    %c0_i32_0 = arith.constant 0 : i32
    return %arg0, %c0_i32 : i32, i32
  }
}

</mosaic_0001>

<bundles_post_ra>
// kernel: lstm_model_forward.1
= control target key start
LH: loop header
LB: loop body
LE: loop exit
PB: predicated region body
PF: predicated region fallthrough
CT: control target
= control target key end

     0   :  { %14 = vsyncpa [#allocation5], 0  ;;  %s5273_s0 = inlined_call_operand.vmem [shape: bf16[1,64,16], index: 0, kind: input, shape index: {}]   ;;  %s5274_s1 = inlined_call_operand.vmem [shape: bf16[16,512], index: 1, kind: input, shape index: {}]   ;;  %s5275_s2 = inlined_call_operand.hbm [shape: bf16[128,512], index: 2, kind: input, shape index: {}]   ;;  %s5276_s3 = inlined_call_operand.vmem [shape: f32[1,512], index: 3, kind: input, shape index: {}]   ;;  %s5277_s4 = inlined_call_operand.hbm [shape: bf16[128,512], index: 4, kind: input, shape index: {}]   ;;  %s5278_s5 = inlined_call_operand.hbm [shape: bf16[128,512], index: 5, kind: input, shape index: {}]   ;;  %s5279_s6 = inlined_call_operand.vmem [shape: f32[1,512], index: 6, kind: input, shape index: {}]   ;;  %s5280_s7 = inlined_call_operand.vmem [shape: bf16[128,128], index: 7, kind: input, shape index: {}]   ;;  %s5281_s8 = inlined_call_operand.vmem [shape: f32[1,128], index: 8, kind: input, shape index: {}]   ;;  %s5282_s9 = inlined_call_operand.vmem [shape: f32[8,128], index: 9, kind: output, shape index: {}]  }
   0x1   :  { %15 = vsyncpa [#allocation7], 0  ;;  %s3897_s30 = smov [#allocation6]   ;;  %s3898_s11 = smov [#allocation4]  }
   0x2   :  { %s39_s10 = sshll.u32 %s3897_s30, 4  ;;  %s25_s12 = sshll.u32 %s3898_s11, 4  ;;  %s40_s10 = int_to_ptr.vmem [resolvable:$true] %s39_s10  ;;  %s3955_s12 = int_to_ptr.vmem [resolvable:$true] %s25_s12 }
   0x3   :  { %s3827_s15 = scalar_lea.hbm %s5277_s4, 4096 }
   0x4   :  { %p3828_p0 = scmp.ne.s32.totalorder %s5277_s4, %s3827_s15  ;;  %p3831_p1 = scmp.lt.u32.totalorder %s3827_s15, %s5277_s4 }
   0x6   :  { %p3833_p2 = pnand %p3831_p1, %p3828_p0 }
   0x8   :  { %3836 = shalt.err (!%p3833_p2)
}
   0x9   :  { %s3837_s20 = scalar_lea.vmem %s40_s10, 4096  ;;  %p3842_p4 = scmp.lt.s32.totalorder %s40_s10, %s40_s10 }
   0xa   :  { %p3838_p3 = scmp.ne.s32.totalorder %s40_s10, %s3837_s20  ;;  %p3843_p5 = scmp.lt.s32.totalorder %s3837_s20, %s3837_s20 }
   0xc   :  { %p3844_p6 = por %p3843_p5, %p3842_p4 }
   0xe   :  { %p3845_p7 = pnand %p3844_p6, %p3838_p3 }
  0x10   :  { %3848 = shalt.err (!%p3845_p7)
}
  0x11   :  { %s3899_s21 = smov 256   ;;  %s3900_s22 = smov 16  }
  0x12   :  { %45 = dma.hbm_to_vmem [thread:$0]  %s5277_s4, 4096, %s40_s10, [#allocation7], %s3899_s21, %s3899_s21, %s3900_s22  }
  0x13   :  { %s3849_s27 = scalar_lea.hbm %s5275_s2, 4096 }
  0x14   :  { %p3850_p8 = scmp.ne.s32.totalorder %s5275_s2, %s3849_s27  ;;  %p3853_p9 = scmp.lt.u32.totalorder %s3849_s27, %s5275_s2 }
  0x16   :  { %p3855_p10 = pnand %p3853_p9, %p3850_p8 }
  0x18   :  { %3858 = shalt.err (!%p3855_p10)
}
  0x19   :  { %s3859_s13 = scalar_lea.vmem %s3955_s12, 4096  ;;  %p3864_p12 = scmp.lt.s32.totalorder %s3955_s12, %s3955_s12 }
  0x1a   :  { %p3860_p11 = scmp.ne.s32.totalorder %s3955_s12, %s3859_s13  ;;  %p3865_p13 = scmp.lt.s32.totalorder %s3859_s13, %s3859_s13 }
  0x1c   :  { %p3866_p0 = por %p3865_p13, %p3864_p12 }
  0x1e   :  { %p3867_p1 = pnand %p3866_p0, %p3860_p11 }
  0x20   :  { %3870 = shalt.err (!%p3867_p1)
}
  0x21   :  { %31 = dma.hbm_to_vmem [thread:$0]  %s5275_s2, 4096, %s3955_s12, [#allocation5], %s3899_s21, %s3899_s21, %s3900_s22  }
  0x22   :  { %s3901_s14 = smov [#allocation8]   ;;  %s3871_s18 = scalar_lea.hbm %s5278_s5, 4096 }
  0x23   :  { %s51_s15 = sshll.u32 %s3901_s14, 4  ;;  %p3872_p2 = scmp.ne.s32.totalorder %s5278_s5, %s3871_s18  ;;  %s52_s15 = int_to_ptr.vmem [resolvable:$true] %s51_s15 }
  0x24   :  { %p3875_p3 = scmp.lt.u32.totalorder %s3871_s18, %s5278_s5 }
  0x26   :  { %p3877_p4 = pnand %p3875_p3, %p3872_p2 }
  0x28   :  { %3880 = shalt.err (!%p3877_p4)
}
  0x29   :  { %s3881_s25 = scalar_lea.vmem %s52_s15, 4096  ;;  %p3886_p6 = scmp.lt.s32.totalorder %s52_s15, %s52_s15 }
  0x2a   :  { %p3882_p5 = scmp.ne.s32.totalorder %s52_s15, %s3881_s25  ;;  %p3887_p7 = scmp.lt.s32.totalorder %s3881_s25, %s3881_s25 }
  0x2c   :  { %p3888_p8 = por %p3887_p7, %p3886_p6 }
  0x2e   :  { %p3889_p9 = pnand %p3888_p8, %p3882_p5 }
  0x30   :  { %3892 = shalt.err (!%p3889_p9)
}
  0x31   :  { %57 = dma.hbm_to_vmem [thread:$0]  %s5278_s5, 4096, %s52_s15, [#allocation7], %s3899_s21, %s3899_s21, %s3900_s22  }
  0x32   :  { %3893 = dma.done.wait [#allocation5], 4096  }
  0x33   :  { %3894 = vsyncadd [#allocation5], 4294963200 }
  0x34   :  { %3895 = dma.done.wait [#allocation7], 8192  }
  0x35   :  { %3896 = vsyncadd [#allocation7], 4294959104  ;;  %v5287_v0 = vmov 0   ;;  %v3345_v1 = vld [vmem:[%s5274_s1 + $0x4] ss:$16 sps:$4 sm:$0xff]   ;;  %vm148_vm0 = vcmask 130048   ;;  %v88_v41 = vlaneseq }
  0x36   :  { %193 = vmatprep.mubr.bf16.mxu0 %v5287_v0  ;;  %266 = vmatprep.mubr.bf16.mxu1 %v5287_v0  ;;  %v3347_v2 = vld [vmem:[%s5274_s1 + $0xc] ss:$16 sps:$4 sm:$0xff]   ;;  %v3349_v3 = vld [vmem:[%s5274_s1] ss:$16 sps:$4 sm:$0xff]   ;;  %v3350_v4 = vld [vmem:[%s5274_s1 + $0x8] ss:$16 sps:$4 sm:$0xff]  }
  0x37   :  { %161 = vmatprep.subr.bf16.mxu0 %v3345_v1  ;;  %234 = vmatprep.subr.bf16.mxu1 %v3347_v2  ;;  %v3351_v5 = vld [vmem:[%s5273_s0] sm:$0xff]   ;;  %v4026_v7 = vld [vmem:[#allocation4 + $0xc] ss:$16 sps:$4 sm:$0xff]   ;;  %v4031_v9 = vld [vmem:[#allocation4 + $0x8] ss:$16 sps:$4 sm:$0xff]   ;;  %v4183_v42 = vshrl.u32 %v88_v41, 7 }
  0x38   :  { %162 = vmatpush1.bf16.msra.mxu0 %v3349_v3  ;;  %235 = vmatpush1.bf16.msra.mxu1 %v3350_v4  ;;  %v4024_v6 = vld [vmem:[#allocation4 + $0x4] ss:$16 sps:$4 sm:$0xff]   ;;  %v4028_v8 = vld [vmem:[#allocation4] ss:$16 sps:$4 sm:$0xff]   ;;  %v4039_v11 = vld [vmem:[#allocation4 + $0x2c] ss:$16 sps:$4 sm:$0xff]  }
  0x39   :  { %538 = vmatprep.subr.bf16.mxu0 %v4024_v6  ;;  %v4035_v10 = vld [vmem:[#allocation4 + $0x24] ss:$16 sps:$4 sm:$0xff]   ;;  %579 = vmatprep.subr.bf16.mxu1 %v4026_v7  ;;  %v4041_v12 = vld [vmem:[#allocation4 + $0x20] ss:$16 sps:$4 sm:$0xff]   ;;  %v4043_v13 = vld [vmem:[#allocation4 + $0x28] ss:$16 sps:$4 sm:$0xff]  }
  0x3a   :  { %v3364_v14 = vld [vmem:[%s5273_s0 + $0x8] sm:$0xff]   ;;  %v4052_v15 = vld [vmem:[#allocation4 + $0x44] ss:$16 sps:$4 sm:$0xff]   ;;  %v4058_v17 = vld [vmem:[#allocation4 + $0x40] ss:$16 sps:$4 sm:$0xff]   ;;  %5291 = vst [vmem:[#allocation11_spill] sm:$0xff] %v4183_v42 }
  0x3b   :  { %3147 = vmatmul.mubr.msk.bf16.vlgmr.msra.gmra.mrb[0].mxu0 %vm148_vm0, %v3351_v5  ;;  %3151 = vmatmul.mubr.msk.bf16.vlgmr.msra.gmra.mrb[0].mxu1 %vm148_vm0, %v3351_v5  ;;  %v4055_v16 = vld [vmem:[#allocation4 + $0x4c] ss:$16 sps:$4 sm:$0xff]   ;;  %v4060_v18 = vld [vmem:[#allocation4 + $0x48] ss:$16 sps:$4 sm:$0xff]   ;;  %v4064_v19 = vld [vmem:[#allocation4 + $0x64] ss:$16 sps:$4 sm:$0xff]  }
  0x3c   :  { %539 = vmatpush1.bf16.msra.mxu0 %v4028_v8  ;;  %580 = vmatpush1.bf16.msra.mxu1 %v4031_v9  ;;  %v4067_v20 = vld [vmem:[#allocation4 + $0x6c] ss:$16 sps:$4 sm:$0xff]   ;;  %v4071_v21 = vld [vmem:[#allocation4 + $0x60] ss:$16 sps:$4 sm:$0xff]   ;;  %v4074_v22 = vld [vmem:[#allocation4 + $0x68] ss:$16 sps:$4 sm:$0xff]  }
  0x3d   :  { %540 = vmatprep.subr.bf16.mxu0 %v4035_v10  ;;  %581 = vmatprep.subr.bf16.mxu1 %v4039_v11  ;;  %v4079_v23 = vld [vmem:[#allocation4 + $0x84] ss:$16 sps:$4 sm:$0xff]   ;;  %v4083_v24 = vld [vmem:[#allocation4 + $0x8c] ss:$16 sps:$4 sm:$0xff]   ;;  %v4089_v26 = vld [vmem:[#allocation4 + $0x80] ss:$16 sps:$4 sm:$0xff]  }
  0x3e   :  { %203 = vmatprep.mubr.bf16.mxu0 %v5287_v0  ;;  %276 = vmatprep.mubr.bf16.mxu1 %v5287_v0  ;;  %v3377_v25 = vld [vmem:[%s5273_s0 + $0x10] sm:$0xff]   ;;  %v4093_v27 = vld [vmem:[#allocation4 + $0x88] ss:$16 sps:$4 sm:$0xff]   ;;  %v4098_v29 = vld [vmem:[#allocation4 + $0xac] ss:$16 sps:$4 sm:$0xff]   ;;  %v5285_v43 = vsub.s32 2, %v4183_v42 }
  0x3f   :  { %v4095_v28 = vld [vmem:[#allocation4 + $0xa4] ss:$16 sps:$4 sm:$0xff]   ;;  %v4103_v30 = vld [vmem:[#allocation4 + $0xa0] ss:$16 sps:$4 sm:$0xff]   ;;  %v4105_v31 = vld [vmem:[#allocation4 + $0xa8] ss:$16 sps:$4 sm:$0xff]  }
  0x40   :  { %541 = vmatpush1.bf16.msra.mxu0 %v4041_v12  ;;  %582 = vmatpush1.bf16.msra.mxu1 %v4043_v13  ;;  %v3390_v32 = vld [vmem:[%s5273_s0 + $0x18] sm:$0xff]   ;;  %v4113_v33 = vld [vmem:[#allocation4 + $0xc4] ss:$16 sps:$4 sm:$0xff]   ;;  %v4119_v35 = vld [vmem:[#allocation4 + $0xc0] ss:$16 sps:$4 sm:$0xff]   ;;  %v5283_v44 = vsub.s32 3, %v4183_v42 }
  0x41   :  { %542 = vmatprep.subr.bf16.mxu0 %v4052_v15  ;;  %583 = vmatprep.subr.bf16.mxu1 %v4055_v16  ;;  %v4117_v34 = vld [vmem:[#allocation4 + $0xcc] ss:$16 sps:$4 sm:$0xff]   ;;  %v4121_v36 = vld [vmem:[#allocation4 + $0xc8] ss:$16 sps:$4 sm:$0xff]   ;;  %v4123_v37 = vld [vmem:[#allocation4 + $0xe4] ss:$16 sps:$4 sm:$0xff]  }
  0x42   :  { %v4126_v38 = vld [vmem:[#allocation4 + $0xec] ss:$16 sps:$4 sm:$0xff]   ;;  %v4131_v39 = vld [vmem:[#allocation4 + $0xe0] ss:$16 sps:$4 sm:$0xff]   ;;  %v4135_v40 = vld [vmem:[#allocation4 + $0xe8] ss:$16 sps:$4 sm:$0xff]  }
  0x43   :  { %3148 = vmatmul.mubr.msk.bf16.gmra.mrb[4].mxu0 %vm148_vm0, %v3364_v14  ;;  %3152 = vmatmul.mubr.msk.bf16.gmra.mrb[4].mxu1 %vm148_vm0, %v3364_v14  ;;  %v5286_v45 = vsub.s32 0, %v4183_v42  ;;  %v86_v46 = vld [vmem:[%s5276_s3] sm:$0xf]  ;;  %v5284_v47 = vsub.s32 1, %v4183_v42  ;;  %vm3904_vm1 = vmmov 0  }
  0x44   :  { %543 = vmatpush1.bf16.msra.mxu0 %v4058_v17  ;;  %213 = vmatprep.mubr.bf16.mxu0 %v5287_v0  ;;  %v4194_v48 = vrot.slane %v86_v46, %v5285_v43  ;;  %v4202_v51 = vrot.slane %v86_v46, %v5283_v44 }
  0x45   :  { %584 = vmatpush1.bf16.msra.mxu1 %v4060_v18  ;;  %544 = vmatprep.subr.bf16.mxu0 %v4064_v19  ;;  %v91_v52 = vrot.slane %v86_v46, %v5286_v45  ;;  %v95_v55 = vrot.slane %v86_v46, %v5284_v47 }
  0x46   :  { %585 = vmatprep.subr.bf16.mxu1 %v4067_v20  ;;  %286 = vmatprep.mubr.bf16.mxu1 %v5287_v0 }
  0x48   :  { %545 = vmatpush1.bf16.msra.mxu0 %v4071_v21 }
  0x49   :  { %586 = vmatpush1.bf16.msra.mxu1 %v4074_v22  ;;  %546 = vmatprep.subr.bf16.mxu0 %v4079_v23 }
  0x4a   :  { %587 = vmatprep.subr.bf16.mxu1 %v4083_v24 }
  0x4b   :  { %3149 = vmatmul.mubr.msk.bf16.gmra.mrb[8].mxu0 %vm148_vm0, %v3377_v25  ;;  %3153 = vmatmul.mubr.msk.bf16.gmra.mrb[8].mxu1 %vm148_vm0, %v3377_v25 }
  0x4c   :  { %547 = vmatpush1.bf16.msra.mxu0 %v4089_v26  ;;  %223 = vmatprep.mubr.bf16.mxu0 %v5287_v0 }
  0x4d   :  { %588 = vmatpush1.bf16.msra.mxu1 %v4093_v27  ;;  %548 = vmatprep.subr.bf16.mxu0 %v4095_v28 }
  0x4e   :  { %589 = vmatprep.subr.bf16.mxu1 %v4098_v29  ;;  %296 = vmatprep.mubr.bf16.mxu1 %v5287_v0 }
  0x50   :  { %549 = vmatpush1.bf16.msra.mxu0 %v4103_v30 }
  0x51   :  { %590 = vmatpush1.bf16.msra.mxu1 %v4105_v31  ;;  %550 = vmatprep.subr.bf16.mxu0 %v4113_v33 }
  0x52   :  { %591 = vmatprep.subr.bf16.mxu1 %v4117_v34 }
  0x53   :  { %3150 = vmatmul.mubr.msk.bf16.gmra.mrb[12].mxu0 %vm148_vm0, %v3390_v32  ;;  %3154 = vmatmul.mubr.msk.bf16.gmra.mrb[12].mxu1 %vm148_vm0, %v3390_v32 }
  0x54   :  { %551 = vmatpush1.bf16.msra.mxu0 %v4119_v35  ;;  %570 = vmatprep.mubr.bf16.mxu0 %v5287_v0 }
  0x55   :  { %592 = vmatpush1.bf16.msra.mxu1 %v4121_v36  ;;  %552 = vmatprep.subr.bf16.mxu0 %v4123_v37 }
  0x56   :  { %593 = vmatprep.subr.bf16.mxu1 %v4126_v38  ;;  %611 = vmatprep.mubr.bf16.mxu1 %v5287_v0 }
  0x58   :  { %553 = vmatpush1.bf16.msra.mxu0 %v4131_v39 }
  0x59   :  { %594 = vmatpush1.bf16.msra.mxu1 %v4135_v40  ;;  %657 = vmatprep.subr.bf16.mxu0 %v4024_v6 }
  0x5a   :  { %698 = vmatprep.subr.bf16.mxu1 %v4026_v7 }
  0x5b   :  { %571 = vmatmul.mubr.bf16.vlgmr.msra.gmra.mrb[16].mxu0 %v5287_v0 }
  0x5c   :  { %612 = vmatmul.mubr.bf16.vlgmr.msra.gmra.mrb[16].mxu1 %v5287_v0  ;;  %658 = vmatpush1.bf16.msra.mxu0 %v4028_v8 }
  0x5d   :  { %699 = vmatpush1.bf16.msra.mxu1 %v4031_v9  ;;  %659 = vmatprep.subr.bf16.mxu0 %v4035_v10 }
  0x5e   :  { %700 = vmatprep.subr.bf16.mxu1 %v4039_v11  ;;  %689 = vmatprep.mubr.bf16.mxu0 %v5287_v0 }
  0x5f   :  { %730 = vmatprep.mubr.bf16.mxu1 %v5287_v0 }
  0x60   :  { %660 = vmatpush1.bf16.msra.mxu0 %v4041_v12 }
  0x61   :  { %701 = vmatpush1.bf16.msra.mxu1 %v4043_v13  ;;  %661 = vmatprep.subr.bf16.mxu0 %v4052_v15 }
  0x62   :  { %702 = vmatprep.subr.bf16.mxu1 %v4055_v16 }
  0x64   :  { %662 = vmatpush1.bf16.msra.mxu0 %v4058_v17 }
  0x65   :  { %703 = vmatpush1.bf16.msra.mxu1 %v4060_v18  ;;  %663 = vmatprep.subr.bf16.mxu0 %v4064_v19 }
  0x66   :  { %704 = vmatprep.subr.bf16.mxu1 %v4067_v20 }
  0x68   :  { %664 = vmatpush1.bf16.msra.mxu0 %v4071_v21 }
  0x69   :  { %705 = vmatpush1.bf16.msra.mxu1 %v4074_v22  ;;  %665 = vmatprep.subr.bf16.mxu0 %v4079_v23 }
  0x6a   :  { %706 = vmatprep.subr.bf16.mxu1 %v4083_v24 }
  0x6c   :  { %666 = vmatpush1.bf16.msra.mxu0 %v4089_v26 }
  0x6d   :  { %707 = vmatpush1.bf16.msra.mxu1 %v4093_v27  ;;  %667 = vmatprep.subr.bf16.mxu0 %v4095_v28 }
  0x6e   :  { %708 = vmatprep.subr.bf16.mxu1 %v4098_v29 }
  0x70   :  { %668 = vmatpush1.bf16.msra.mxu0 %v4103_v30 }
  0x71   :  { %709 = vmatpush1.bf16.msra.mxu1 %v4105_v31  ;;  %669 = vmatprep.subr.bf16.mxu0 %v4113_v33 }
  0x72   :  { %710 = vmatprep.subr.bf16.mxu1 %v4117_v34 }
  0x74   :  { %670 = vmatpush1.bf16.msra.mxu0 %v4119_v35 }
  0x75   :  { %711 = vmatpush1.bf16.msra.mxu1 %v4121_v36  ;;  %671 = vmatprep.subr.bf16.mxu0 %v4123_v37 }
  0x76   :  { %712 = vmatprep.subr.bf16.mxu1 %v4126_v38 }
  0x78   :  { %672 = vmatpush1.bf16.msra.mxu0 %v4131_v39 }
  0x79   :  { %713 = vmatpush1.bf16.msra.mxu1 %v4135_v40  ;;  %777 = vmatprep.subr.bf16.mxu0 %v4024_v6 }
  0x7a   :  { %818 = vmatprep.subr.bf16.mxu1 %v4026_v7 }
 0x10e   :  { %v4196_v49 = vpop.f32.mrb[0].mxu0  ;;  %v4198_v50 = vpop.f32.mrb[0].mxu1 }
 0x10f   :  { %v197_v53 = vpop.f32.mrb[1].mxu0  ;;  %v270_v54 = vpop.f32.mrb[1].mxu1 }
 0x110   :  { %v199_v56 = vpop.f32.mrb[2].mxu0  ;;  %v272_v57 = vpop.f32.mrb[2].mxu1 }
 0x111   :  { %v4208_v58 = vadd.f32 %v199_v56, %v91_v52  ;;  %v201_v59 = vpop.f32.mrb[3].mxu0  ;;  %v4211_v60 = vadd.f32 %v272_v57, %v4194_v48  ;;  %v274_v61 = vpop.f32.mrb[3].mxu1 }
 0x112   :  { %v4213_v62 = vadd.f32 %v201_v59, %v95_v55  ;;  %v4216_v63 = vadd.f32 %v274_v61, %v4202_v51 }
 0x116   :  { %v205_v1 = vpop.f32.mrb[4].mxu0  ;;  %v278_v2 = vpop.f32.mrb[4].mxu1 }
 0x117   :  { %v4218_v3 = vadd.f32 %v205_v1, %v91_v52  ;;  %v207_v4 = vpop.f32.mrb[5].mxu0  ;;  %v4221_v5 = vadd.f32 %v278_v2, %v4194_v48  ;;  %v280_v14 = vpop.f32.mrb[5].mxu1 }
 0x118   :  { %v4223_v25 = vadd.f32 %v207_v4, %v95_v55  ;;  %v209_v32 = vpop.f32.mrb[6].mxu0  ;;  %v4226_v41 = vadd.f32 %v280_v14, %v4202_v51  ;;  %v282_v46 = vpop.f32.mrb[6].mxu1 }
 0x119   :  { %v4228_v56 = vadd.f32 %v209_v32, %v91_v52  ;;  %v211_v57 = vpop.f32.mrb[7].mxu0  ;;  %v4231_v59 = vadd.f32 %v282_v46, %v4194_v48  ;;  %v284_v61 = vpop.f32.mrb[7].mxu1 }
 0x11a   :  { %5292 = vst [vmem:[#allocation12_spill] sm:$0xff] %v4226_v41  ;;  %v4233_v1 = vadd.f32 %v211_v57, %v95_v55  ;;  %v4236_v2 = vadd.f32 %v284_v61, %v4202_v51 }
 0x11b   :  { %5293 = vst [vmem:[#allocation13_spill] sm:$0xff] %v4228_v56  ;;  %5294 = vst [vmem:[#allocation14_spill] sm:$0xff] %v4231_v59 }
 0x11c   :  { %5295 = vst [vmem:[#allocation15_spill] sm:$0xff] %v4233_v1  ;;  %5296 = vst [vmem:[#allocation16_spill] sm:$0xff] %v4236_v2 }
 0x11e   :  { %v215_v44 = vpop.f32.mrb[8].mxu0  ;;  %v288_v4 = vpop.f32.mrb[8].mxu1 }
 0x11f   :  { %v4238_v47 = vadd.f32 %v215_v44, %v91_v52  ;;  %v217_v43 = vpop.f32.mrb[9].mxu0  ;;  %v4241_v14 = vadd.f32 %v288_v4, %v4194_v48  ;;  %v290_v32 = vpop.f32.mrb[9].mxu1 }
 0x120   :  { %v4243_v45 = vadd.f32 %v217_v43, %v95_v55  ;;  %v219_v0 = vpop.f32.mrb[10].mxu0  ;;  %v4246_v46 = vadd.f32 %v290_v32, %v4202_v51  ;;  %v292_v57 = vpop.f32.mrb[10].mxu1 }
 0x121   :  { %5297 = vst [vmem:[#allocation17_spill] sm:$0xff] %v4238_v47  ;;  %5298 = vst [vmem:[#allocation18_spill] sm:$0xff] %v4241_v14  ;;  %v4248_v42 = vadd.f32 %v219_v0, %v91_v52  ;;  %v221_v61 = vpop.f32.mrb[11].mxu0  ;;  %v4251_v2 = vadd.f32 %v292_v57, %v4194_v48  ;;  %v294_v44 = vpop.f32.mrb[11].mxu1 }
 0x122   :  { %5299 = vst [vmem:[#allocation19_spill] sm:$0xff] %v4243_v45  ;;  %5300 = vst [vmem:[#allocation20_spill] sm:$0xff] %v4246_v46  ;;  %v4253_v47 = vadd.f32 %v221_v61, %v95_v55  ;;  %v4256_v4 = vadd.f32 %v294_v44, %v4202_v51 }
 0x123   :  { %5301 = vst [vmem:[#allocation21_spill] sm:$0xff] %v4248_v42  ;;  %5302 = vst [vmem:[#allocation22_spill] sm:$0xff] %v4251_v2 }
 0x124   :  { %5303 = vst [vmem:[#allocation23_spill] sm:$0xff] %v4253_v47  ;;  %5304 = vst [vmem:[#allocation24_spill] sm:$0xff] %v4256_v4 }
 0x126   :  { %v225_v14 = vpop.f32.mrb[12].mxu0  ;;  %v298_v43 = vpop.f32.mrb[12].mxu1 }
 0x127   :  { %v4258_v45 = vadd.f32 %v225_v14, %v91_v52  ;;  %v227_v1 = vpop.f32.mrb[13].mxu0  ;;  %v4261_v32 = vadd.f32 %v298_v43, %v4194_v48  ;;  %v300_v0 = vpop.f32.mrb[13].mxu1 }
 0x128   :  { %v4263_v42 = vadd.f32 %v227_v1, %v95_v55  ;;  %v229_v46 = vpop.f32.mrb[14].mxu0  ;;  %v4266_v57 = vadd.f32 %v300_v0, %v4202_v51  ;;  %v302_v61 = vpop.f32.mrb[14].mxu1  ;;  %v196_v1 = vadd.f32 %v4196_v49, %v91_v52  ;;  %v269_v0 = vadd.f32 %v4198_v50, %v4194_v48 }
 0x129   :  { %5305 = vst [vmem:[#allocation25_spill] sm:$0xff] %v4258_v45  ;;  %5306 = vst [vmem:[#allocation26_spill] sm:$0xff] %v4261_v32  ;;  %v4268_v47 = vadd.f32 %v229_v46, %v91_v52  ;;  %v231_v44 = vpop.f32.mrb[15].mxu0  ;;  %v4271_v4 = vadd.f32 %v302_v61, %v4194_v48  ;;  %v304_v14 = vpop.f32.mrb[15].mxu1  ;;  %v271_v46 = vadd.f32 %v270_v54, %v4202_v51 }
 0x12a   :  { %5307 = vst [vmem:[#allocation27_spill] sm:$0xff] %v4263_v42  ;;  %5308 = vst [vmem:[#allocation28_spill] sm:$0xff] %v4266_v57  ;;  %v4273_v45 = vadd.f32 %v231_v44, %v95_v55  ;;  %v4276_v43 = vadd.f32 %v304_v14, %v4202_v51  ;;  %v198_v42 = vadd.f32 %v197_v53, %v95_v55 }
 0x12b   :  { %5309 = vst [vmem:[#allocation29_spill] sm:$0xff] %v4268_v47  ;;  %5310 = vst [vmem:[#allocation30_spill] sm:$0xff] %v4271_v4 }
 0x12c   :  { %5311 = vst [vmem:[#allocation31_spill] sm:$0xff] %v4273_v45  ;;  %5312 = vst [vmem:[#allocation32_spill] sm:$0xff] %v4276_v43 }
 0x12e   :  { %v572_v57 = vpop.f32.mrb[16].mxu0 }
 0x12f   :  { %v620_v47 = vadd.f32 %v572_v57, %v196_v1  ;;  %v613_v32 = vpop.f32.mrb[16].mxu1  ;;  %v574_v2 = vpop.f32.mrb[17].mxu0 }
 0x130   :  { %v622_v61 = vadd.f32 %v613_v32, %v269_v0  ;;  %v621_v4 = vadd.f32 %v574_v2, %v198_v42  ;;  %v615_v59 = vpop.f32.mrb[17].mxu1  ;;  %v576_v44 = vpop.f32.mrb[18].mxu0 }
 0x131   :  { %v3187_v45 = vmul.f32 -1.442695, %v620_v47  ;;  %v623_v56 = vadd.f32 %v615_v59, %v271_v46  ;;  %v577_v14 = vpop.f32.mrb[19].mxu0  ;;  %v617_v43 = vpop.f32.mrb[18].mxu1 }
 0x132   :  { %v3188_v41 = vmul.f32 -1.442695, %v621_v4  ;;  %v618_v49 = vpop.f32.mrb[19].mxu1  ;;  %v5313_v43 = vmov 0  }
 0x133   :  { %3507 = vpow2.f32 %v3187_v45  ;;  %v3189_v52 = vmul.f32 -1.442695, %v623_v56 }
 0x134   :  { %3509 = vpow2.f32 %v3188_v41 }
 0x135   :  { %3511 = vpow2.f32 %v3189_v52 }
 0x136   :  { %3513 = vtanh.f32 %v622_v61 }
 0x13d   :  { %v3508_v48 = vpop.eup %3507 }
 0x13e   :  { %v3510_v50 = vpop.eup %3509  ;;  %v627_v53 = vadd.f32 1.0, %v3508_v48 }
 0x13f   :  { %v633_v51 = vadd.f32 1.0, %v3510_v50  ;;  %v3512_v42 = vpop.eup %3511 }
 0x140   :  { %3515 = vrcp.f32 %v627_v53  ;;  %v3514_v54 = vpop.eup %3513  ;;  %v640_v2 = vadd.f32 1.0, %v3512_v42 }
 0x141   :  { %3517 = vrcp.f32 %v633_v51 }
 0x142   :  { %3519 = vrcp.f32 %v640_v2 }
 0x14a   :  { %v3516_v55 = vpop.eup %3515 }
 0x14b   :  { %v3518_v47 = vpop.eup %3517  ;;  %v644_v59 = vmul.f32 %v3516_v55, %v3514_v54 }
 0x14c   :  { %v643_v32 = vmul.f32 0.0, %v3518_v47  ;;  %v3520_v45 = vpop.eup %3519 }
 0x14e   :  { %v4282_v4 = vadd.f32 %v644_v59, %v643_v32 }
 0x150   :  { %3521 = vtanh.f32 %v4282_v4 }
 0x15a   :  { %v3522_v41 = vpop.eup %3521 }
 0x15b   :  { %v4285_v56 = vmul.f32 %v3522_v41, %v3520_v45 }
 0x15d   :  { %v656_v57 = vpack.c.bf16 %v4285_v56, %v4285_v56 }
 0x15f   :  { %690 = vmatmul.mubr.bf16.vlgmr.msra.gmra.mrb[20].mxu0 %v656_v57  ;;  %731 = vmatmul.mubr.bf16.vlgmr.msra.gmra.mrb[20].mxu1 %v656_v57 }
 0x160   :  { %778 = vmatpush1.bf16.msra.mxu0 %v4028_v8  ;;  %819 = vmatpush1.bf16.msra.mxu1 %v4031_v9 }
 0x161   :  { %779 = vmatprep.subr.bf16.mxu0 %v4035_v10  ;;  %820 = vmatprep.subr.bf16.mxu1 %v4039_v11 }
 0x162   :  { %809 = vmatprep.mubr.bf16.mxu0 %v5313_v43  ;;  %850 = vmatprep.mubr.bf16.mxu1 %v5313_v43 }
 0x164   :  { %780 = vmatpush1.bf16.msra.mxu0 %v4041_v12  ;;  %821 = vmatpush1.bf16.msra.mxu1 %v4043_v13 }
 0x165   :  { %781 = vmatprep.subr.bf16.mxu0 %v4052_v15  ;;  %822 = vmatprep.subr.bf16.mxu1 %v4055_v16 }
 0x168   :  { %782 = vmatpush1.bf16.msra.mxu0 %v4058_v17  ;;  %823 = vmatpush1.bf16.msra.mxu1 %v4060_v18 }
 0x169   :  { %783 = vmatprep.subr.bf16.mxu0 %v4064_v19  ;;  %824 = vmatprep.subr.bf16.mxu1 %v4067_v20 }
 0x16c   :  { %784 = vmatpush1.bf16.msra.mxu0 %v4071_v21  ;;  %825 = vmatpush1.bf16.msra.mxu1 %v4074_v22 }
 0x16d   :  { %785 = vmatprep.subr.bf16.mxu0 %v4079_v23  ;;  %826 = vmatprep.subr.bf16.mxu1 %v4083_v24 }
 0x170   :  { %786 = vmatpush1.bf16.msra.mxu0 %v4089_v26  ;;  %827 = vmatpush1.bf16.msra.mxu1 %v4093_v27 }
 0x171   :  { %787 = vmatprep.subr.bf16.mxu0 %v4095_v28  ;;  %828 = vmatprep.subr.bf16.mxu1 %v4098_v29 }
 0x174   :  { %788 = vmatpush1.bf16.msra.mxu0 %v4103_v30  ;;  %829 = vmatpush1.bf16.msra.mxu1 %v4105_v31 }
 0x175   :  { %789 = vmatprep.subr.bf16.mxu0 %v4113_v33  ;;  %830 = vmatprep.subr.bf16.mxu1 %v4117_v34 }
 0x178   :  { %790 = vmatpush1.bf16.msra.mxu0 %v4119_v35  ;;  %831 = vmatpush1.bf16.msra.mxu1 %v4121_v36 }
 0x179   :  { %791 = vmatprep.subr.bf16.mxu0 %v4123_v37  ;;  %832 = vmatprep.subr.bf16.mxu1 %v4126_v38 }
 0x17c   :  { %792 = vmatpush1.bf16.msra.mxu0 %v4131_v39  ;;  %833 = vmatpush1.bf16.msra.mxu1 %v4135_v40 }
 0x17d   :  { %897 = vmatprep.subr.bf16.mxu0 %v4024_v6  ;;  %938 = vmatprep.subr.bf16.mxu1 %v4026_v7 }
 0x232   :  { %v691_v1 = vpop.f32.mrb[20].mxu0  ;;  %v732_v0 = vpop.f32.mrb[20].mxu1 }
 0x233   :  { %v739_v46 = vadd.f32 %v691_v1, %v4208_v58  ;;  %v741_v61 = vadd.f32 %v732_v0, %v4211_v60  ;;  %v693_v44 = vpop.f32.mrb[21].mxu0  ;;  %v734_v14 = vpop.f32.mrb[21].mxu1 }
 0x234   :  { %v740_v49 = vadd.f32 %v693_v44, %v4213_v62  ;;  %v742_v52 = vadd.f32 %v734_v14, %v4216_v63  ;;  %v695_v48 = vpop.f32.mrb[22].mxu0  ;;  %v736_v50 = vpop.f32.mrb[22].mxu1 }
 0x235   :  { %v3190_v53 = vmul.f32 -1.442695, %v739_v46  ;;  %v696_v51 = vpop.f32.mrb[23].mxu0  ;;  %v737_v42 = vpop.f32.mrb[23].mxu1 }
 0x236   :  { %v3191_v54 = vmul.f32 -1.442695, %v740_v49  ;;  %v3192_v55 = vmul.f32 -1.442695, %v742_v52  ;;  %v5314_v51 = vld [vmem:[#allocation12_spill] sm:$0xff] }
 0x237   :  { %3523 = vpow2.f32 %v3190_v53 }
 0x238   :  { %3525 = vpow2.f32 %v3191_v54 }
 0x239   :  { %3527 = vpow2.f32 %v3192_v55 }
 0x23a   :  { %3529 = vtanh.f32 %v741_v61 }
 0x241   :  { %v3524_v47 = vpop.eup %3523 }
 0x242   :  { %v3526_v59 = vpop.eup %3525  ;;  %v746_v58 = vadd.f32 1.0, %v3524_v47 }
 0x243   :  { %v752_v60 = vadd.f32 1.0, %v3526_v59  ;;  %v3528_v62 = vpop.eup %3527 }
 0x244   :  { %3531 = vrcp.f32 %v746_v58  ;;  %v3530_v2 = vpop.eup %3529  ;;  %v759_v41 = vadd.f32 1.0, %v3528_v62 }
 0x245   :  { %3533 = vrcp.f32 %v752_v60 }
 0x246   :  { %3535 = vrcp.f32 %v759_v41 }
 0x24e   :  { %v3532_v63 = vpop.eup %3531 }
 0x24f   :  { %v3534_v32 = vpop.eup %3533  ;;  %v763_v45 = vmul.f32 %v3532_v63, %v3530_v2 }
 0x250   :  { %v762_v57 = vmul.f32 %v3534_v32, %v4282_v4  ;;  %v3536_v0 = vpop.eup %3535 }
 0x252   :  { %v4328_v1 = vadd.f32 %v763_v45, %v762_v57 }
 0x254   :  { %3537 = vtanh.f32 %v4328_v1 }
 0x25e   :  { %v3538_v46 = vpop.eup %3537 }
 0x25f   :  { %v4331_v44 = vmul.f32 %v3538_v46, %v3536_v0 }
 0x261   :  { %v776_v61 = vpack.c.bf16 %v4331_v44, %v4331_v44 }
 0x263   :  { %810 = vmatmul.mubr.bf16.vlgmr.msra.gmra.mrb[24].mxu0 %v776_v61  ;;  %851 = vmatmul.mubr.bf16.vlgmr.msra.gmra.mrb[24].mxu1 %v776_v61 }
 0x264   :  { %898 = vmatpush1.bf16.msra.mxu0 %v4028_v8  ;;  %939 = vmatpush1.bf16.msra.mxu1 %v4031_v9 }
 0x265   :  { %899 = vmatprep.subr.bf16.mxu0 %v4035_v10  ;;  %940 = vmatprep.subr.bf16.mxu1 %v4039_v11 }
 0x266   :  { %929 = vmatprep.mubr.bf16.mxu0 %v5313_v43  ;;  %970 = vmatprep.mubr.bf16.mxu1 %v5313_v43 }
 0x268   :  { %900 = vmatpush1.bf16.msra.mxu0 %v4041_v12  ;;  %941 = vmatpush1.bf16.msra.mxu1 %v4043_v13 }
 0x269   :  { %901 = vmatprep.subr.bf16.mxu0 %v4052_v15  ;;  %942 = vmatprep.subr.bf16.mxu1 %v4055_v16 }
 0x26c   :  { %902 = vmatpush1.bf16.msra.mxu0 %v4058_v17  ;;  %943 = vmatpush1.bf16.msra.mxu1 %v4060_v18 }
 0x26d   :  { %903 = vmatprep.subr.bf16.mxu0 %v4064_v19  ;;  %944 = vmatprep.subr.bf16.mxu1 %v4067_v20 }
 0x270   :  { %904 = vmatpush1.bf16.msra.mxu0 %v4071_v21  ;;  %945 = vmatpush1.bf16.msra.mxu1 %v4074_v22 }
 0x271   :  { %905 = vmatprep.subr.bf16.mxu0 %v4079_v23  ;;  %946 = vmatprep.subr.bf16.mxu1 %v4083_v24 }
 0x274   :  { %906 = vmatpush1.bf16.msra.mxu0 %v4089_v26  ;;  %947 = vmatpush1.bf16.msra.mxu1 %v4093_v27 }
 0x275   :  { %907 = vmatprep.subr.bf16.mxu0 %v4095_v28  ;;  %948 = vmatprep.subr.bf16.mxu1 %v4098_v29 }
 0x278   :  { %908 = vmatpush1.bf16.msra.mxu0 %v4103_v30  ;;  %949 = vmatpush1.bf16.msra.mxu1 %v4105_v31 }
 0x279   :  { %909 = vmatprep.subr.bf16.mxu0 %v4113_v33  ;;  %950 = vmatprep.subr.bf16.mxu1 %v4117_v34 }
 0x27c   :  { %910 = vmatpush1.bf16.msra.mxu0 %v4119_v35  ;;  %951 = vmatpush1.bf16.msra.mxu1 %v4121_v36 }
 0x27d   :  { %911 = vmatprep.subr.bf16.mxu0 %v4123_v37  ;;  %952 = vmatprep.subr.bf16.mxu1 %v4126_v38 }
 0x280   :  { %912 = vmatpush1.bf16.msra.mxu0 %v4131_v39  ;;  %953 = vmatpush1.bf16.msra.mxu1 %v4135_v40 }
 0x281   :  { %1017 = vmatprep.subr.bf16.mxu0 %v4024_v6  ;;  %1058 = vmatprep.subr.bf16.mxu1 %v4026_v7 }
 0x336   :  { %v811_v4 = vpop.f32.mrb[24].mxu0  ;;  %v852_v14 = vpop.f32.mrb[24].mxu1 }
 0x337   :  { %v859_v49 = vadd.f32 %v811_v4, %v4218_v3  ;;  %v861_v52 = vadd.f32 %v852_v14, %v4221_v5  ;;  %v813_v48 = vpop.f32.mrb[25].mxu0  ;;  %v854_v50 = vpop.f32.mrb[25].mxu1 }
 0x338   :  { %v860_v53 = vadd.f32 %v813_v48, %v4223_v25  ;;  %v862_v42 = vadd.f32 %v854_v50, %v5314_v51  ;;  %v815_v54 = vpop.f32.mrb[26].mxu0  ;;  %v856_v55 = vpop.f32.mrb[26].mxu1 }
 0x339   :  { %v3193_v47 = vmul.f32 -1.442695, %v859_v49  ;;  %v816_v59 = vpop.f32.mrb[27].mxu0  ;;  %v857_v58 = vpop.f32.mrb[27].mxu1 }
 0x33a   :  { %v3194_v6 = vmul.f32 -1.442695, %v860_v53  ;;  %v3195_v7 = vmul.f32 -1.442695, %v862_v42 }
 0x33b   :  { %3539 = vpow2.f32 %v3193_v47 }
 0x33c   :  { %3541 = vpow2.f32 %v3194_v6 }
 0x33d   :  { %3543 = vpow2.f32 %v3195_v7 }
 0x33e   :  { %3545 = vtanh.f32 %v861_v52 }
 0x345   :  { %v3540_v60 = vpop.eup %3539 }
 0x346   :  { %v3542_v62 = vpop.eup %3541  ;;  %v866_v3 = vadd.f32 1.0, %v3540_v60  ;;  %v4431_v60 = vld [vmem:[#allocation4] ss:$16 sps:$4 sm:$0xff]  }
 0x347   :  { %v872_v5 = vadd.f32 1.0, %v3542_v62  ;;  %v3544_v25 = vpop.eup %3543  ;;  %v4434_v62 = vld [vmem:[#allocation4 + $0x8] ss:$16 sps:$4 sm:$0xff]  }
 0x348   :  { %3547 = vrcp.f32 %v866_v3  ;;  %v3546_v2 = vpop.eup %3545  ;;  %v879_v41 = vadd.f32 1.0, %v3544_v25  ;;  %v4437_v3 = vld [vmem:[#allocation4 + $0x24] ss:$16 sps:$4 sm:$0xff]   ;;  %v4445_v25 = vld [vmem:[#allocation4 + $0x20] ss:$16 sps:$4 sm:$0xff]  }
 0x349   :  { %3549 = vrcp.f32 %v872_v5  ;;  %v4440_v5 = vld [vmem:[#allocation4 + $0x2c] ss:$16 sps:$4 sm:$0xff]  }
 0x34a   :  { %3551 = vrcp.f32 %v879_v41  ;;  %v4460_v41 = vld [vmem:[#allocation4 + $0x48] ss:$16 sps:$4 sm:$0xff]  }
 0x352   :  { %v3548_v63 = vpop.eup %3547 }
 0x353   :  { %v3550_v32 = vpop.eup %3549  ;;  %v883_v45 = vmul.f32 %v3548_v63, %v3546_v2  ;;  %v4448_v2 = vld [vmem:[#allocation4 + $0x28] ss:$16 sps:$4 sm:$0xff]   ;;  %v4451_v63 = vld [vmem:[#allocation4 + $0x44] ss:$16 sps:$4 sm:$0xff]  }
 0x354   :  { %v882_v57 = vmul.f32 %v3550_v32, %v4328_v1  ;;  %v3552_v46 = vpop.eup %3551  ;;  %v4454_v32 = vld [vmem:[#allocation4 + $0x4c] ss:$16 sps:$4 sm:$0xff]  }
 0x356   :  { %v4374_v0 = vadd.f32 %v883_v45, %v882_v57  ;;  %v4457_v45 = vld [vmem:[#allocation4 + $0x40] ss:$16 sps:$4 sm:$0xff]   ;;  %v4463_v57 = vld [vmem:[#allocation4 + $0x64] ss:$16 sps:$4 sm:$0xff]  }
 0x358   :  { %3553 = vtanh.f32 %v4374_v0 }
 0x362   :  { %v3554_v61 = vpop.eup %3553 }
 0x363   :  { %v4377_v4 = vmul.f32 %v3554_v61, %v3552_v46  ;;  %v4469_v46 = vld [vmem:[#allocation4 + $0x60] ss:$16 sps:$4 sm:$0xff]   ;;  %v4472_v61 = vld [vmem:[#allocation4 + $0x68] ss:$16 sps:$4 sm:$0xff]  }
 0x365   :  { %v896_v14 = vpack.c.bf16 %v4377_v4, %v4377_v4 }
 0x367   :  { %930 = vmatmul.mubr.bf16.vlgmr.msra.gmra.mrb[28].mxu0 %v896_v14  ;;  %971 = vmatmul.mubr.bf16.vlgmr.msra.gmra.mrb[28].mxu1 %v896_v14  ;;  %v4475_v14 = vld [vmem:[#allocation4 + $0x84] ss:$16 sps:$4 sm:$0xff]  }
 0x368   :  { %1018 = vmatpush1.bf16.msra.mxu0 %v4028_v8  ;;  %1059 = vmatpush1.bf16.msra.mxu1 %v4031_v9  ;;  %v4413_v8 = vld [vmem:[#allocation4 + $0x4] ss:$16 sps:$4 sm:$0xff]   ;;  %v4416_v9 = vld [vmem:[#allocation4 + $0xc] ss:$16 sps:$4 sm:$0xff]  }
 0x369   :  { %1019 = vmatprep.subr.bf16.mxu0 %v4035_v10  ;;  %1060 = vmatprep.subr.bf16.mxu1 %v4039_v11 }
 0x36a   :  { %1049 = vmatprep.mubr.bf16.mxu0 %v5313_v43  ;;  %1090 = vmatprep.mubr.bf16.mxu1 %v5313_v43 }
 0x36c   :  { %1020 = vmatpush1.bf16.msra.mxu0 %v4041_v12  ;;  %1061 = vmatpush1.bf16.msra.mxu1 %v4043_v13  ;;  %v5315_v12 = vld [vmem:[#allocation13_spill] sm:$0xff] }
 0x36d   :  { %1021 = vmatprep.subr.bf16.mxu0 %v4052_v15  ;;  %1062 = vmatprep.subr.bf16.mxu1 %v4055_v16  ;;  %v5316_v15 = vld [vmem:[#allocation14_spill] sm:$0xff] }
 0x370   :  { %1022 = vmatpush1.bf16.msra.mxu0 %v4058_v17  ;;  %1063 = vmatpush1.bf16.msra.mxu1 %v4060_v18 }
 0x371   :  { %1023 = vmatprep.subr.bf16.mxu0 %v4064_v19  ;;  %1064 = vmatprep.subr.bf16.mxu1 %v4067_v20  ;;  %v5317_v19 = vld [vmem:[#allocation15_spill] sm:$0xff] }
 0x374   :  { %1024 = vmatpush1.bf16.msra.mxu0 %v4071_v21  ;;  %1065 = vmatpush1.bf16.msra.mxu1 %v4074_v22  ;;  %v5318_v21 = vld [vmem:[#allocation16_spill] sm:$0xff] }
 0x375   :  { %1025 = vmatprep.subr.bf16.mxu0 %v4079_v23  ;;  %1066 = vmatprep.subr.bf16.mxu1 %v4083_v24 }
 0x378   :  { %1026 = vmatpush1.bf16.msra.mxu0 %v4089_v26  ;;  %1067 = vmatpush1.bf16.msra.mxu1 %v4093_v27 }
 0x379   :  { %1027 = vmatprep.subr.bf16.mxu0 %v4095_v28  ;;  %1068 = vmatprep.subr.bf16.mxu1 %v4098_v29 }
 0x37c   :  { %1028 = vmatpush1.bf16.msra.mxu0 %v4103_v30  ;;  %1069 = vmatpush1.bf16.msra.mxu1 %v4105_v31 }
 0x37d   :  { %1029 = vmatprep.subr.bf16.mxu0 %v4113_v33  ;;  %1070 = vmatprep.subr.bf16.mxu1 %v4117_v34 }
 0x380   :  { %1030 = vmatpush1.bf16.msra.mxu0 %v4119_v35  ;;  %1071 = vmatpush1.bf16.msra.mxu1 %v4121_v36 }
 0x381   :  { %1031 = vmatprep.subr.bf16.mxu0 %v4123_v37  ;;  %1072 = vmatprep.subr.bf16.mxu1 %v4126_v38 }
 0x384   :  { %1032 = vmatpush1.bf16.msra.mxu0 %v4131_v39  ;;  %1073 = vmatpush1.bf16.msra.mxu1 %v4135_v40 }
 0x385   :  { %1137 = vmatprep.subr.bf16.mxu0 %v4413_v8  ;;  %1178 = vmatprep.subr.bf16.mxu1 %v4416_v9 }
 0x43a   :  { %v931_v10 = vpop.f32.mrb[28].mxu0  ;;  %v972_v11 = vpop.f32.mrb[28].mxu1 }
 0x43b   :  { %v979_v13 = vadd.f32 %v931_v10, %v5315_v12  ;;  %v981_v16 = vadd.f32 %v972_v11, %v5316_v15  ;;  %v933_v17 = vpop.f32.mrb[29].mxu0  ;;  %v974_v18 = vpop.f32.mrb[29].mxu1  ;;  %v4478_v10 = vld [vmem:[#allocation4 + $0x8c] ss:$16 sps:$4 sm:$0xff]   ;;  %v4481_v11 = vld [vmem:[#allocation4 + $0x80] ss:$16 sps:$4 sm:$0xff]  }
 0x43c   :  { %v980_v20 = vadd.f32 %v933_v17, %v5317_v19  ;;  %v982_v22 = vadd.f32 %v974_v18, %v5318_v21  ;;  %v935_v23 = vpop.f32.mrb[30].mxu0  ;;  %v976_v24 = vpop.f32.mrb[30].mxu1  ;;  %v4484_v12 = vld [vmem:[#allocation4 + $0x88] ss:$16 sps:$4 sm:$0xff]   ;;  %v4490_v15 = vld [vmem:[#allocation4 + $0xac] ss:$16 sps:$4 sm:$0xff]  }
 0x43d   :  { %v3196_v26 = vmul.f32 -1.442695, %v979_v13  ;;  %v936_v27 = vpop.f32.mrb[31].mxu0  ;;  %v977_v28 = vpop.f32.mrb[31].mxu1  ;;  %v4487_v13 = vld [vmem:[#allocation4 + $0xa4] ss:$16 sps:$4 sm:$0xff]  }
 0x43e   :  { %v3197_v29 = vmul.f32 -1.442695, %v980_v20  ;;  %v3198_v30 = vmul.f32 -1.442695, %v982_v22  ;;  %v4496_v17 = vld [vmem:[#allocation4 + $0xa8] ss:$16 sps:$4 sm:$0xff]  }
 0x43f   :  { %3555 = vpow2.f32 %v3196_v26  ;;  %v5319_v19 = vld [vmem:[#allocation17_spill] sm:$0xff]  ;;  %v5320_v20 = vld [vmem:[#allocation18_spill] sm:$0xff]  ;;  %v5321_v22 = vld [vmem:[#allocation19_spill] sm:$0xff] }
 0x440   :  { %3557 = vpow2.f32 %v3197_v29  ;;  %v5322_v23 = vld [vmem:[#allocation20_spill] sm:$0xff] }
 0x441   :  { %3559 = vpow2.f32 %v3198_v30 }
 0x442   :  { %3561 = vtanh.f32 %v981_v16  ;;  %v4493_v16 = vld [vmem:[#allocation4 + $0xa0] ss:$16 sps:$4 sm:$0xff]  }
 0x449   :  { %v3556_v31 = vpop.eup %3555 }
 0x44a   :  { %v3558_v1 = vpop.eup %3557  ;;  %v986_v49 = vadd.f32 1.0, %v3556_v31 }
 0x44b   :  { %v992_v52 = vadd.f32 1.0, %v3558_v1  ;;  %v3560_v48 = vpop.eup %3559 }
 0x44c   :  { %3563 = vrcp.f32 %v986_v49  ;;  %v3562_v50 = vpop.eup %3561  ;;  %v999_v54 = vadd.f32 1.0, %v3560_v48 }
 0x44d   :  { %3565 = vrcp.f32 %v992_v52 }
 0x44e   :  { %3567 = vrcp.f32 %v999_v54 }
 0x456   :  { %v3564_v53 = vpop.eup %3563 }
 0x457   :  { %v3566_v51 = vpop.eup %3565  ;;  %v1003_v42 = vmul.f32 %v3564_v53, %v3562_v50 }
 0x458   :  { %v1002_v55 = vmul.f32 %v3566_v51, %v4374_v0  ;;  %v3568_v59 = vpop.eup %3567  ;;  %v4466_v0 = vld [vmem:[#allocation4 + $0x6c] ss:$16 sps:$4 sm:$0xff]  }
 0x45a   :  { %v4424_v47 = vadd.f32 %v1003_v42, %v1002_v55 }
 0x45c   :  { %3569 = vtanh.f32 %v4424_v47 }
 0x466   :  { %v3570_v58 = vpop.eup %3569 }
 0x467   :  { %v4427_v6 = vmul.f32 %v3570_v58, %v3568_v59 }
 0x469   :  { %v1016_v7 = vpack.c.bf16 %v4427_v6, %v4427_v6 }
 0x46b   :  { %1050 = vmatmul.mubr.bf16.vlgmr.msra.gmra.mrb[32].mxu0 %v1016_v7  ;;  %1091 = vmatmul.mubr.bf16.vlgmr.msra.gmra.mrb[32].mxu1 %v1016_v7 }
 0x46c   :  { %1138 = vmatpush1.bf16.msra.mxu0 %v4431_v60  ;;  %1179 = vmatpush1.bf16.msra.mxu1 %v4434_v62 }
 0x46d   :  { %1139 = vmatprep.subr.bf16.mxu0 %v4437_v3  ;;  %1180 = vmatprep.subr.bf16.mxu1 %v4440_v5 }
 0x46e   :  { %1169 = vmatprep.mubr.bf16.mxu0 %v5313_v43  ;;  %1210 = vmatprep.mubr.bf16.mxu1 %v5313_v43 }
 0x470   :  { %1140 = vmatpush1.bf16.msra.mxu0 %v4445_v25  ;;  %1181 = vmatpush1.bf16.msra.mxu1 %v4448_v2 }
 0x471   :  { %1141 = vmatprep.subr.bf16.mxu0 %v4451_v63  ;;  %1182 = vmatprep.subr.bf16.mxu1 %v4454_v32 }
 0x474   :  { %1142 = vmatpush1.bf16.msra.mxu0 %v4457_v45  ;;  %1183 = vmatpush1.bf16.msra.mxu1 %v4460_v41 }
 0x475   :  { %1143 = vmatprep.subr.bf16.mxu0 %v4463_v57  ;;  %1184 = vmatprep.subr.bf16.mxu1 %v4466_v0 }
 0x478   :  { %1144 = vmatpush1.bf16.msra.mxu0 %v4469_v46  ;;  %1185 = vmatpush1.bf16.msra.mxu1 %v4472_v61 }
 0x479   :  { %1145 = vmatprep.subr.bf16.mxu0 %v4475_v14  ;;  %1186 = vmatprep.subr.bf16.mxu1 %v4478_v10 }
 0x47c   :  { %1146 = vmatpush1.bf16.msra.mxu0 %v4481_v11  ;;  %1187 = vmatpush1.bf16.msra.mxu1 %v4484_v12 }
 0x47d   :  { %1147 = vmatprep.subr.bf16.mxu0 %v4487_v13  ;;  %1188 = vmatprep.subr.bf16.mxu1 %v4490_v15 }
 0x480   :  { %1148 = vmatpush1.bf16.msra.mxu0 %v4493_v16  ;;  %1189 = vmatpush1.bf16.msra.mxu1 %v4496_v17 }
 0x481   :  { %1149 = vmatprep.subr.bf16.mxu0 %v4113_v33  ;;  %1190 = vmatprep.subr.bf16.mxu1 %v4117_v34 }
 0x484   :  { %1150 = vmatpush1.bf16.msra.mxu0 %v4119_v35  ;;  %1191 = vmatpush1.bf16.msra.mxu1 %v4121_v36 }
 0x485   :  { %1151 = vmatprep.subr.bf16.mxu0 %v4123_v37  ;;  %1192 = vmatprep.subr.bf16.mxu1 %v4126_v38 }
 0x488   :  { %1152 = vmatpush1.bf16.msra.mxu0 %v4131_v39  ;;  %1193 = vmatpush1.bf16.msra.mxu1 %v4135_v40 }
 0x489   :  { %1257 = vmatprep.subr.bf16.mxu0 %v4413_v8  ;;  %1298 = vmatprep.subr.bf16.mxu1 %v4416_v9 }
 0x53e   :  { %v1051_v18 = vpop.f32.mrb[32].mxu0  ;;  %v1092_v33 = vpop.f32.mrb[32].mxu1 }
 0x53f   :  { %v1099_v34 = vadd.f32 %v1051_v18, %v5319_v19  ;;  %v1101_v35 = vadd.f32 %v1092_v33, %v5320_v20  ;;  %v1053_v21 = vpop.f32.mrb[33].mxu0  ;;  %v1094_v36 = vpop.f32.mrb[33].mxu1  ;;  %v4548_v33 = vld [vmem:[#allocation4 + $0xcc] ss:$16 sps:$4 sm:$0xff]   ;;  %v4551_v19 = vld [vmem:[#allocation4 + $0xc0] ss:$16 sps:$4 sm:$0xff]  }
 0x540   :  { %v1100_v37 = vadd.f32 %v1053_v21, %v5321_v22  ;;  %v1102_v38 = vadd.f32 %v1094_v36, %v5322_v23  ;;  %v1055_v24 = vpop.f32.mrb[34].mxu0  ;;  %v1096_v39 = vpop.f32.mrb[34].mxu1  ;;  %v4557_v20 = vld [vmem:[#allocation4 + $0xe4] ss:$16 sps:$4 sm:$0xff]   ;;  %v4563_v21 = vld [vmem:[#allocation4 + $0xe0] ss:$16 sps:$4 sm:$0xff]  }
 0x541   :  { %v3199_v26 = vmul.f32 -1.442695, %v1099_v34  ;;  %v1056_v40 = vpop.f32.mrb[35].mxu0  ;;  %v1097_v27 = vpop.f32.mrb[35].mxu1  ;;  %v4554_v34 = vld [vmem:[#allocation4 + $0xc8] ss:$16 sps:$4 sm:$0xff]  }
 0x542   :  { %v3200_v28 = vmul.f32 -1.442695, %v1100_v37  ;;  %v3201_v29 = vmul.f32 -1.442695, %v1102_v38  ;;  %v4566_v36 = vld [vmem:[#allocation4 + $0xe8] ss:$16 sps:$4 sm:$0xff]  }
 0x543   :  { %3571 = vpow2.f32 %v3199_v26  ;;  %v5323_v23 = vld [vmem:[#allocation21_spill] sm:$0xff]  ;;  %v5324_v24 = vld [vmem:[#allocation22_spill] sm:$0xff]  ;;  %v5325_v27 = vld [vmem:[#allocation23_spill] sm:$0xff] }
 0x544   :  { %3573 = vpow2.f32 %v3200_v28 }
 0x545   :  { %3575 = vpow2.f32 %v3201_v29  ;;  %v5326_v29 = vld [vmem:[#allocation24_spill] sm:$0xff] }
 0x546   :  { %3577 = vtanh.f32 %v1101_v35  ;;  %v4560_v35 = vld [vmem:[#allocation4 + $0xec] ss:$16 sps:$4 sm:$0xff]  }
 0x54d   :  { %v3572_v30 = vpop.eup %3571 }
 0x54e   :  { %v3574_v31 = vpop.eup %3573  ;;  %v1106_v1 = vadd.f32 1.0, %v3572_v30 }
 0x54f   :  { %v1112_v49 = vadd.f32 1.0, %v3574_v31  ;;  %v3576_v52 = vpop.eup %3575 }
 0x550   :  { %3579 = vrcp.f32 %v1106_v1  ;;  %v3578_v48 = vpop.eup %3577  ;;  %v1119_v42 = vadd.f32 1.0, %v3576_v52 }
 0x551   :  { %3581 = vrcp.f32 %v1112_v49 }
 0x552   :  { %3583 = vrcp.f32 %v1119_v42 }
 0x55a   :  { %v3580_v50 = vpop.eup %3579 }
 0x55b   :  { %v3582_v53 = vpop.eup %3581  ;;  %v1123_v51 = vmul.f32 %v3580_v50, %v3578_v48 }
 0x55c   :  { %v1122_v54 = vmul.f32 %v3582_v53, %v4424_v47  ;;  %v3584_v59 = vpop.eup %3583  ;;  %v4545_v47 = vld [vmem:[#allocation4 + $0xc4] ss:$16 sps:$4 sm:$0xff]  }
 0x55e   :  { %v4514_v55 = vadd.f32 %v1123_v51, %v1122_v54 }
 0x560   :  { %3585 = vtanh.f32 %v4514_v55 }
 0x56a   :  { %v3586_v58 = vpop.eup %3585 }
 0x56b   :  { %v4517_v7 = vmul.f32 %v3586_v58, %v3584_v59 }
 0x56d   :  { %v1136_v18 = vpack.c.bf16 %v4517_v7, %v4517_v7 }
 0x56f   :  { %1170 = vmatmul.mubr.bf16.vlgmr.msra.gmra.mrb[36].mxu0 %v1136_v18  ;;  %1211 = vmatmul.mubr.bf16.vlgmr.msra.gmra.mrb[36].mxu1 %v1136_v18 }
 0x570   :  { %1258 = vmatpush1.bf16.msra.mxu0 %v4431_v60  ;;  %1299 = vmatpush1.bf16.msra.mxu1 %v4434_v62 }
 0x571   :  { %1259 = vmatprep.subr.bf16.mxu0 %v4437_v3  ;;  %1300 = vmatprep.subr.bf16.mxu1 %v4440_v5 }
 0x572   :  { %1289 = vmatprep.mubr.bf16.mxu0 %v5313_v43  ;;  %1330 = vmatprep.mubr.bf16.mxu1 %v5313_v43 }
 0x574   :  { %1260 = vmatpush1.bf16.msra.mxu0 %v4445_v25  ;;  %1301 = vmatpush1.bf16.msra.mxu1 %v4448_v2 }
 0x575   :  { %1261 = vmatprep.subr.bf16.mxu0 %v4451_v63  ;;  %1302 = vmatprep.subr.bf16.mxu1 %v4454_v32 }
 0x578   :  { %1262 = vmatpush1.bf16.msra.mxu0 %v4457_v45  ;;  %1303 = vmatpush1.bf16.msra.mxu1 %v4460_v41 }
 0x579   :  { %1263 = vmatprep.subr.bf16.mxu0 %v4463_v57  ;;  %1304 = vmatprep.subr.bf16.mxu1 %v4466_v0 }
 0x57c   :  { %1264 = vmatpush1.bf16.msra.mxu0 %v4469_v46  ;;  %1305 = vmatpush1.bf16.msra.mxu1 %v4472_v61 }
 0x57d   :  { %1265 = vmatprep.subr.bf16.mxu0 %v4475_v14  ;;  %1306 = vmatprep.subr.bf16.mxu1 %v4478_v10 }
 0x580   :  { %1266 = vmatpush1.bf16.msra.mxu0 %v4481_v11  ;;  %1307 = vmatpush1.bf16.msra.mxu1 %v4484_v12 }
 0x581   :  { %1267 = vmatprep.subr.bf16.mxu0 %v4487_v13  ;;  %1308 = vmatprep.subr.bf16.mxu1 %v4490_v15 }
 0x584   :  { %1268 = vmatpush1.bf16.msra.mxu0 %v4493_v16  ;;  %1309 = vmatpush1.bf16.msra.mxu1 %v4496_v17 }
 0x585   :  { %1269 = vmatprep.subr.bf16.mxu0 %v4545_v47  ;;  %1310 = vmatprep.subr.bf16.mxu1 %v4548_v33 }
 0x588   :  { %1270 = vmatpush1.bf16.msra.mxu0 %v4551_v19  ;;  %1311 = vmatpush1.bf16.msra.mxu1 %v4554_v34 }
 0x589   :  { %1271 = vmatprep.subr.bf16.mxu0 %v4557_v20  ;;  %1312 = vmatprep.subr.bf16.mxu1 %v4560_v35 }
 0x58c   :  { %1272 = vmatpush1.bf16.msra.mxu0 %v4563_v21  ;;  %1313 = vmatpush1.bf16.msra.mxu1 %v4566_v36 }
 0x58d   :  { %1377 = vmatprep.subr.bf16.mxu0 %v4413_v8  ;;  %1418 = vmatprep.subr.bf16.mxu1 %v4416_v9 }
 0x642   :  { %v1171_v22 = vpop.f32.mrb[36].mxu0  ;;  %v1212_v37 = vpop.f32.mrb[36].mxu1 }
 0x643   :  { %v1219_v38 = vadd.f32 %v1171_v22, %v5323_v23  ;;  %v1221_v39 = vadd.f32 %v1212_v37, %v5324_v24  ;;  %v1173_v26 = vpop.f32.mrb[37].mxu0  ;;  %v1214_v40 = vpop.f32.mrb[37].mxu1 }
 0x644   :  { %v1220_v28 = vadd.f32 %v1173_v26, %v5325_v27  ;;  %v1222_v30 = vadd.f32 %v1214_v40, %v5326_v29  ;;  %v1175_v31 = vpop.f32.mrb[38].mxu0  ;;  %v1216_v1 = vpop.f32.mrb[38].mxu1 }
 0x645   :  { %v3202_v49 = vmul.f32 -1.442695, %v1219_v38  ;;  %v1176_v52 = vpop.f32.mrb[39].mxu0  ;;  %v1217_v48 = vpop.f32.mrb[39].mxu1  ;;  %v3403_v1 = vld [vmem:[#allocation6] ss:$16 sps:$4 sm:$0xff]  }
 0x646   :  { %v3203_v8 = vmul.f32 -1.442695, %v1220_v28  ;;  %v3204_v9 = vmul.f32 -1.442695, %v1222_v30  ;;  %v3411_v48 = vld [vmem:[#allocation6 + $0x24] ss:$16 sps:$4 sm:$0xff]  }
 0x647   :  { %3587 = vpow2.f32 %v3202_v49  ;;  %v3406_v49 = vld [vmem:[#allocation6 + $0x8] ss:$16 sps:$4 sm:$0xff]  }
 0x648   :  { %3589 = vpow2.f32 %v3203_v8  ;;  %v3414_v8 = vld [vmem:[#allocation6 + $0x2c] ss:$16 sps:$4 sm:$0xff]  }
 0x649   :  { %3591 = vpow2.f32 %v3204_v9  ;;  %v3409_v9 = vld [vmem:[#allocation6 + $0x20] ss:$16 sps:$4 sm:$0xff]  }
 0x64a   :  { %3593 = vtanh.f32 %v1221_v39 }
 0x651   :  { %v3588_v50 = vpop.eup %3587 }
 0x652   :  { %v3590_v53 = vpop.eup %3589  ;;  %v1226_v51 = vadd.f32 1.0, %v3588_v50  ;;  %v3412_v50 = vld [vmem:[#allocation6 + $0x28] ss:$16 sps:$4 sm:$0xff]  }
 0x653   :  { %v1232_v42 = vadd.f32 1.0, %v3590_v53  ;;  %v3592_v54 = vpop.eup %3591  ;;  %v3417_v53 = vld [vmem:[#allocation6 + $0x44] ss:$16 sps:$4 sm:$0xff]  }
 0x654   :  { %3595 = vrcp.f32 %v1226_v51  ;;  %v3594_v59 = vpop.eup %3593  ;;  %v1239_v37 = vadd.f32 1.0, %v3592_v54  ;;  %v3420_v51 = vld [vmem:[#allocation6 + $0x4c] ss:$16 sps:$4 sm:$0xff]   ;;  %v3418_v54 = vld [vmem:[#allocation6 + $0x48] ss:$16 sps:$4 sm:$0xff]  }
 0x655   :  { %3597 = vrcp.f32 %v1232_v42  ;;  %v3415_v42 = vld [vmem:[#allocation6 + $0x40] ss:$16 sps:$4 sm:$0xff]  }
 0x656   :  { %3599 = vrcp.f32 %v1239_v37  ;;  %v3429_v37 = vld [vmem:[#allocation6 + $0x84] ss:$16 sps:$4 sm:$0xff]  }
 0x65e   :  { %v3596_v58 = vpop.eup %3595 }
 0x65f   :  { %v3598_v18 = vpop.eup %3597  ;;  %v1243_v22 = vmul.f32 %v3596_v58, %v3594_v59  ;;  %v3423_v59 = vld [vmem:[#allocation6 + $0x64] ss:$16 sps:$4 sm:$0xff]   ;;  %v3426_v58 = vld [vmem:[#allocation6 + $0x6c] ss:$16 sps:$4 sm:$0xff]  }
 0x660   :  { %v1242_v23 = vmul.f32 %v3598_v18, %v4514_v55  ;;  %v3600_v24 = vpop.eup %3599  ;;  %v3421_v18 = vld [vmem:[#allocation6 + $0x60] ss:$16 sps:$4 sm:$0xff]  }
 0x662   :  { %v4576_v38 = vadd.f32 %v1243_v22, %v1242_v23  ;;  %v3424_v22 = vld [vmem:[#allocation6 + $0x68] ss:$16 sps:$4 sm:$0xff]   ;;  %v3432_v23 = vld [vmem:[#allocation6 + $0x8c] ss:$16 sps:$4 sm:$0xff]  }
 0x664   :  { %3601 = vtanh.f32 %v4576_v38 }
 0x66e   :  { %v3602_v26 = vpop.eup %3601 }
 0x66f   :  { %v4579_v40 = vmul.f32 %v3602_v26, %v3600_v24  ;;  %v3430_v24 = vld [vmem:[#allocation6 + $0x88] ss:$16 sps:$4 sm:$0xff]   ;;  %v3435_v26 = vld [vmem:[#allocation6 + $0xa4] ss:$16 sps:$4 sm:$0xff]  }
 0x671   :  { %v1256_v39 = vpack.c.bf16 %v4579_v40, %v4579_v40 }
 0x673   :  { %1290 = vmatmul.mubr.bf16.vlgmr.msra.gmra.mrb[40].mxu0 %v1256_v39  ;;  %1331 = vmatmul.mubr.bf16.vlgmr.msra.gmra.mrb[40].mxu1 %v1256_v39  ;;  %v3438_v39 = vld [vmem:[#allocation6 + $0xac] ss:$16 sps:$4 sm:$0xff]  }
 0x674   :  { %1378 = vmatpush1.bf16.msra.mxu0 %v4431_v60  ;;  %1419 = vmatpush1.bf16.msra.mxu1 %v4434_v62  ;;  %v3405_v60 = vld [vmem:[#allocation6 + $0x4] ss:$16 sps:$4 sm:$0xff]   ;;  %v3408_v62 = vld [vmem:[#allocation6 + $0xc] ss:$16 sps:$4 sm:$0xff]  }
 0x675   :  { %1379 = vmatprep.subr.bf16.mxu0 %v4437_v3  ;;  %1420 = vmatprep.subr.bf16.mxu1 %v4440_v5 }
 0x676   :  { %1409 = vmatprep.mubr.bf16.mxu0 %v5313_v43  ;;  %1450 = vmatprep.mubr.bf16.mxu1 %v5313_v43 }
 0x678   :  { %1380 = vmatpush1.bf16.msra.mxu0 %v4445_v25  ;;  %1421 = vmatpush1.bf16.msra.mxu1 %v4448_v2  ;;  %v5327_v25 = vld [vmem:[#allocation25_spill] sm:$0xff] }
 0x679   :  { %1381 = vmatprep.subr.bf16.mxu0 %v4451_v63  ;;  %1422 = vmatprep.subr.bf16.mxu1 %v4454_v32  ;;  %v5328_v63 = vld [vmem:[#allocation26_spill] sm:$0xff] }
 0x67c   :  { %1382 = vmatpush1.bf16.msra.mxu0 %v4457_v45  ;;  %1423 = vmatpush1.bf16.msra.mxu1 %v4460_v41 }
 0x67d   :  { %1383 = vmatprep.subr.bf16.mxu0 %v4463_v57  ;;  %1424 = vmatprep.subr.bf16.mxu1 %v4466_v0  ;;  %v5329_v57 = vld [vmem:[#allocation27_spill] sm:$0xff] }
 0x680   :  { %1384 = vmatpush1.bf16.msra.mxu0 %v4469_v46  ;;  %1425 = vmatpush1.bf16.msra.mxu1 %v4472_v61  ;;  %v5330_v46 = vld [vmem:[#allocation28_spill] sm:$0xff] }
 0x681   :  { %1385 = vmatprep.subr.bf16.mxu0 %v4475_v14  ;;  %1426 = vmatprep.subr.bf16.mxu1 %v4478_v10 }
 0x684   :  { %1386 = vmatpush1.bf16.msra.mxu0 %v4481_v11  ;;  %1427 = vmatpush1.bf16.msra.mxu1 %v4484_v12 }
 0x685   :  { %1387 = vmatprep.subr.bf16.mxu0 %v4487_v13  ;;  %1428 = vmatprep.subr.bf16.mxu1 %v4490_v15 }
 0x688   :  { %1388 = vmatpush1.bf16.msra.mxu0 %v4493_v16  ;;  %1429 = vmatpush1.bf16.msra.mxu1 %v4496_v17 }
 0x689   :  { %1389 = vmatprep.subr.bf16.mxu0 %v4545_v47  ;;  %1430 = vmatprep.subr.bf16.mxu1 %v4548_v33 }
 0x68c   :  { %1390 = vmatpush1.bf16.msra.mxu0 %v4551_v19  ;;  %1431 = vmatpush1.bf16.msra.mxu1 %v4554_v34 }
 0x68d   :  { %1391 = vmatprep.subr.bf16.mxu0 %v4557_v20  ;;  %1432 = vmatprep.subr.bf16.mxu1 %v4560_v35 }
 0x690   :  { %1392 = vmatpush1.bf16.msra.mxu0 %v4563_v21  ;;  %1433 = vmatpush1.bf16.msra.mxu1 %v4566_v36 }
 0x691   :  { %1715 = vmatprep.subr.bf16.mxu0 %v3405_v60  ;;  %1788 = vmatprep.subr.bf16.mxu1 %v3408_v62  ;;  %v3433_v60 = vld [vmem:[#allocation6 + $0xa0] ss:$16 sps:$4 sm:$0xff]   ;;  %v3436_v62 = vld [vmem:[#allocation6 + $0xa8] ss:$16 sps:$4 sm:$0xff]  }
 0x746   :  { %v1291_v3 = vpop.f32.mrb[40].mxu0  ;;  %v1332_v5 = vpop.f32.mrb[40].mxu1 }
 0x747   :  { %v1339_v2 = vadd.f32 %v1291_v3, %v5327_v25  ;;  %v1341_v32 = vadd.f32 %v1332_v5, %v5328_v63  ;;  %v1293_v45 = vpop.f32.mrb[41].mxu0  ;;  %v1334_v41 = vpop.f32.mrb[41].mxu1  ;;  %v3441_v3 = vld [vmem:[#allocation6 + $0xc4] ss:$16 sps:$4 sm:$0xff]   ;;  %v3444_v5 = vld [vmem:[#allocation6 + $0xcc] ss:$16 sps:$4 sm:$0xff]  }
 0x748   :  { %v1340_v0 = vadd.f32 %v1293_v45, %v5329_v57  ;;  %v1342_v61 = vadd.f32 %v1334_v41, %v5330_v46  ;;  %v1295_v14 = vpop.f32.mrb[42].mxu0  ;;  %v1336_v10 = vpop.f32.mrb[42].mxu1  ;;  %v3439_v25 = vld [vmem:[#allocation6 + $0xc0] ss:$16 sps:$4 sm:$0xff]   ;;  %v3447_v63 = vld [vmem:[#allocation6 + $0xe4] ss:$16 sps:$4 sm:$0xff]   ;;  %v1497_v57 = vpack.c.bf16 %v4331_v44, %v4285_v56  ;;  %v1499_v46 = vpack.c.bf16 %v4579_v40, %v4517_v7 }
 0x749   :  { %v3205_v11 = vmul.f32 -1.442695, %v1339_v2  ;;  %v1296_v12 = vpop.f32.mrb[43].mxu0  ;;  %v1337_v13 = vpop.f32.mrb[43].mxu1  ;;  %v3442_v2 = vld [vmem:[#allocation6 + $0xc8] ss:$16 sps:$4 sm:$0xff]  }
 0x74a   :  { %v3206_v15 = vmul.f32 -1.442695, %v1340_v0  ;;  %v3207_v16 = vmul.f32 -1.442695, %v1342_v61  ;;  %v3445_v45 = vld [vmem:[#allocation6 + $0xe0] ss:$16 sps:$4 sm:$0xff]   ;;  %v1498_v0 = vpack.c.bf16 %v4427_v6, %v4377_v4 }
 0x74b   :  { %3603 = vpow2.f32 %v3205_v11  ;;  %v3448_v41 = vld [vmem:[#allocation6 + $0xe8] ss:$16 sps:$4 sm:$0xff]   ;;  %v4641_v56 = vld [vmem:[#allocation8 + $0x4] ss:$16 sps:$4 sm:$0xff]   ;;  %v4643_v44 = vld [vmem:[#allocation8 + $0xc] ss:$16 sps:$4 sm:$0xff]  }
 0x74c   :  { %3605 = vpow2.f32 %v3206_v15  ;;  %v4645_v4 = vld [vmem:[#allocation8] ss:$16 sps:$4 sm:$0xff]   ;;  %v4647_v6 = vld [vmem:[#allocation8 + $0x8] ss:$16 sps:$4 sm:$0xff]   ;;  %v4653_v7 = vld [vmem:[#allocation8 + $0x24] ss:$16 sps:$4 sm:$0xff]  }
 0x74d   :  { %3607 = vpow2.f32 %v3207_v16  ;;  %v4655_v40 = vld [vmem:[#allocation8 + $0x2c] ss:$16 sps:$4 sm:$0xff]   ;;  %v4657_v61 = vld [vmem:[#allocation8 + $0x20] ss:$16 sps:$4 sm:$0xff]   ;;  %v4659_v14 = vld [vmem:[#allocation8 + $0x28] ss:$16 sps:$4 sm:$0xff]  }
 0x74e   :  { %3609 = vtanh.f32 %v1341_v32  ;;  %v3450_v32 = vld [vmem:[#allocation6 + $0xec] ss:$16 sps:$4 sm:$0xff]   ;;  %v4665_v10 = vld [vmem:[#allocation8 + $0x44] ss:$16 sps:$4 sm:$0xff]   ;;  %v4669_v12 = vld [vmem:[#allocation8 + $0x40] ss:$16 sps:$4 sm:$0xff]  }
 0x74f   :  { %v4667_v11 = vld [vmem:[#allocation8 + $0x4c] ss:$16 sps:$4 sm:$0xff]   ;;  %v4671_v13 = vld [vmem:[#allocation8 + $0x48] ss:$16 sps:$4 sm:$0xff]   ;;  %v4677_v15 = vld [vmem:[#allocation8 + $0x64] ss:$16 sps:$4 sm:$0xff]  }
 0x750   :  { %v4679_v16 = vld [vmem:[#allocation8 + $0x6c] ss:$16 sps:$4 sm:$0xff]  }
 0x755   :  { %v3604_v17 = vpop.eup %3603 }
 0x756   :  { %v3606_v55 = vpop.eup %3605  ;;  %v1346_v47 = vadd.f32 1.0, %v3604_v17  ;;  %v4681_v17 = vld [vmem:[#allocation8 + $0x60] ss:$16 sps:$4 sm:$0xff]  }
 0x757   :  { %v1352_v33 = vadd.f32 1.0, %v3606_v55  ;;  %v3608_v19 = vpop.eup %3607  ;;  %v4683_v55 = vld [vmem:[#allocation8 + $0x68] ss:$16 sps:$4 sm:$0xff]  }
 0x758   :  { %3611 = vrcp.f32 %v1346_v47  ;;  %v3610_v34 = vpop.eup %3609  ;;  %v1359_v36 = vadd.f32 1.0, %v3608_v19  ;;  %v4689_v47 = vld [vmem:[#allocation8 + $0x84] ss:$16 sps:$4 sm:$0xff]   ;;  %v4693_v19 = vld [vmem:[#allocation8 + $0x80] ss:$16 sps:$4 sm:$0xff]  }
 0x759   :  { %3613 = vrcp.f32 %v1352_v33  ;;  %v4691_v33 = vld [vmem:[#allocation8 + $0x8c] ss:$16 sps:$4 sm:$0xff]  }
 0x75a   :  { %3615 = vrcp.f32 %v1359_v36  ;;  %v4707_v36 = vld [vmem:[#allocation8 + $0xa8] ss:$16 sps:$4 sm:$0xff]  }
 0x762   :  { %v3612_v20 = vpop.eup %3611 }
 0x763   :  { %v3614_v35 = vpop.eup %3613  ;;  %v1363_v21 = vmul.f32 %v3612_v20, %v3610_v34  ;;  %v4695_v34 = vld [vmem:[#allocation8 + $0x88] ss:$16 sps:$4 sm:$0xff]   ;;  %v4701_v20 = vld [vmem:[#allocation8 + $0xa4] ss:$16 sps:$4 sm:$0xff]  }
 0x764   :  { %v1362_v27 = vmul.f32 %v3614_v35, %v4576_v38  ;;  %v3616_v29 = vpop.eup %3615  ;;  %v3427_v38 = vld [vmem:[#allocation6 + $0x80] ss:$16 sps:$4 sm:$0xff]   ;;  %v4703_v35 = vld [vmem:[#allocation8 + $0xac] ss:$16 sps:$4 sm:$0xff]  }
 0x766   :  { %v4620_v28 = vadd.f32 %v1363_v21, %v1362_v27  ;;  %v4705_v21 = vld [vmem:[#allocation8 + $0xa0] ss:$16 sps:$4 sm:$0xff]   ;;  %v4713_v27 = vld [vmem:[#allocation8 + $0xc4] ss:$16 sps:$4 sm:$0xff]  }
 0x768   :  { %3617 = vtanh.f32 %v4620_v28 }
 0x772   :  { %v3618_v30 = vpop.eup %3617 }
 0x773   :  { %v4623_v31 = vmul.f32 %v3618_v30, %v3616_v29  ;;  %v4715_v29 = vld [vmem:[#allocation8 + $0xcc] ss:$16 sps:$4 sm:$0xff]   ;;  %v4717_v30 = vld [vmem:[#allocation8 + $0xc0] ss:$16 sps:$4 sm:$0xff]  }
 0x775   :  { %v1376_v52 = vpack.c.bf16 %v4623_v31, %v4623_v31 }
 0x777   :  { %1410 = vmatmul.mubr.bf16.vlgmr.msra.gmra.mrb[44].mxu0 %v1376_v52  ;;  %1451 = vmatmul.mubr.bf16.vlgmr.msra.gmra.mrb[44].mxu1 %v1376_v52  ;;  %v4727_v52 = vld [vmem:[#allocation8 + $0xec] ss:$16 sps:$4 sm:$0xff]  }
 0x778   :  { %1716 = vmatpush1.bf16.msra.mxu0 %v3403_v1  ;;  %1789 = vmatpush1.bf16.msra.mxu1 %v3406_v49  ;;  %v4719_v1 = vld [vmem:[#allocation8 + $0xc8] ss:$16 sps:$4 sm:$0xff]   ;;  %v4725_v49 = vld [vmem:[#allocation8 + $0xe4] ss:$16 sps:$4 sm:$0xff]  }
 0x779   :  { %1717 = vmatprep.subr.bf16.mxu0 %v3411_v48  ;;  %1790 = vmatprep.subr.bf16.mxu1 %v3414_v8  ;;  %v4729_v48 = vld [vmem:[#allocation8 + $0xe0] ss:$16 sps:$4 sm:$0xff]   ;;  %v4731_v8 = vld [vmem:[#allocation8 + $0xe8] ss:$16 sps:$4 sm:$0xff]  }
 0x77a   :  { %1747 = vmatprep.mubr.bf16.mxu0 %v5313_v43  ;;  %1820 = vmatprep.mubr.bf16.mxu1 %v5313_v43 }
 0x77c   :  { %1718 = vmatpush1.bf16.msra.mxu0 %v3409_v9  ;;  %1791 = vmatpush1.bf16.msra.mxu1 %v3412_v50 }
 0x77d   :  { %1719 = vmatprep.subr.bf16.mxu0 %v3417_v53  ;;  %1792 = vmatprep.subr.bf16.mxu1 %v3420_v51  ;;  %v5331_v53 = vld [vmem:[#allocation29_spill] sm:$0xff] }
 0x780   :  { %1720 = vmatpush1.bf16.msra.mxu0 %v3415_v42  ;;  %1793 = vmatpush1.bf16.msra.mxu1 %v3418_v54  ;;  %v5332_v42 = vld [vmem:[#allocation30_spill] sm:$0xff] }
 0x781   :  { %1721 = vmatprep.subr.bf16.mxu0 %v3423_v59  ;;  %1794 = vmatprep.subr.bf16.mxu1 %v3426_v58 }
 0x784   :  { %1722 = vmatpush1.bf16.msra.mxu0 %v3421_v18  ;;  %1795 = vmatpush1.bf16.msra.mxu1 %v3424_v22  ;;  %v5333_v18 = vld [vmem:[#allocation31_spill] sm:$0xff] }
 0x785   :  { %1723 = vmatprep.subr.bf16.mxu0 %v3429_v37  ;;  %1796 = vmatprep.subr.bf16.mxu1 %v3432_v23  ;;  %v5334_v37 = vld [vmem:[#allocation32_spill] sm:$0xff] }
 0x788   :  { %1724 = vmatpush1.bf16.msra.mxu0 %v3427_v38  ;;  %1797 = vmatpush1.bf16.msra.mxu1 %v3430_v24 }
 0x789   :  { %1725 = vmatprep.subr.bf16.mxu0 %v3435_v26  ;;  %1798 = vmatprep.subr.bf16.mxu1 %v3438_v39 }
 0x78c   :  { %1726 = vmatpush1.bf16.msra.mxu0 %v3433_v60  ;;  %1799 = vmatpush1.bf16.msra.mxu1 %v3436_v62 }
 0x78d   :  { %1727 = vmatprep.subr.bf16.mxu0 %v3441_v3  ;;  %1800 = vmatprep.subr.bf16.mxu1 %v3444_v5 }
 0x790   :  { %1728 = vmatpush1.bf16.msra.mxu0 %v3439_v25  ;;  %1801 = vmatpush1.bf16.msra.mxu1 %v3442_v2 }
 0x791   :  { %1729 = vmatprep.subr.bf16.mxu0 %v3447_v63  ;;  %1802 = vmatprep.subr.bf16.mxu1 %v3450_v32 }
 0x794   :  { %1730 = vmatpush1.bf16.msra.mxu0 %v3445_v45  ;;  %1803 = vmatpush1.bf16.msra.mxu1 %v3448_v41 }
 0x795   :  { %2089 = vmatprep.subr.bf16.mxu0 %v4641_v56  ;;  %2130 = vmatprep.subr.bf16.mxu1 %v4643_v44 }
 0x797   :  { %1748 = vmatmul.mubr.bf16.vlgmr.msra.gmra.mrb[48].mxu0 %v1497_v57  ;;  %1821 = vmatmul.mubr.bf16.vlgmr.msra.gmra.mrb[48].mxu1 %v1497_v57 }
 0x798   :  { %1757 = vmatprep.mubr.bf16.mxu0 %v5313_v43  ;;  %1830 = vmatprep.mubr.bf16.mxu1 %v5313_v43 }
 0x799   :  { %2090 = vmatpush1.bf16.msra.mxu0 %v4645_v4  ;;  %2131 = vmatpush1.bf16.msra.mxu1 %v4647_v6 }
 0x79a   :  { %2091 = vmatprep.subr.bf16.mxu0 %v4653_v7  ;;  %2132 = vmatprep.subr.bf16.mxu1 %v4655_v40 }
 0x79d   :  { %2092 = vmatpush1.bf16.msra.mxu0 %v4657_v61  ;;  %2133 = vmatpush1.bf16.msra.mxu1 %v4659_v14 }
 0x79e   :  { %2093 = vmatprep.subr.bf16.mxu0 %v4665_v10  ;;  %2134 = vmatprep.subr.bf16.mxu1 %v4667_v11 }
 0x79f   :  { %1758 = vmatmul.mubr.bf16.gmra.mrb[52].mxu0 %v1498_v0  ;;  %1831 = vmatmul.mubr.bf16.gmra.mrb[52].mxu1 %v1498_v0 }
 0x7a0   :  { %1767 = vmatprep.mubr.bf16.mxu0 %v5313_v43  ;;  %1840 = vmatprep.mubr.bf16.mxu1 %v5313_v43 }
 0x7a1   :  { %2094 = vmatpush1.bf16.msra.mxu0 %v4669_v12  ;;  %2135 = vmatpush1.bf16.msra.mxu1 %v4671_v13 }
 0x7a2   :  { %2095 = vmatprep.subr.bf16.mxu0 %v4677_v15  ;;  %2136 = vmatprep.subr.bf16.mxu1 %v4679_v16 }
 0x7a5   :  { %2096 = vmatpush1.bf16.msra.mxu0 %v4681_v17  ;;  %2137 = vmatpush1.bf16.msra.mxu1 %v4683_v55 }
 0x7a6   :  { %2097 = vmatprep.subr.bf16.mxu0 %v4689_v47  ;;  %2138 = vmatprep.subr.bf16.mxu1 %v4691_v33 }
 0x7a7   :  { %1768 = vmatmul.mubr.bf16.gmra.mrb[56].mxu0 %v1499_v46  ;;  %1841 = vmatmul.mubr.bf16.gmra.mrb[56].mxu1 %v1499_v46 }
 0x7a8   :  { %1777 = vmatprep.mubr.bf16.mxu0 %v5313_v43  ;;  %1850 = vmatprep.mubr.bf16.mxu1 %v5313_v43 }
 0x7a9   :  { %2098 = vmatpush1.bf16.msra.mxu0 %v4693_v19  ;;  %2139 = vmatpush1.bf16.msra.mxu1 %v4695_v34 }
 0x7aa   :  { %2099 = vmatprep.subr.bf16.mxu0 %v4701_v20  ;;  %2140 = vmatprep.subr.bf16.mxu1 %v4703_v35 }
 0x7ad   :  { %2100 = vmatpush1.bf16.msra.mxu0 %v4705_v21  ;;  %2141 = vmatpush1.bf16.msra.mxu1 %v4707_v36 }
 0x7ae   :  { %2101 = vmatprep.subr.bf16.mxu0 %v4713_v27  ;;  %2142 = vmatprep.subr.bf16.mxu1 %v4715_v29 }
 0x7b1   :  { %2102 = vmatpush1.bf16.msra.mxu0 %v4717_v30  ;;  %2143 = vmatpush1.bf16.msra.mxu1 %v4719_v1 }
 0x7b2   :  { %2103 = vmatprep.subr.bf16.mxu0 %v4725_v49  ;;  %2144 = vmatprep.subr.bf16.mxu1 %v4727_v52 }
 0x7b5   :  { %2104 = vmatpush1.bf16.msra.mxu0 %v4729_v48  ;;  %2145 = vmatpush1.bf16.msra.mxu1 %v4731_v8 }
 0x7b6   :  { %2205 = vmatprep.subr.bf16.mxu0 %v4641_v56  ;;  %2246 = vmatprep.subr.bf16.mxu1 %v4643_v44 }
 0x84a   :  { %v1411_v9 = vpop.f32.mrb[44].mxu0  ;;  %v1452_v50 = vpop.f32.mrb[44].mxu1 }
 0x84b   :  { %v1459_v51 = vadd.f32 %v1411_v9, %v5331_v53  ;;  %v1461_v54 = vadd.f32 %v1452_v50, %v5332_v42  ;;  %v1413_v59 = vpop.f32.mrb[45].mxu0  ;;  %v1454_v58 = vpop.f32.mrb[45].mxu1 }
 0x84c   :  { %v1460_v22 = vadd.f32 %v1413_v59, %v5333_v18  ;;  %v1462_v23 = vadd.f32 %v1454_v58, %v5334_v37  ;;  %v1415_v38 = vpop.f32.mrb[46].mxu0  ;;  %v1456_v24 = vpop.f32.mrb[46].mxu1 }
 0x84d   :  { %v3208_v26 = vmul.f32 -1.442695, %v1459_v51  ;;  %v1416_v39 = vpop.f32.mrb[47].mxu0  ;;  %v1457_v60 = vpop.f32.mrb[47].mxu1 }
 0x84e   :  { %v3209_v62 = vmul.f32 -1.442695, %v1460_v22  ;;  %v3210_v3 = vmul.f32 -1.442695, %v1462_v23 }
 0x84f   :  { %3619 = vpow2.f32 %v3208_v26 }
 0x850   :  { %3621 = vpow2.f32 %v3209_v62 }
 0x851   :  { %3623 = vpow2.f32 %v3210_v3 }
 0x852   :  { %3625 = vtanh.f32 %v1461_v54 }
 0x859   :  { %v3620_v5 = vpop.eup %3619 }
 0x85a   :  { %v3622_v25 = vpop.eup %3621  ;;  %v1466_v2 = vadd.f32 1.0, %v3620_v5 }
 0x85b   :  { %v1472_v63 = vadd.f32 1.0, %v3622_v25  ;;  %v3624_v32 = vpop.eup %3623 }
 0x85c   :  { %3627 = vrcp.f32 %v1466_v2  ;;  %v3626_v45 = vpop.eup %3625  ;;  %v1479_v46 = vadd.f32 1.0, %v3624_v32 }
 0x85d   :  { %3629 = vrcp.f32 %v1472_v63 }
 0x85e   :  { %3631 = vrcp.f32 %v1479_v46  ;;  %v1533_v46 = vld [vmem:[%s5279_s6] sm:$0xf] }
 0x866   :  { %v3628_v41 = vpop.eup %3627 }
 0x867   :  { %v3630_v57 = vpop.eup %3629  ;;  %v1483_v0 = vmul.f32 %v3628_v41, %v3626_v45 }
 0x868   :  { %v1482_v9 = vmul.f32 %v3630_v57, %v4620_v28  ;;  %v3632_v39 = vpop.eup %3631 }
 0x86a   :  { %v4744_v50 = vpop.f32.mrb[48].mxu0  ;;  %v4746_v53 = vpop.f32.mrb[48].mxu1  ;;  %v1484_v51 = vadd.f32 %v1483_v0, %v1482_v9 }
 0x86b   :  { %v4748_v42 = vpop.f32.mrb[49].mxu0  ;;  %v4750_v54 = vpop.f32.mrb[49].mxu1 }
 0x86c   :  { %v4752_v59 = vpop.f32.mrb[50].mxu0  ;;  %v4754_v58 = vpop.f32.mrb[50].mxu1  ;;  %3633 = vtanh.f32 %v1484_v51 }
 0x86d   :  { %v4756_v18 = vpop.f32.mrb[51].mxu0  ;;  %v4758_v22 = vpop.f32.mrb[51].mxu1 }
 0x872   :  { %v4760_v28 = vpop.f32.mrb[52].mxu0  ;;  %v4762_v37 = vpop.f32.mrb[52].mxu1 }
 0x873   :  { %5335 = vst [vmem:[#allocation12_spill] sm:$0xff] %v4762_v37  ;;  %v4764_v23 = vpop.f32.mrb[53].mxu0  ;;  %v4766_v38 = vpop.f32.mrb[53].mxu1 }
 0x874   :  { %5336 = vst [vmem:[#allocation13_spill] sm:$0xff] %v4764_v23  ;;  %5337 = vst [vmem:[#allocation14_spill] sm:$0xff] %v4766_v38  ;;  %v4768_v24 = vpop.f32.mrb[54].mxu0  ;;  %v4770_v26 = vpop.f32.mrb[54].mxu1 }
 0x875   :  { %5338 = vst [vmem:[#allocation15_spill] sm:$0xff] %v4768_v24  ;;  %5339 = vst [vmem:[#allocation16_spill] sm:$0xff] %v4770_v26  ;;  %v4772_v60 = vpop.f32.mrb[55].mxu0  ;;  %v4774_v62 = vpop.f32.mrb[55].mxu1 }
 0x876   :  { %5340 = vst [vmem:[#allocation17_spill] sm:$0xff] %v4772_v60  ;;  %5341 = vst [vmem:[#allocation18_spill] sm:$0xff] %v4774_v62  ;;  %v3634_v3 = vpop.eup %3633 }
 0x877   :  { %v1486_v5 = vmul.f32 %v3634_v3, %v3632_v39 }
 0x879   :  { %v1500_v25 = vpack.c.bf16 %v1486_v5, %v4623_v31 }
 0x87a   :  { %v4777_v2 = vpop.f32.mrb[56].mxu0  ;;  %v4779_v63 = vpop.f32.mrb[56].mxu1 }
 0x87b   :  { %5342 = vst [vmem:[#allocation19_spill] sm:$0xff] %v4777_v2  ;;  %5343 = vst [vmem:[#allocation20_spill] sm:$0xff] %v4779_v63  ;;  %v4781_v32 = vpop.f32.mrb[57].mxu0  ;;  %v4783_v45 = vpop.f32.mrb[57].mxu1  ;;  %1778 = vmatmul.mubr.bf16.gmra.mrb[60].mxu0 %v1500_v25  ;;  %1851 = vmatmul.mubr.bf16.gmra.mrb[60].mxu1 %v1500_v25 }
 0x87c   :  { %5344 = vst [vmem:[#allocation21_spill] sm:$0xff] %v4781_v32  ;;  %5345 = vst [vmem:[#allocation22_spill] sm:$0xff] %v4783_v45  ;;  %v4785_v41 = vpop.f32.mrb[58].mxu0  ;;  %v4787_v57 = vpop.f32.mrb[58].mxu1  ;;  %2121 = vmatprep.mubr.bf16.mxu0 %v5313_v43  ;;  %2162 = vmatprep.mubr.bf16.mxu1 %v5313_v43 }
 0x87d   :  { %5346 = vst [vmem:[#allocation23_spill] sm:$0xff] %v4785_v41  ;;  %5347 = vst [vmem:[#allocation24_spill] sm:$0xff] %v4787_v57  ;;  %v4791_v0 = vpop.f32.mrb[59].mxu0  ;;  %v4793_v31 = vpop.f32.mrb[59].mxu1 }
 0x87e   :  { %5348 = vst [vmem:[#allocation25_spill] sm:$0xff] %v4791_v0  ;;  %5349 = vst [vmem:[#allocation26_spill] sm:$0xff] %v4793_v31  ;;  %v5356_v31 = vld [vmem:[#allocation11_spill] sm:$0xff] }
 0x87f   :  { %v5357_v0 = vsub.s32 0, %v5356_v31  ;;  %v5358_v41 = vsub.s32 2, %v5356_v31 }
 0x881   :  { %v4848_v57 = vrot.slane %v1533_v46, %v5357_v0  ;;  %v4852_v45 = vrot.slane %v1533_v46, %v5358_v41 }
 0x883   :  { %2122 = vmatmul.mubr.bf16.vlgmr.msra.gmra.mrb[64].mxu0 %v5313_v43  ;;  %2163 = vmatmul.mubr.bf16.vlgmr.msra.gmra.mrb[64].mxu1 %v5313_v43  ;;  %v1750_v0 = vadd.f32 %v4744_v50, %v4848_v57 }
 0x884   :  { %2206 = vmatpush1.bf16.msra.mxu0 %v4645_v4  ;;  %2247 = vmatpush1.bf16.msra.mxu1 %v4647_v6 }
 0x885   :  { %2207 = vmatprep.subr.bf16.mxu0 %v4653_v7  ;;  %2248 = vmatprep.subr.bf16.mxu1 %v4655_v40 }
 0x886   :  { %2237 = vmatprep.mubr.bf16.mxu0 %v5313_v43  ;;  %2278 = vmatprep.mubr.bf16.mxu1 %v5313_v43 }
 0x888   :  { %2208 = vmatpush1.bf16.msra.mxu0 %v4657_v61  ;;  %2249 = vmatpush1.bf16.msra.mxu1 %v4659_v14 }
 0x889   :  { %2209 = vmatprep.subr.bf16.mxu0 %v4665_v10  ;;  %2250 = vmatprep.subr.bf16.mxu1 %v4667_v11 }
 0x88c   :  { %2210 = vmatpush1.bf16.msra.mxu0 %v4669_v12  ;;  %2251 = vmatpush1.bf16.msra.mxu1 %v4671_v13 }
 0x88d   :  { %2211 = vmatprep.subr.bf16.mxu0 %v4677_v15  ;;  %2252 = vmatprep.subr.bf16.mxu1 %v4679_v16 }
 0x890   :  { %2212 = vmatpush1.bf16.msra.mxu0 %v4681_v17  ;;  %2253 = vmatpush1.bf16.msra.mxu1 %v4683_v55 }
 0x891   :  { %2213 = vmatprep.subr.bf16.mxu0 %v4689_v47  ;;  %2254 = vmatprep.subr.bf16.mxu1 %v4691_v33 }
 0x894   :  { %2214 = vmatpush1.bf16.msra.mxu0 %v4693_v19  ;;  %2255 = vmatpush1.bf16.msra.mxu1 %v4695_v34 }
 0x895   :  { %2215 = vmatprep.subr.bf16.mxu0 %v4701_v20  ;;  %2256 = vmatprep.subr.bf16.mxu1 %v4703_v35 }
 0x898   :  { %2216 = vmatpush1.bf16.msra.mxu0 %v4705_v21  ;;  %2257 = vmatpush1.bf16.msra.mxu1 %v4707_v36 }
 0x899   :  { %2217 = vmatprep.subr.bf16.mxu0 %v4713_v27  ;;  %2258 = vmatprep.subr.bf16.mxu1 %v4715_v29 }
 0x89c   :  { %2218 = vmatpush1.bf16.msra.mxu0 %v4717_v30  ;;  %2259 = vmatpush1.bf16.msra.mxu1 %v4719_v1 }
 0x89d   :  { %2219 = vmatprep.subr.bf16.mxu0 %v4725_v49  ;;  %2260 = vmatprep.subr.bf16.mxu1 %v4727_v52 }
 0x8a0   :  { %2220 = vmatpush1.bf16.msra.mxu0 %v4729_v48  ;;  %2261 = vmatpush1.bf16.msra.mxu1 %v4731_v8 }
 0x8a1   :  { %2321 = vmatprep.subr.bf16.mxu0 %v4641_v56  ;;  %2362 = vmatprep.subr.bf16.mxu1 %v4643_v44 }
 0x94e   :  { %v4834_v9 = vpop.f32.mrb[60].mxu0  ;;  %v4836_v51 = vpop.f32.mrb[60].mxu1 }
 0x94f   :  { %5350 = vst [vmem:[#allocation27_spill] sm:$0xff] %v4834_v9  ;;  %5351 = vst [vmem:[#allocation28_spill] sm:$0xff] %v4836_v51  ;;  %v4838_v39 = vpop.f32.mrb[61].mxu0  ;;  %v4840_v3 = vpop.f32.mrb[61].mxu1 }
 0x950   :  { %5352 = vst [vmem:[#allocation29_spill] sm:$0xff] %v4838_v39  ;;  %5353 = vst [vmem:[#allocation30_spill] sm:$0xff] %v4840_v3  ;;  %v4842_v5 = vpop.f32.mrb[62].mxu0  ;;  %v4844_v25 = vpop.f32.mrb[62].mxu1  ;;  %v5361_v39 = vsub.s32 1, %v5356_v31 }
 0x951   :  { %5354 = vst [vmem:[#allocation31_spill] sm:$0xff] %v4842_v5  ;;  %5355 = vst [vmem:[#allocation32_spill] sm:$0xff] %v4844_v25  ;;  %v4854_v32 = vpop.f32.mrb[63].mxu0  ;;  %v4856_v9 = vpop.f32.mrb[63].mxu1  ;;  %v5362_v5 = vsub.s32 3, %v5356_v31  ;;  %v1823_v25 = vadd.f32 %v4746_v53, %v4852_v45 }
 0x952   :  { %5359 = vst [vmem:[#allocation11_spill] sm:$0xff] %v4854_v32  ;;  %5360 = vst [vmem:[#allocation33_spill] sm:$0xff] %v4856_v9  ;;  %v4860_v51 = vrot.slane %v1533_v46, %v5361_v39 }
 0x953   :  { %v4864_v3 = vrot.slane %v1533_v46, %v5362_v5 }
 0x954   :  { %v1752_v41 = vadd.f32 %v4748_v42, %v4860_v51 }
 0x955   :  { %v1825_v9 = vadd.f32 %v4750_v54, %v4864_v3 }
 0x956   :  { %v2123_v32 = vpop.f32.mrb[64].mxu0  ;;  %v2164_v63 = vpop.f32.mrb[64].mxu1 }
 0x957   :  { %v2171_v39 = vadd.f32 %v2123_v32, %v1750_v0  ;;  %v2173_v2 = vadd.f32 %v2164_v63, %v1823_v25  ;;  %v2125_v62 = vpop.f32.mrb[65].mxu0  ;;  %v2166_v31 = vpop.f32.mrb[65].mxu1 }
 0x958   :  { %v2172_v46 = vadd.f32 %v2125_v62, %v1752_v41  ;;  %v2174_v5 = vadd.f32 %v2166_v31, %v1825_v9  ;;  %v2127_v60 = vpop.f32.mrb[66].mxu0  ;;  %v2168_v26 = vpop.f32.mrb[66].mxu1  ;;  %v1756_v31 = vadd.f32 %v4756_v18, %v4860_v51 }
 0x959   :  { %v3275_v50 = vmul.f32 -1.442695, %v2171_v39  ;;  %v2128_v24 = vpop.f32.mrb[67].mxu0  ;;  %v2169_v38 = vpop.f32.mrb[67].mxu1  ;;  %v1827_v39 = vadd.f32 %v4754_v58, %v4852_v45 }
 0x95a   :  { %v3276_v53 = vmul.f32 -1.442695, %v2172_v46  ;;  %v3277_v42 = vmul.f32 -1.442695, %v2174_v5  ;;  %v1829_v46 = vadd.f32 %v4758_v22, %v4864_v3 }
 0x95b   :  { %3635 = vpow2.f32 %v3275_v50 }
 0x95c   :  { %3637 = vpow2.f32 %v3276_v53 }
 0x95d   :  { %3639 = vpow2.f32 %v3277_v42 }
 0x95e   :  { %3641 = vtanh.f32 %v2173_v2  ;;  %v1754_v2 = vadd.f32 %v4752_v59, %v4848_v57 }
 0x965   :  { %v3636_v23 = vpop.eup %3635 }
 0x966   :  { %v3638_v37 = vpop.eup %3637  ;;  %v2178_v54 = vadd.f32 1.0, %v3636_v23 }
 0x967   :  { %v2184_v32 = vadd.f32 1.0, %v3638_v37  ;;  %v3640_v63 = vpop.eup %3639 }
 0x968   :  { %3643 = vrcp.f32 %v2178_v54  ;;  %v3642_v62 = vpop.eup %3641  ;;  %v2191_v25 = vadd.f32 1.0, %v3640_v63 }
 0x969   :  { %3645 = vrcp.f32 %v2184_v32 }
 0x96a   :  { %3647 = vrcp.f32 %v2191_v25 }
 0x972   :  { %v3644_v9 = vpop.eup %3643 }
 0x973   :  { %v3646_v60 = vpop.eup %3645  ;;  %v2195_v26 = vmul.f32 %v3644_v9, %v3642_v62 }
 0x974   :  { %v2194_v24 = vmul.f32 0.0, %v3646_v60  ;;  %v3648_v0 = vpop.eup %3647 }
 0x976   :  { %v4874_v38 = vadd.f32 %v2195_v26, %v2194_v24 }
 0x978   :  { %3649 = vtanh.f32 %v4874_v38 }
 0x982   :  { %v3650_v41 = vpop.eup %3649 }
 0x983   :  { %v4877_v23 = vmul.f32 %v3650_v41, %v3648_v0 }
 0x985   :  { %v2204_v37 = vpack.c.bf16 %v4877_v23, %v4877_v23 }
 0x987   :  { %2238 = vmatmul.mubr.bf16.vlgmr.msra.gmra.mrb[68].mxu0 %v2204_v37  ;;  %2279 = vmatmul.mubr.bf16.vlgmr.msra.gmra.mrb[68].mxu1 %v2204_v37 }
 0x988   :  { %2322 = vmatpush1.bf16.msra.mxu0 %v4645_v4  ;;  %2363 = vmatpush1.bf16.msra.mxu1 %v4647_v6 }
 0x989   :  { %2323 = vmatprep.subr.bf16.mxu0 %v4653_v7  ;;  %2364 = vmatprep.subr.bf16.mxu1 %v4655_v40 }
 0x98a   :  { %2353 = vmatprep.mubr.bf16.mxu0 %v5313_v43  ;;  %2394 = vmatprep.mubr.bf16.mxu1 %v5313_v43 }
 0x98c   :  { %2324 = vmatpush1.bf16.msra.mxu0 %v4657_v61  ;;  %2365 = vmatpush1.bf16.msra.mxu1 %v4659_v14 }
 0x98d   :  { %2325 = vmatprep.subr.bf16.mxu0 %v4665_v10  ;;  %2366 = vmatprep.subr.bf16.mxu1 %v4667_v11 }
 0x990   :  { %2326 = vmatpush1.bf16.msra.mxu0 %v4669_v12  ;;  %2367 = vmatpush1.bf16.msra.mxu1 %v4671_v13 }
 0x991   :  { %2327 = vmatprep.subr.bf16.mxu0 %v4677_v15  ;;  %2368 = vmatprep.subr.bf16.mxu1 %v4679_v16 }
 0x994   :  { %2328 = vmatpush1.bf16.msra.mxu0 %v4681_v17  ;;  %2369 = vmatpush1.bf16.msra.mxu1 %v4683_v55 }
 0x995   :  { %2329 = vmatprep.subr.bf16.mxu0 %v4689_v47  ;;  %2370 = vmatprep.subr.bf16.mxu1 %v4691_v33 }
 0x998   :  { %2330 = vmatpush1.bf16.msra.mxu0 %v4693_v19  ;;  %2371 = vmatpush1.bf16.msra.mxu1 %v4695_v34 }
 0x999   :  { %2331 = vmatprep.subr.bf16.mxu0 %v4701_v20  ;;  %2372 = vmatprep.subr.bf16.mxu1 %v4703_v35 }
 0x99c   :  { %2332 = vmatpush1.bf16.msra.mxu0 %v4705_v21  ;;  %2373 = vmatpush1.bf16.msra.mxu1 %v4707_v36 }
 0x99d   :  { %2333 = vmatprep.subr.bf16.mxu0 %v4713_v27  ;;  %2374 = vmatprep.subr.bf16.mxu1 %v4715_v29 }
 0x9a0   :  { %2334 = vmatpush1.bf16.msra.mxu0 %v4717_v30  ;;  %2375 = vmatpush1.bf16.msra.mxu1 %v4719_v1 }
 0x9a1   :  { %2335 = vmatprep.subr.bf16.mxu0 %v4725_v49  ;;  %2376 = vmatprep.subr.bf16.mxu1 %v4727_v52 }
 0x9a4   :  { %2336 = vmatpush1.bf16.msra.mxu0 %v4729_v48  ;;  %2377 = vmatpush1.bf16.msra.mxu1 %v4731_v8 }
 0x9a5   :  { %2437 = vmatprep.subr.bf16.mxu0 %v4641_v56  ;;  %2478 = vmatprep.subr.bf16.mxu1 %v4643_v44 }
 0xa5a   :  { %v2239_v5 = vpop.f32.mrb[68].mxu0  ;;  %v2280_v50 = vpop.f32.mrb[68].mxu1 }
 0xa5b   :  { %v2287_v53 = vadd.f32 %v2239_v5, %v1754_v2  ;;  %v2289_v42 = vadd.f32 %v2280_v50, %v1827_v39  ;;  %v2241_v54 = vpop.f32.mrb[69].mxu0  ;;  %v2282_v32 = vpop.f32.mrb[69].mxu1 }
 0xa5c   :  { %v2288_v63 = vadd.f32 %v2241_v54, %v1756_v31  ;;  %v2290_v62 = vadd.f32 %v2282_v32, %v1829_v46  ;;  %v2243_v9 = vpop.f32.mrb[70].mxu0  ;;  %v2284_v60 = vpop.f32.mrb[70].mxu1 }
 0xa5d   :  { %v3278_v59 = vmul.f32 -1.442695, %v2287_v53  ;;  %v2244_v26 = vpop.f32.mrb[71].mxu0  ;;  %v2285_v25 = vpop.f32.mrb[71].mxu1  ;;  %v5364_v60 = vld [vmem:[#allocation13_spill] sm:$0xff] }
 0xa5e   :  { %v3279_v58 = vmul.f32 -1.442695, %v2288_v63  ;;  %v3280_v18 = vmul.f32 -1.442695, %v2290_v62  ;;  %v5363_v62 = vld [vmem:[#allocation12_spill] sm:$0xff]  ;;  %v5365_v26 = vld [vmem:[#allocation14_spill] sm:$0xff] }
 0xa5f   :  { %3651 = vpow2.f32 %v3278_v59  ;;  %v1833_v9 = vadd.f32 %v5363_v62, %v4852_v45  ;;  %v1762_v59 = vadd.f32 %v5364_v60, %v4860_v51  ;;  %v1835_v25 = vadd.f32 %v5365_v26, %v4864_v3 }
 0xa60   :  { %3653 = vpow2.f32 %v3279_v58 }
 0xa61   :  { %3655 = vpow2.f32 %v3280_v18 }
 0xa62   :  { %3657 = vtanh.f32 %v2289_v42 }
 0xa69   :  { %v3652_v24 = vpop.eup %3651 }
 0xa6a   :  { %v3654_v0 = vpop.eup %3653  ;;  %v2294_v22 = vadd.f32 1.0, %v3652_v24 }
 0xa6b   :  { %v2300_v41 = vadd.f32 1.0, %v3654_v0  ;;  %v3656_v37 = vpop.eup %3655 }
 0xa6c   :  { %3659 = vrcp.f32 %v2294_v22  ;;  %v3658_v2 = vpop.eup %3657  ;;  %v2307_v5 = vadd.f32 1.0, %v3656_v37 }
 0xa6d   :  { %3661 = vrcp.f32 %v2300_v41 }
 0xa6e   :  { %3663 = vrcp.f32 %v2307_v5 }
 0xa76   :  { %v3660_v39 = vpop.eup %3659 }
 0xa77   :  { %v3662_v31 = vpop.eup %3661  ;;  %v2311_v46 = vmul.f32 %v3660_v39, %v3658_v2 }
 0xa78   :  { %v2310_v50 = vmul.f32 %v3662_v31, %v4874_v38  ;;  %v3664_v54 = vpop.eup %3663  ;;  %v1760_v38 = vadd.f32 %v4760_v28, %v4848_v57 }
 0xa7a   :  { %v4924_v53 = vadd.f32 %v2311_v46, %v2310_v50 }
 0xa7c   :  { %3665 = vtanh.f32 %v4924_v53 }
 0xa86   :  { %v3666_v32 = vpop.eup %3665 }
 0xa87   :  { %v4927_v63 = vmul.f32 %v3666_v32, %v3664_v54 }
 0xa89   :  { %v2320_v42 = vpack.c.bf16 %v4927_v63, %v4927_v63 }
 0xa8b   :  { %2354 = vmatmul.mubr.bf16.vlgmr.msra.gmra.mrb[72].mxu0 %v2320_v42  ;;  %2395 = vmatmul.mubr.bf16.vlgmr.msra.gmra.mrb[72].mxu1 %v2320_v42 }
 0xa8c   :  { %2438 = vmatpush1.bf16.msra.mxu0 %v4645_v4  ;;  %2479 = vmatpush1.bf16.msra.mxu1 %v4647_v6 }
 0xa8d   :  { %2439 = vmatprep.subr.bf16.mxu0 %v4653_v7  ;;  %2480 = vmatprep.subr.bf16.mxu1 %v4655_v40 }
 0xa8e   :  { %2469 = vmatprep.mubr.bf16.mxu0 %v5313_v43  ;;  %2510 = vmatprep.mubr.bf16.mxu1 %v5313_v43 }
 0xa90   :  { %2440 = vmatpush1.bf16.msra.mxu0 %v4657_v61  ;;  %2481 = vmatpush1.bf16.msra.mxu1 %v4659_v14 }
 0xa91   :  { %2441 = vmatprep.subr.bf16.mxu0 %v4665_v10  ;;  %2482 = vmatprep.subr.bf16.mxu1 %v4667_v11 }
 0xa94   :  { %2442 = vmatpush1.bf16.msra.mxu0 %v4669_v12  ;;  %2483 = vmatpush1.bf16.msra.mxu1 %v4671_v13 }
 0xa95   :  { %2443 = vmatprep.subr.bf16.mxu0 %v4677_v15  ;;  %2484 = vmatprep.subr.bf16.mxu1 %v4679_v16 }
 0xa98   :  { %2444 = vmatpush1.bf16.msra.mxu0 %v4681_v17  ;;  %2485 = vmatpush1.bf16.msra.mxu1 %v4683_v55 }
 0xa99   :  { %2445 = vmatprep.subr.bf16.mxu0 %v4689_v47  ;;  %2486 = vmatprep.subr.bf16.mxu1 %v4691_v33 }
 0xa9c   :  { %2446 = vmatpush1.bf16.msra.mxu0 %v4693_v19  ;;  %2487 = vmatpush1.bf16.msra.mxu1 %v4695_v34 }
 0xa9d   :  { %2447 = vmatprep.subr.bf16.mxu0 %v4701_v20  ;;  %2488 = vmatprep.subr.bf16.mxu1 %v4703_v35 }
 0xaa0   :  { %2448 = vmatpush1.bf16.msra.mxu0 %v4705_v21  ;;  %2489 = vmatpush1.bf16.msra.mxu1 %v4707_v36 }
 0xaa1   :  { %2449 = vmatprep.subr.bf16.mxu0 %v4713_v27  ;;  %2490 = vmatprep.subr.bf16.mxu1 %v4715_v29 }
 0xaa4   :  { %2450 = vmatpush1.bf16.msra.mxu0 %v4717_v30  ;;  %2491 = vmatpush1.bf16.msra.mxu1 %v4719_v1 }
 0xaa5   :  { %2451 = vmatprep.subr.bf16.mxu0 %v4725_v49  ;;  %2492 = vmatprep.subr.bf16.mxu1 %v4727_v52 }
 0xaa8   :  { %2452 = vmatpush1.bf16.msra.mxu0 %v4729_v48  ;;  %2493 = vmatpush1.bf16.msra.mxu1 %v4731_v8 }
 0xaa9   :  { %2553 = vmatprep.subr.bf16.mxu0 %v4641_v56  ;;  %2594 = vmatprep.subr.bf16.mxu1 %v4643_v44 }
 0xb5e   :  { %v2355_v58 = vpop.f32.mrb[72].mxu0  ;;  %v2396_v18 = vpop.f32.mrb[72].mxu1 }
 0xb5f   :  { %v2403_v24 = vadd.f32 %v2355_v58, %v1760_v38  ;;  %v2405_v0 = vadd.f32 %v2396_v18, %v1833_v9  ;;  %v2357_v22 = vpop.f32.mrb[73].mxu0  ;;  %v2398_v41 = vpop.f32.mrb[73].mxu1 }
 0xb60   :  { %v2404_v37 = vadd.f32 %v2357_v22, %v1762_v59  ;;  %v2406_v2 = vadd.f32 %v2398_v41, %v1835_v25  ;;  %v2359_v39 = vpop.f32.mrb[74].mxu0  ;;  %v2400_v31 = vpop.f32.mrb[74].mxu1 }
 0xb61   :  { %v3281_v28 = vmul.f32 -1.442695, %v2403_v24  ;;  %v2360_v46 = vpop.f32.mrb[75].mxu0  ;;  %v2401_v5 = vpop.f32.mrb[75].mxu1 }
 0xb62   :  { %v3282_v50 = vmul.f32 -1.442695, %v2404_v37  ;;  %v3283_v54 = vmul.f32 -1.442695, %v2406_v2  ;;  %v5369_v5 = vld [vmem:[#allocation18_spill] sm:$0xff] }
 0xb63   :  { %3667 = vpow2.f32 %v3281_v28  ;;  %v5368_v28 = vld [vmem:[#allocation17_spill] sm:$0xff] }
 0xb64   :  { %3669 = vpow2.f32 %v3282_v50  ;;  %v1766_v46 = vadd.f32 %v5368_v28, %v4860_v51  ;;  %v1839_v50 = vadd.f32 %v5369_v5, %v4864_v3 }
 0xb65   :  { %3671 = vpow2.f32 %v3283_v54 }
 0xb66   :  { %3673 = vtanh.f32 %v2405_v0  ;;  %v2315_v0 = vadd.f32 %v4927_v63, %v4877_v23  ;;  %v5366_v23 = vld [vmem:[#allocation15_spill] sm:$0xff]  ;;  %v5367_v63 = vld [vmem:[#allocation16_spill] sm:$0xff] }
 0xb67   :  { %v1837_v31 = vadd.f32 %v5367_v63, %v4852_v45 }
 0xb6d   :  { %v3668_v32 = vpop.eup %3667 }
 0xb6e   :  { %v3670_v42 = vpop.eup %3669  ;;  %v2410_v62 = vadd.f32 1.0, %v3668_v32 }
 0xb6f   :  { %v2416_v38 = vadd.f32 1.0, %v3670_v42  ;;  %v3672_v9 = vpop.eup %3671 }
 0xb70   :  { %3675 = vrcp.f32 %v2410_v62  ;;  %v3674_v60 = vpop.eup %3673  ;;  %v2423_v58 = vadd.f32 1.0, %v3672_v9 }
 0xb71   :  { %3677 = vrcp.f32 %v2416_v38 }
 0xb72   :  { %3679 = vrcp.f32 %v2423_v58 }
 0xb7a   :  { %v3676_v59 = vpop.eup %3675 }
 0xb7b   :  { %v3678_v26 = vpop.eup %3677  ;;  %v2427_v25 = vmul.f32 %v3676_v59, %v3674_v60 }
 0xb7c   :  { %v2426_v18 = vmul.f32 %v3678_v26, %v4924_v53  ;;  %v3680_v22 = vpop.eup %3679  ;;  %v1764_v53 = vadd.f32 %v5366_v23, %v4848_v57 }
 0xb7e   :  { %v4974_v24 = vadd.f32 %v2427_v25, %v2426_v18 }
 0xb80   :  { %3681 = vtanh.f32 %v4974_v24 }
 0xb8a   :  { %v3682_v41 = vpop.eup %3681 }
 0xb8b   :  { %v2430_v37 = vmul.f32 %v3682_v41, %v3680_v22 }
 0xb8d   :  { %v4979_v2 = vadd.f32 %v2430_v37, %v2315_v0  ;;  %v2436_v39 = vpack.c.bf16 %v2430_v37, %v2430_v37 }
 0xb8f   :  { %2470 = vmatmul.mubr.bf16.vlgmr.msra.gmra.mrb[76].mxu0 %v2436_v39  ;;  %2511 = vmatmul.mubr.bf16.vlgmr.msra.gmra.mrb[76].mxu1 %v2436_v39 }
 0xb90   :  { %2554 = vmatpush1.bf16.msra.mxu0 %v4645_v4  ;;  %2595 = vmatpush1.bf16.msra.mxu1 %v4647_v6 }
 0xb91   :  { %2555 = vmatprep.subr.bf16.mxu0 %v4653_v7  ;;  %2596 = vmatprep.subr.bf16.mxu1 %v4655_v40 }
 0xb92   :  { %2585 = vmatprep.mubr.bf16.mxu0 %v5313_v43  ;;  %2626 = vmatprep.mubr.bf16.mxu1 %v5313_v43 }
 0xb94   :  { %2556 = vmatpush1.bf16.msra.mxu0 %v4657_v61  ;;  %2597 = vmatpush1.bf16.msra.mxu1 %v4659_v14 }
 0xb95   :  { %2557 = vmatprep.subr.bf16.mxu0 %v4665_v10  ;;  %2598 = vmatprep.subr.bf16.mxu1 %v4667_v11 }
 0xb98   :  { %2558 = vmatpush1.bf16.msra.mxu0 %v4669_v12  ;;  %2599 = vmatpush1.bf16.msra.mxu1 %v4671_v13 }
 0xb99   :  { %2559 = vmatprep.subr.bf16.mxu0 %v4677_v15  ;;  %2600 = vmatprep.subr.bf16.mxu1 %v4679_v16 }
 0xb9c   :  { %2560 = vmatpush1.bf16.msra.mxu0 %v4681_v17  ;;  %2601 = vmatpush1.bf16.msra.mxu1 %v4683_v55 }
 0xb9d   :  { %2561 = vmatprep.subr.bf16.mxu0 %v4689_v47  ;;  %2602 = vmatprep.subr.bf16.mxu1 %v4691_v33 }
 0xba0   :  { %2562 = vmatpush1.bf16.msra.mxu0 %v4693_v19  ;;  %2603 = vmatpush1.bf16.msra.mxu1 %v4695_v34 }
 0xba1   :  { %2563 = vmatprep.subr.bf16.mxu0 %v4701_v20  ;;  %2604 = vmatprep.subr.bf16.mxu1 %v4703_v35 }
 0xba4   :  { %2564 = vmatpush1.bf16.msra.mxu0 %v4705_v21  ;;  %2605 = vmatpush1.bf16.msra.mxu1 %v4707_v36 }
 0xba5   :  { %2565 = vmatprep.subr.bf16.mxu0 %v4713_v27  ;;  %2606 = vmatprep.subr.bf16.mxu1 %v4715_v29 }
 0xba8   :  { %2566 = vmatpush1.bf16.msra.mxu0 %v4717_v30  ;;  %2607 = vmatpush1.bf16.msra.mxu1 %v4719_v1 }
 0xba9   :  { %2567 = vmatprep.subr.bf16.mxu0 %v4725_v49  ;;  %2608 = vmatprep.subr.bf16.mxu1 %v4727_v52 }
 0xbac   :  { %2568 = vmatpush1.bf16.msra.mxu0 %v4729_v48  ;;  %2609 = vmatpush1.bf16.msra.mxu1 %v4731_v8 }
 0xbad   :  { %2669 = vmatprep.subr.bf16.mxu0 %v4641_v56  ;;  %2710 = vmatprep.subr.bf16.mxu1 %v4643_v44 }
 0xc62   :  { %v2471_v54 = vpop.f32.mrb[76].mxu0  ;;  %v2512_v32 = vpop.f32.mrb[76].mxu1 }
 0xc63   :  { %v2519_v42 = vadd.f32 %v2471_v54, %v1764_v53  ;;  %v2521_v62 = vadd.f32 %v2512_v32, %v1837_v31  ;;  %v2473_v38 = vpop.f32.mrb[77].mxu0  ;;  %v2514_v9 = vpop.f32.mrb[77].mxu1 }
 0xc64   :  { %v2520_v60 = vadd.f32 %v2473_v38, %v1766_v46  ;;  %v2522_v59 = vadd.f32 %v2514_v9, %v1839_v50  ;;  %v2475_v26 = vpop.f32.mrb[78].mxu0  ;;  %v2516_v25 = vpop.f32.mrb[78].mxu1 }
 0xc65   :  { %v3284_v58 = vmul.f32 -1.442695, %v2519_v42  ;;  %v2476_v18 = vpop.f32.mrb[79].mxu0  ;;  %v2517_v22 = vpop.f32.mrb[79].mxu1 }
 0xc66   :  { %v3285_v41 = vmul.f32 -1.442695, %v2520_v60  ;;  %v3286_v0 = vmul.f32 -1.442695, %v2522_v59 }
 0xc67   :  { %3683 = vpow2.f32 %v3284_v58 }
 0xc68   :  { %3685 = vpow2.f32 %v3285_v41  ;;  %v5079_v41 = vld [vmem:[#allocation8] ss:$16 sps:$4 sm:$0xff]  }
 0xc69   :  { %3687 = vpow2.f32 %v3286_v0  ;;  %v5082_v0 = vld [vmem:[#allocation8 + $0x8] ss:$16 sps:$4 sm:$0xff]  }
 0xc6a   :  { %3689 = vtanh.f32 %v2521_v62 }
 0xc71   :  { %v3684_v37 = vpop.eup %3683 }
 0xc72   :  { %v3686_v39 = vpop.eup %3685  ;;  %v2526_v23 = vadd.f32 1.0, %v3684_v37  ;;  %v5085_v37 = vld [vmem:[#allocation8 + $0x24] ss:$16 sps:$4 sm:$0xff]  }
 0xc73   :  { %v2532_v53 = vadd.f32 1.0, %v3686_v39  ;;  %v3688_v63 = vpop.eup %3687  ;;  %v5088_v39 = vld [vmem:[#allocation8 + $0x2c] ss:$16 sps:$4 sm:$0xff]  }
 0xc74   :  { %3691 = vrcp.f32 %v2526_v23  ;;  %v3690_v31 = vpop.eup %3689  ;;  %v2539_v50 = vadd.f32 1.0, %v3688_v63  ;;  %v5093_v23 = vld [vmem:[#allocation8 + $0x20] ss:$16 sps:$4 sm:$0xff]   ;;  %v5099_v63 = vld [vmem:[#allocation8 + $0x44] ss:$16 sps:$4 sm:$0xff]  }
 0xc75   :  { %3693 = vrcp.f32 %v2532_v53  ;;  %v5096_v53 = vld [vmem:[#allocation8 + $0x28] ss:$16 sps:$4 sm:$0xff]  }
 0xc76   :  { %3695 = vrcp.f32 %v2539_v50  ;;  %v5114_v50 = vld [vmem:[#allocation8 + $0x6c] ss:$16 sps:$4 sm:$0xff]  }
 0xc7e   :  { %v3692_v28 = vpop.eup %3691 }
 0xc7f   :  { %v3694_v46 = vpop.eup %3693  ;;  %v2543_v5 = vmul.f32 %v3692_v28, %v3690_v31  ;;  %v5102_v31 = vld [vmem:[#allocation8 + $0x4c] ss:$16 sps:$4 sm:$0xff]   ;;  %v5105_v28 = vld [vmem:[#allocation8 + $0x40] ss:$16 sps:$4 sm:$0xff]  }
 0xc80   :  { %v2542_v54 = vmul.f32 %v3694_v46, %v4974_v24  ;;  %v3696_v42 = vpop.eup %3695  ;;  %v5108_v46 = vld [vmem:[#allocation8 + $0x48] ss:$16 sps:$4 sm:$0xff]  }
 0xc82   :  { %v5024_v32 = vadd.f32 %v2543_v5, %v2542_v54  ;;  %v5111_v5 = vld [vmem:[#allocation8 + $0x64] ss:$16 sps:$4 sm:$0xff]   ;;  %v5117_v54 = vld [vmem:[#allocation8 + $0x60] ss:$16 sps:$4 sm:$0xff]  }
 0xc84   :  { %3697 = vtanh.f32 %v5024_v32 }
 0xc8e   :  { %v3698_v38 = vpop.eup %3697 }
 0xc8f   :  { %v2546_v9 = vmul.f32 %v3698_v38, %v3696_v42  ;;  %v5123_v42 = vld [vmem:[#allocation8 + $0x84] ss:$16 sps:$4 sm:$0xff]   ;;  %v5126_v38 = vld [vmem:[#allocation8 + $0x8c] ss:$16 sps:$4 sm:$0xff]  }
 0xc91   :  { %v5028_v62 = vadd.f32 %v2546_v9, %v4979_v2  ;;  %v2552_v60 = vpack.c.bf16 %v2546_v9, %v2546_v9  ;;  %v5129_v9 = vld [vmem:[#allocation8 + $0x80] ss:$16 sps:$4 sm:$0xff]  }
 0xc93   :  { %2586 = vmatmul.mubr.bf16.vlgmr.msra.gmra.mrb[80].mxu0 %v2552_v60  ;;  %2627 = vmatmul.mubr.bf16.vlgmr.msra.gmra.mrb[80].mxu1 %v2552_v60  ;;  %v5135_v60 = vld [vmem:[#allocation8 + $0xa4] ss:$16 sps:$4 sm:$0xff]  }
 0xc94   :  { %2670 = vmatpush1.bf16.msra.mxu0 %v4645_v4  ;;  %2711 = vmatpush1.bf16.msra.mxu1 %v4647_v6  ;;  %v5370_v4 = vld [vmem:[#allocation19_spill] sm:$0xff] }
 0xc95   :  { %2671 = vmatprep.subr.bf16.mxu0 %v4653_v7  ;;  %2712 = vmatprep.subr.bf16.mxu1 %v4655_v40  ;;  %v1770_v6 = vadd.f32 %v5370_v4, %v4848_v57  ;;  %v5371_v7 = vld [vmem:[#allocation20_spill] sm:$0xff] }
 0xc96   :  { %2701 = vmatprep.mubr.bf16.mxu0 %v5313_v43  ;;  %2742 = vmatprep.mubr.bf16.mxu1 %v5313_v43  ;;  %v1843_v40 = vadd.f32 %v5371_v7, %v4852_v45  ;;  %v5138_v4 = vld [vmem:[#allocation8 + $0xac] ss:$16 sps:$4 sm:$0xff]   ;;  %v5144_v7 = vld [vmem:[#allocation8 + $0xa8] ss:$16 sps:$4 sm:$0xff]  }
 0xc98   :  { %2672 = vmatpush1.bf16.msra.mxu0 %v4657_v61  ;;  %2713 = vmatpush1.bf16.msra.mxu1 %v4659_v14  ;;  %v5372_v61 = vld [vmem:[#allocation21_spill] sm:$0xff] }
 0xc99   :  { %2673 = vmatprep.subr.bf16.mxu0 %v4665_v10  ;;  %2714 = vmatprep.subr.bf16.mxu1 %v4667_v11  ;;  %v1772_v14 = vadd.f32 %v5372_v61, %v4860_v51  ;;  %v5373_v10 = vld [vmem:[#allocation22_spill] sm:$0xff] }
 0xc9a   :  { %v1845_v11 = vadd.f32 %v5373_v10, %v4864_v3  ;;  %v5150_v61 = vld [vmem:[#allocation8 + $0xcc] ss:$16 sps:$4 sm:$0xff]   ;;  %v5156_v10 = vld [vmem:[#allocation8 + $0xc8] ss:$16 sps:$4 sm:$0xff]  }
 0xc9c   :  { %2674 = vmatpush1.bf16.msra.mxu0 %v4669_v12  ;;  %2715 = vmatpush1.bf16.msra.mxu1 %v4671_v13 }
 0xc9d   :  { %2675 = vmatprep.subr.bf16.mxu0 %v4677_v15  ;;  %2716 = vmatprep.subr.bf16.mxu1 %v4679_v16 }
 0xca0   :  { %2676 = vmatpush1.bf16.msra.mxu0 %v4681_v17  ;;  %2717 = vmatpush1.bf16.msra.mxu1 %v4683_v55 }
 0xca1   :  { %2677 = vmatprep.subr.bf16.mxu0 %v4689_v47  ;;  %2718 = vmatprep.subr.bf16.mxu1 %v4691_v33 }
 0xca4   :  { %2678 = vmatpush1.bf16.msra.mxu0 %v4693_v19  ;;  %2719 = vmatpush1.bf16.msra.mxu1 %v4695_v34 }
 0xca5   :  { %2679 = vmatprep.subr.bf16.mxu0 %v4701_v20  ;;  %2720 = vmatprep.subr.bf16.mxu1 %v4703_v35 }
 0xca8   :  { %2680 = vmatpush1.bf16.msra.mxu0 %v4705_v21  ;;  %2721 = vmatpush1.bf16.msra.mxu1 %v4707_v36 }
 0xca9   :  { %2681 = vmatprep.subr.bf16.mxu0 %v4713_v27  ;;  %2722 = vmatprep.subr.bf16.mxu1 %v4715_v29 }
 0xcac   :  { %2682 = vmatpush1.bf16.msra.mxu0 %v4717_v30  ;;  %2723 = vmatpush1.bf16.msra.mxu1 %v4719_v1 }
 0xcad   :  { %2683 = vmatprep.subr.bf16.mxu0 %v4725_v49  ;;  %2724 = vmatprep.subr.bf16.mxu1 %v4727_v52 }
 0xcb0   :  { %2684 = vmatpush1.bf16.msra.mxu0 %v4729_v48  ;;  %2725 = vmatpush1.bf16.msra.mxu1 %v4731_v8 }
 0xcb1   :  { %2785 = vmatprep.subr.bf16.mxu0 %v4641_v56  ;;  %2826 = vmatprep.subr.bf16.mxu1 %v4643_v44 }
 0xd66   :  { %v2587_v12 = vpop.f32.mrb[80].mxu0  ;;  %v2628_v13 = vpop.f32.mrb[80].mxu1 }
 0xd67   :  { %v2635_v15 = vadd.f32 %v2587_v12, %v1770_v6  ;;  %v2637_v16 = vadd.f32 %v2628_v13, %v1843_v40  ;;  %v2589_v17 = vpop.f32.mrb[81].mxu0  ;;  %v2630_v56 = vpop.f32.mrb[81].mxu1  ;;  %v5141_v6 = vld [vmem:[#allocation8 + $0xa0] ss:$16 sps:$4 sm:$0xff]   ;;  %v5147_v40 = vld [vmem:[#allocation8 + $0xc4] ss:$16 sps:$4 sm:$0xff]  }
 0xd68   :  { %v2636_v55 = vadd.f32 %v2589_v17, %v1772_v14  ;;  %v2638_v44 = vadd.f32 %v2630_v56, %v1845_v11  ;;  %v2591_v47 = vpop.f32.mrb[82].mxu0  ;;  %v2632_v33 = vpop.f32.mrb[82].mxu1  ;;  %v5153_v14 = vld [vmem:[#allocation8 + $0xc0] ss:$16 sps:$4 sm:$0xff]   ;;  %v5159_v11 = vld [vmem:[#allocation8 + $0xe4] ss:$16 sps:$4 sm:$0xff]  }
 0xd69   :  { %v3287_v19 = vmul.f32 -1.442695, %v2635_v15  ;;  %v2592_v34 = vpop.f32.mrb[83].mxu0  ;;  %v2633_v20 = vpop.f32.mrb[83].mxu1  ;;  %v5162_v12 = vld [vmem:[#allocation8 + $0xec] ss:$16 sps:$4 sm:$0xff]  }
 0xd6a   :  { %v3288_v35 = vmul.f32 -1.442695, %v2636_v55  ;;  %v3289_v21 = vmul.f32 -1.442695, %v2638_v44  ;;  %v5165_v13 = vld [vmem:[#allocation8 + $0xe0] ss:$16 sps:$4 sm:$0xff]  }
 0xd6b   :  { %3699 = vpow2.f32 %v3287_v19  ;;  %v5168_v15 = vld [vmem:[#allocation8 + $0xe8] ss:$16 sps:$4 sm:$0xff]   ;;  %v3826_v17 = vld [vmem:[#allocation8 + $0xc] ss:$16 sps:$4 sm:$0xff]   ;;  %v5374_v56 = vld [vmem:[#allocation23_spill] sm:$0xff] }
 0xd6c   :  { %3701 = vpow2.f32 %v3288_v35  ;;  %v1774_v55 = vadd.f32 %v5374_v56, %v4848_v57  ;;  %v5375_v44 = vld [vmem:[#allocation24_spill] sm:$0xff]  ;;  %v5376_v33 = vld [vmem:[#allocation25_spill] sm:$0xff]  ;;  %v5377_v34 = vld [vmem:[#allocation26_spill] sm:$0xff] }
 0xd6d   :  { %3703 = vpow2.f32 %v3289_v21  ;;  %v1847_v47 = vadd.f32 %v5375_v44, %v4852_v45  ;;  %v1776_v19 = vadd.f32 %v5376_v33, %v4860_v51  ;;  %v1849_v20 = vadd.f32 %v5377_v34, %v4864_v3 }
 0xd6e   :  { %3705 = vtanh.f32 %v2637_v16  ;;  %v3825_v16 = vld [vmem:[#allocation8 + $0x4] ss:$16 sps:$4 sm:$0xff]  }
 0xd75   :  { %v3700_v36 = vpop.eup %3699 }
 0xd76   :  { %v3702_v27 = vpop.eup %3701  ;;  %v2642_v29 = vadd.f32 1.0, %v3700_v36 }
 0xd77   :  { %v2648_v30 = vadd.f32 1.0, %v3702_v27  ;;  %v3704_v1 = vpop.eup %3703 }
 0xd78   :  { %3707 = vrcp.f32 %v2642_v29  ;;  %v3706_v49 = vpop.eup %3705  ;;  %v2655_v24 = vadd.f32 1.0, %v3704_v1 }
 0xd79   :  { %3709 = vrcp.f32 %v2648_v30 }
 0xd7a   :  { %3711 = vrcp.f32 %v2655_v24 }
 0xd82   :  { %v3708_v52 = vpop.eup %3707 }
 0xd83   :  { %v3710_v48 = vpop.eup %3709  ;;  %v2659_v8 = vmul.f32 %v3708_v52, %v3706_v49 }
 0xd84   :  { %v2658_v2 = vmul.f32 %v3710_v48, %v5024_v32  ;;  %v3712_v26 = vpop.eup %3711  ;;  %v5120_v32 = vld [vmem:[#allocation8 + $0x68] ss:$16 sps:$4 sm:$0xff]  }
 0xd86   :  { %v5073_v59 = vadd.f32 %v2659_v8, %v2658_v2 }
 0xd88   :  { %3713 = vtanh.f32 %v5073_v59 }
 0xd92   :  { %v3714_v25 = vpop.eup %3713 }
 0xd93   :  { %v2662_v58 = vmul.f32 %v3714_v25, %v3712_v26 }
 0xd95   :  { %v5077_v18 = vadd.f32 %v2662_v58, %v5028_v62  ;;  %v2668_v22 = vpack.c.bf16 %v2662_v58, %v2662_v58  ;;  %v5132_v62 = vld [vmem:[#allocation8 + $0x88] ss:$16 sps:$4 sm:$0xff]  }
 0xd97   :  { %2702 = vmatmul.mubr.bf16.vlgmr.msra.gmra.mrb[84].mxu0 %v2668_v22  ;;  %2743 = vmatmul.mubr.bf16.vlgmr.msra.gmra.mrb[84].mxu1 %v2668_v22 }
 0xd98   :  { %2786 = vmatpush1.bf16.msra.mxu0 %v5079_v41  ;;  %2827 = vmatpush1.bf16.msra.mxu1 %v5082_v0 }
 0xd99   :  { %2787 = vmatprep.subr.bf16.mxu0 %v5085_v37  ;;  %2828 = vmatprep.subr.bf16.mxu1 %v5088_v39 }
 0xd9a   :  { %2817 = vmatprep.mubr.bf16.mxu0 %v5313_v43  ;;  %2858 = vmatprep.mubr.bf16.mxu1 %v5313_v43 }
 0xd9c   :  { %2788 = vmatpush1.bf16.msra.mxu0 %v5093_v23  ;;  %2829 = vmatpush1.bf16.msra.mxu1 %v5096_v53 }
 0xd9d   :  { %2789 = vmatprep.subr.bf16.mxu0 %v5099_v63  ;;  %2830 = vmatprep.subr.bf16.mxu1 %v5102_v31 }
 0xda0   :  { %2790 = vmatpush1.bf16.msra.mxu0 %v5105_v28  ;;  %2831 = vmatpush1.bf16.msra.mxu1 %v5108_v46 }
 0xda1   :  { %2791 = vmatprep.subr.bf16.mxu0 %v5111_v5  ;;  %2832 = vmatprep.subr.bf16.mxu1 %v5114_v50 }
 0xda4   :  { %2792 = vmatpush1.bf16.msra.mxu0 %v5117_v54  ;;  %2833 = vmatpush1.bf16.msra.mxu1 %v5120_v32 }
 0xda5   :  { %2793 = vmatprep.subr.bf16.mxu0 %v5123_v42  ;;  %2834 = vmatprep.subr.bf16.mxu1 %v5126_v38 }
 0xda8   :  { %2794 = vmatpush1.bf16.msra.mxu0 %v5129_v9  ;;  %2835 = vmatpush1.bf16.msra.mxu1 %v5132_v62 }
 0xda9   :  { %2795 = vmatprep.subr.bf16.mxu0 %v5135_v60  ;;  %2836 = vmatprep.subr.bf16.mxu1 %v5138_v4 }
 0xdac   :  { %2796 = vmatpush1.bf16.msra.mxu0 %v5141_v6  ;;  %2837 = vmatpush1.bf16.msra.mxu1 %v5144_v7 }
 0xdad   :  { %2797 = vmatprep.subr.bf16.mxu0 %v5147_v40  ;;  %2838 = vmatprep.subr.bf16.mxu1 %v5150_v61 }
 0xdb0   :  { %2798 = vmatpush1.bf16.msra.mxu0 %v5153_v14  ;;  %2839 = vmatpush1.bf16.msra.mxu1 %v5156_v10 }
 0xdb1   :  { %2799 = vmatprep.subr.bf16.mxu0 %v5159_v11  ;;  %2840 = vmatprep.subr.bf16.mxu1 %v5162_v12 }
 0xdb4   :  { %2800 = vmatpush1.bf16.msra.mxu0 %v5165_v13  ;;  %2841 = vmatpush1.bf16.msra.mxu1 %v5168_v15 }
 0xdb5   :  { %2901 = vmatprep.subr.bf16.mxu0 %v3825_v16  ;;  %2942 = vmatprep.subr.bf16.mxu1 %v3826_v17 }
 0xe6a   :  { %v2703_v35 = vpop.f32.mrb[84].mxu0  ;;  %v2744_v21 = vpop.f32.mrb[84].mxu1 }
 0xe6b   :  { %v2751_v36 = vadd.f32 %v2703_v35, %v1774_v55  ;;  %v2753_v27 = vadd.f32 %v2744_v21, %v1847_v47  ;;  %v2705_v29 = vpop.f32.mrb[85].mxu0  ;;  %v2746_v30 = vpop.f32.mrb[85].mxu1 }
 0xe6c   :  { %v2752_v1 = vadd.f32 %v2705_v29, %v1776_v19  ;;  %v2754_v49 = vadd.f32 %v2746_v30, %v1849_v20  ;;  %v2707_v52 = vpop.f32.mrb[86].mxu0  ;;  %v2748_v48 = vpop.f32.mrb[86].mxu1 }
 0xe6d   :  { %v3290_v8 = vmul.f32 -1.442695, %v2751_v36  ;;  %v2708_v24 = vpop.f32.mrb[87].mxu0  ;;  %v2749_v2 = vpop.f32.mrb[87].mxu1 }
 0xe6e   :  { %v3291_v26 = vmul.f32 -1.442695, %v2752_v1  ;;  %v3292_v25 = vmul.f32 -1.442695, %v2754_v49  ;;  %v3499_v2 = vld [vmem:[%s5280_s7] sm:$0xff]  }
 0xe6f   :  { %3715 = vpow2.f32 %v3290_v8 }
 0xe70   :  { %3717 = vpow2.f32 %v3291_v26  ;;  %v3903_v26 = vmov 0.0  }
 0xe71   :  { %3719 = vpow2.f32 %v3292_v25  ;;  %v3500_v25 = vld [vmem:[%s5280_s7 + $0x8] sm:$0xff]  }
 0xe72   :  { %3721 = vtanh.f32 %v2753_v27 }
 0xe79   :  { %v3716_v58 = vpop.eup %3715 }
 0xe7a   :  { %v3718_v22 = vpop.eup %3717  ;;  %v2758_v16 = vadd.f32 1.0, %v3716_v58  ;;  %v3501_v58 = vld [vmem:[%s5280_s7 + $0x10] sm:$0xff]  }
 0xe7b   :  { %v2764_v17 = vadd.f32 1.0, %v3718_v22  ;;  %v3720_v56 = vpop.eup %3719  ;;  %v3502_v22 = vld [vmem:[%s5280_s7 + $0x18] sm:$0xff]  }
 0xe7c   :  { %3723 = vrcp.f32 %v2758_v16  ;;  %v3722_v55 = vpop.eup %3721  ;;  %v2771_v19 = vadd.f32 1.0, %v3720_v56  ;;  %v3503_v16 = vld [vmem:[%s5280_s7 + $0x20] sm:$0xff]   ;;  %v3505_v56 = vld [vmem:[%s5280_s7 + $0x30] sm:$0xff]  }
 0xe7d   :  { %3725 = vrcp.f32 %v2764_v17  ;;  %v3504_v17 = vld [vmem:[%s5280_s7 + $0x28] sm:$0xff]  }
 0xe7e   :  { %3727 = vrcp.f32 %v2771_v19 }
 0xe86   :  { %v3724_v44 = vpop.eup %3723 }
 0xe87   :  { %v3726_v47 = vpop.eup %3725  ;;  %v2775_v33 = vmul.f32 %v3724_v44, %v3722_v55  ;;  %v3506_v55 = vld [vmem:[%s5280_s7 + $0x38] sm:$0xff]   ;;  %v5382_v44 = vld [vmem:[#allocation31_spill] sm:$0xff] }
 0xe88   :  { %v2774_v34 = vmul.f32 %v3726_v47, %v5073_v59  ;;  %v3728_v35 = vpop.eup %3727  ;;  %v1784_v47 = vadd.f32 %v5382_v44, %v4848_v57 }
 0xe8a   :  { %v5180_v20 = vadd.f32 %v2775_v33, %v2774_v34  ;;  %v5383_v33 = vld [vmem:[#allocation32_spill] sm:$0xff]  ;;  %v5384_v34 = vld [vmem:[#allocation11_spill] sm:$0xff] }
 0xe8b   :  { %v1857_v19 = vadd.f32 %v5383_v33, %v4852_v45 }
 0xe8c   :  { %3729 = vtanh.f32 %v5180_v20 }
 0xe96   :  { %v3730_v21 = vpop.eup %3729 }
 0xe97   :  { %v2778_v36 = vmul.f32 %v3730_v21, %v3728_v35  ;;  %v5385_v35 = vld [vmem:[#allocation33_spill] sm:$0xff] }
 0xe98   :  { %v1859_v21 = vadd.f32 %v5385_v35, %v4864_v3 }
 0xe99   :  { %v5184_v27 = vadd.f32 %v2778_v36, %v5077_v18  ;;  %v2784_v29 = vpack.c.bf16 %v2778_v36, %v2778_v36  ;;  %v5379_v18 = vld [vmem:[#allocation28_spill] sm:$0xff] }
 0xe9b   :  { %2818 = vmatmul.mubr.bf16.vlgmr.msra.gmra.mrb[88].mxu0 %v2784_v29  ;;  %2859 = vmatmul.mubr.bf16.vlgmr.msra.gmra.mrb[88].mxu1 %v2784_v29 }
 0xe9c   :  { %2902 = vmatpush1.bf16.msra.mxu0 %v5079_v41  ;;  %2943 = vmatpush1.bf16.msra.mxu1 %v5082_v0  ;;  %v1853_v41 = vadd.f32 %v5379_v18, %v4852_v45  ;;  %v5380_v0 = vld [vmem:[#allocation29_spill] sm:$0xff] }
 0xe9d   :  { %2903 = vmatprep.subr.bf16.mxu0 %v5085_v37  ;;  %2944 = vmatprep.subr.bf16.mxu1 %v5088_v39  ;;  %v1782_v37 = vadd.f32 %v5380_v0, %v4860_v51  ;;  %v5381_v39 = vld [vmem:[#allocation30_spill] sm:$0xff] }
 0xe9e   :  { %2933 = vmatprep.mubr.bf16.mxu0 %v5313_v43  ;;  %2974 = vmatprep.mubr.bf16.mxu1 %v5313_v43  ;;  %v5378_v43 = vld [vmem:[#allocation27_spill] sm:$0xff] }
 0xe9f   :  { %v1780_v59 = vadd.f32 %v5378_v43, %v4848_v57 }
 0xea0   :  { %2904 = vmatpush1.bf16.msra.mxu0 %v5093_v23  ;;  %2945 = vmatpush1.bf16.msra.mxu1 %v5096_v53  ;;  %v1855_v23 = vadd.f32 %v5381_v39, %v4864_v3 }
 0xea1   :  { %2905 = vmatprep.subr.bf16.mxu0 %v5099_v63  ;;  %2946 = vmatprep.subr.bf16.mxu1 %v5102_v31 }
 0xea4   :  { %2906 = vmatpush1.bf16.msra.mxu0 %v5105_v28  ;;  %2947 = vmatpush1.bf16.msra.mxu1 %v5108_v46 }
 0xea5   :  { %2907 = vmatprep.subr.bf16.mxu0 %v5111_v5  ;;  %2948 = vmatprep.subr.bf16.mxu1 %v5114_v50 }
 0xea8   :  { %2908 = vmatpush1.bf16.msra.mxu0 %v5117_v54  ;;  %2949 = vmatpush1.bf16.msra.mxu1 %v5120_v32 }
 0xea9   :  { %2909 = vmatprep.subr.bf16.mxu0 %v5123_v42  ;;  %2950 = vmatprep.subr.bf16.mxu1 %v5126_v38 }
 0xeac   :  { %2910 = vmatpush1.bf16.msra.mxu0 %v5129_v9  ;;  %2951 = vmatpush1.bf16.msra.mxu1 %v5132_v62 }
 0xead   :  { %2911 = vmatprep.subr.bf16.mxu0 %v5135_v60  ;;  %2952 = vmatprep.subr.bf16.mxu1 %v5138_v4 }
 0xeb0   :  { %2912 = vmatpush1.bf16.msra.mxu0 %v5141_v6  ;;  %2953 = vmatpush1.bf16.msra.mxu1 %v5144_v7 }
 0xeb1   :  { %2913 = vmatprep.subr.bf16.mxu0 %v5147_v40  ;;  %2954 = vmatprep.subr.bf16.mxu1 %v5150_v61 }
 0xeb4   :  { %2914 = vmatpush1.bf16.msra.mxu0 %v5153_v14  ;;  %2955 = vmatpush1.bf16.msra.mxu1 %v5156_v10 }
 0xeb5   :  { %2915 = vmatprep.subr.bf16.mxu0 %v5159_v11  ;;  %2956 = vmatprep.subr.bf16.mxu1 %v5162_v12 }
 0xeb8   :  { %2916 = vmatpush1.bf16.msra.mxu0 %v5165_v13  ;;  %2957 = vmatpush1.bf16.msra.mxu1 %v5168_v15 }
 0xeb9   :  { %3317 = vmatprep.subr.bf16.mxu0 %v3903_v26 }
 0xf6e   :  { %v2819_v53 = vpop.f32.mrb[88].mxu0  ;;  %v2860_v63 = vpop.f32.mrb[88].mxu1 }
 0xf6f   :  { %v2867_v31 = vadd.f32 %v2819_v53, %v1780_v59  ;;  %v2869_v28 = vadd.f32 %v2860_v63, %v1853_v41  ;;  %v2821_v46 = vpop.f32.mrb[89].mxu0  ;;  %v2862_v5 = vpop.f32.mrb[89].mxu1 }
 0xf70   :  { %v2868_v50 = vadd.f32 %v2821_v46, %v1782_v37  ;;  %v2870_v54 = vadd.f32 %v2862_v5, %v1855_v23  ;;  %v2823_v32 = vpop.f32.mrb[90].mxu0  ;;  %v2864_v42 = vpop.f32.mrb[90].mxu1 }
 0xf71   :  { %v3293_v38 = vmul.f32 -1.442695, %v2867_v31  ;;  %v2824_v9 = vpop.f32.mrb[91].mxu0  ;;  %v2865_v62 = vpop.f32.mrb[91].mxu1 }
 0xf72   :  { %v3294_v60 = vmul.f32 -1.442695, %v2868_v50  ;;  %v3295_v4 = vmul.f32 -1.442695, %v2870_v54 }
 0xf73   :  { %3731 = vpow2.f32 %v3293_v38 }
 0xf74   :  { %3733 = vpow2.f32 %v3294_v60 }
 0xf75   :  { %3735 = vpow2.f32 %v3295_v4 }
 0xf76   :  { %3737 = vtanh.f32 %v2869_v28 }
 0xf7d   :  { %v3732_v6 = vpop.eup %3731 }
 0xf7e   :  { %v3734_v7 = vpop.eup %3733  ;;  %v2874_v40 = vadd.f32 1.0, %v3732_v6 }
 0xf7f   :  { %v2880_v61 = vadd.f32 1.0, %v3734_v7  ;;  %v3736_v14 = vpop.eup %3735 }
 0xf80   :  { %3739 = vrcp.f32 %v2874_v40  ;;  %v3738_v10 = vpop.eup %3737  ;;  %v2887_v15 = vadd.f32 1.0, %v3736_v14 }
 0xf81   :  { %3741 = vrcp.f32 %v2880_v61  ;;  %v3299_v61 = vld [vmem:[%s5281_s8] ss:$0 sm:$0xff] }
 0xf82   :  { %3743 = vrcp.f32 %v2887_v15 }
 0xf8a   :  { %v3740_v11 = vpop.eup %3739 }
 0xf8b   :  { %v3742_v12 = vpop.eup %3741  ;;  %v2891_v13 = vmul.f32 %v3740_v11, %v3738_v10 }
 0xf8c   :  { %v2890_v30 = vmul.f32 %v3742_v12, %v5180_v20  ;;  %v3744_v49 = vpop.eup %3743  ;;  %v1786_v20 = vadd.f32 %v5384_v34, %v4860_v51 }
 0xf8e   :  { %v5227_v1 = vadd.f32 %v2891_v13, %v2890_v30 }
 0xf90   :  { %3745 = vtanh.f32 %v5227_v1 }
 0xf9a   :  { %v3746_v52 = vpop.eup %3745 }
 0xf9b   :  { %v2894_v48 = vmul.f32 %v3746_v52, %v3744_v49 }
 0xf9d   :  { %v2900_v8 = vpack.c.bf16 %v2894_v48, %v2894_v48  ;;  %v5231_v24 = vadd.f32 %v2894_v48, %v5184_v27 }
 0xf9f   :  { %2934 = vmatmul.mubr.bf16.vlgmr.msra.gmra.mrb[92].mxu0 %v2900_v8  ;;  %2975 = vmatmul.mubr.bf16.vlgmr.msra.gmra.mrb[92].mxu1 %v2900_v8 }
 0xfa0   :  { %3318 = vmatpush3.bf16.msra.mxu0 %v3499_v2  ;;  %3333 = vmatprep.mubr.msk.bf16.mxu0 %vm3904_vm1, %v3903_v26 }
 0xfa1   :  { %3319 = vmatprep.subr.bf16.mxu0 %v3903_v26 }
 0xfa4   :  { %3320 = vmatpush3.bf16.msra.mxu0 %v3500_v25 }
 0xfa5   :  { %3321 = vmatprep.subr.bf16.mxu0 %v3903_v26 }
 0xfa8   :  { %3322 = vmatpush3.bf16.msra.mxu0 %v3501_v58 }
 0xfa9   :  { %3323 = vmatprep.subr.bf16.mxu0 %v3903_v26 }
 0xfac   :  { %3324 = vmatpush3.bf16.msra.mxu0 %v3502_v22 }
 0xfad   :  { %3325 = vmatprep.subr.bf16.mxu0 %v3903_v26 }
 0xfb0   :  { %3326 = vmatpush3.bf16.msra.mxu0 %v3503_v16 }
 0xfb1   :  { %3327 = vmatprep.subr.bf16.mxu0 %v3903_v26 }
 0xfb4   :  { %3328 = vmatpush3.bf16.msra.mxu0 %v3504_v17 }
 0xfb5   :  { %3329 = vmatprep.subr.bf16.mxu0 %v3903_v26 }
 0xfb8   :  { %3330 = vmatpush3.bf16.msra.mxu0 %v3505_v56 }
 0xfb9   :  { %3331 = vmatprep.subr.bf16.mxu0 %v3903_v26 }
 0xfbc   :  { %3332 = vmatpush3.bf16.msra.mxu0 %v3506_v55 }
0x1072   :  { %v2935_v36 = vpop.f32.mrb[92].mxu0  ;;  %v2976_v27 = vpop.f32.mrb[92].mxu1 }
0x1073   :  { %v2983_v29 = vadd.f32 %v2935_v36, %v1784_v47  ;;  %v2985_v43 = vadd.f32 %v2976_v27, %v1857_v19  ;;  %v2937_v59 = vpop.f32.mrb[93].mxu0  ;;  %v2978_v18 = vpop.f32.mrb[93].mxu1 }
0x1074   :  { %v2984_v41 = vadd.f32 %v2937_v59, %v1786_v20  ;;  %v2986_v0 = vadd.f32 %v2978_v18, %v1859_v21  ;;  %v2939_v37 = vpop.f32.mrb[94].mxu0  ;;  %v2980_v39 = vpop.f32.mrb[94].mxu1 }
0x1075   :  { %v3296_v57 = vmul.f32 -1.442695, %v2983_v29  ;;  %v2940_v23 = vpop.f32.mrb[95].mxu0  ;;  %v2981_v53 = vpop.f32.mrb[95].mxu1 }
0x1076   :  { %v3297_v45 = vmul.f32 -1.442695, %v2984_v41  ;;  %v3298_v51 = vmul.f32 -1.442695, %v2986_v0 }
0x1077   :  { %3747 = vpow2.f32 %v3296_v57 }
0x1078   :  { %3749 = vpow2.f32 %v3297_v45 }
0x1079   :  { %3751 = vpow2.f32 %v3298_v51 }
0x107a   :  { %3753 = vtanh.f32 %v2985_v43 }
0x1081   :  { %v3748_v63 = vpop.eup %3747 }
0x1082   :  { %v3750_v31 = vpop.eup %3749  ;;  %v2990_v3 = vadd.f32 1.0, %v3748_v63 }
0x1083   :  { %v2996_v28 = vadd.f32 1.0, %v3750_v31  ;;  %v3752_v46 = vpop.eup %3751 }
0x1084   :  { %3755 = vrcp.f32 %v2990_v3  ;;  %v3754_v5 = vpop.eup %3753  ;;  %v3003_v42 = vadd.f32 1.0, %v3752_v46 }
0x1085   :  { %3757 = vrcp.f32 %v2996_v28 }
0x1086   :  { %3759 = vrcp.f32 %v3003_v42 }
0x108e   :  { %v3756_v50 = vpop.eup %3755 }
0x108f   :  { %v3758_v54 = vpop.eup %3757  ;;  %v3007_v32 = vmul.f32 %v3756_v50, %v3754_v5 }
0x1090   :  { %v3006_v38 = vmul.f32 %v3758_v54, %v5227_v1  ;;  %v3760_v62 = vpop.eup %3759 }
0x1092   :  { %v3008_v9 = vadd.f32 %v3007_v32, %v3006_v38 }
0x1094   :  { %3761 = vtanh.f32 %v3008_v9 }
0x109e   :  { %v3762_v60 = vpop.eup %3761 }
0x109f   :  { %v3010_v4 = vmul.f32 %v3762_v60, %v3760_v62 }
0x10a1   :  { %v3011_v6 = vadd.f32 %v3010_v4, %v5231_v24 }
0x10a3   :  { %v3012_v7 = vmul.f32 0.125, %v3011_v6 }
0x10a5   :  { %v3013_v40 = vpack.c.bf16 %v3012_v7, %v3012_v7 }
0x10a7   :  { %3334 = vmatmul.mubr.bf16.vlgmr.msra.gmra.mrb[96].mxu0 %v3013_v40 }
0x117a   :  { %v3119_v14 = vpop.f32.mrb[96].mxu0 }
0x117b   :  { %v3120_v10 = vadd.f32 %v3299_v61, %v3119_v14  ;;  %v3335_v11 = vpop.f32.mrb[97].mxu0 }
0x117c   :  { %v3122_v12 = vpop.f32.mrb[98].mxu0 }
0x117d   :  { %3125 = vst [vmem:[%s5282_s9] sm:$0xff] %v3120_v10  ;;  %v3336_v13 = vpop.f32.mrb[99].mxu0 }
0x117e   :  { %3130 = vsyncpa [#allocation5], 1 }
0x117f   :  { %3131 = vsyncpa [#allocation7], 1 }

</bundles_post_ra>
